<compile_context>
chip_gen: v7x
topology: tpu7x:2x2x1
jax: 0.10.0
libtpu: 0.0.40
codegen_flags: <defaults>
</compile_context>

<pallas_src>
import functools

import jax
import jax.numpy as jnp
from jax.experimental import pallas as pl
from jax.experimental.pallas import tpu as pltpu

EPS = 1e-5
LANES = 128
NCORES = 2                      # megacore split for pass 1 (harmless on 1-TC chips)
VMEM_LIMIT = 48 * 1024 * 1024   # <= v7x 64 MiB physical; sweep higher on v5e/v6e
TM_CONV = 256                   # per-core row tile for the conv+stats pass


# ---------------- Pallas kernels: pass 1 (conv matmul + BN statistics) ----------------

def conv_stats_kernel(a_ref, w_ref, y_ref, sum_ref, sq_ref):
    """Conv tile (im2col matmul, bf16 in / f32 acc) + per-channel partial stats."""
    acc = jnp.dot(a_ref[...], w_ref[...], preferred_element_type=jnp.float32)
    y_ref[...] = acc.astype(y_ref.dtype)          # bf16 intermediate: halves HBM stream

    @pl.when(pl.program_id(1) == 0)               # init per-core resident accumulators
    def _():
        sum_ref[...] = jnp.zeros_like(sum_ref)
        sq_ref[...] = jnp.zeros_like(sq_ref)

    sum_ref[...] += jnp.sum(acc, axis=0, keepdims=True)
    sq_ref[...] += jnp.sum(acc * acc, axis=0, keepdims=True)


def conv_proj_stats_kernel(a_ref, w_ref, s_ref, ws_ref,
                           y_ref, ysc_ref, sum_ref, sq_ref, sums_ref, sqs_ref):
    """Conv2 plus the 1x1 projection shortcut, sharing the same row grid."""
    acc = jnp.dot(a_ref[...], w_ref[...], preferred_element_type=jnp.float32)
    sc = jnp.dot(s_ref[...], ws_ref[...], preferred_element_type=jnp.float32)
    y_ref[...] = acc.astype(y_ref.dtype)
    ysc_ref[...] = sc.astype(ysc_ref.dtype)

    @pl.when(pl.program_id(1) == 0)
    def _():
        sum_ref[...] = jnp.zeros_like(sum_ref)
        sq_ref[...] = jnp.zeros_like(sq_ref)
        sums_ref[...] = jnp.zeros_like(sums_ref)
        sqs_ref[...] = jnp.zeros_like(sqs_ref)

    sum_ref[...] += jnp.sum(acc, axis=0, keepdims=True)
    sq_ref[...] += jnp.sum(acc * acc, axis=0, keepdims=True)
    sums_ref[...] += jnp.sum(sc, axis=0, keepdims=True)
    sqs_ref[...] += jnp.sum(sc * sc, axis=0, keepdims=True)


# ---------------- Pallas kernels: pass 2 (folded BN affine + residual + ReLU) ----------------

def scale_relu_kernel(y_ref, a_ref, b_ref, o_ref):
    y = y_ref[...].astype(jnp.float32)
    o_ref[...] = jnp.maximum(y * a_ref[...] + b_ref[...], 0.0).astype(o_ref.dtype)


def scale_add_relu_kernel(y_ref, a_ref, b_ref, r_ref, o_ref):
    y = y_ref[...].astype(jnp.float32)
    r = r_ref[...].astype(jnp.float32)
    o_ref[...] = jnp.maximum(y * a_ref[...] + b_ref[...] + r, 0.0).astype(o_ref.dtype)


def scale_add_proj_relu_kernel(y_ref, a_ref, b_ref, ysc_ref, as_ref, bs_ref, o_ref):
    y = y_ref[...].astype(jnp.float32)
    sc = ysc_ref[...].astype(jnp.float32)
    out = (y * a_ref[...] + b_ref[...]) + (sc * as_ref[...] + bs_ref[...])
    o_ref[...] = jnp.maximum(out, 0.0).astype(o_ref.dtype)


# ---------------- pallas_call wrappers ----------------

def _conv_stats_call(a, w, tm):
    mpad, k = a.shape
    fp = w.shape[1]
    steps = mpad // (NCORES * tm)
    row = lambda c, i: (c * steps + i, 0)
    stat_spec = pl.BlockSpec((None, 1, fp), lambda c, i: (c, 0, 0))
    stat_shape = jax.ShapeDtypeStruct((NCORES, 1, fp), jnp.float32)
    flops = 2 * mpad * k * fp
    bytes_accessed = (a.size * a.dtype.itemsize + w.size * w.dtype.itemsize
                      + mpad * fp * 2 + 2 * NCORES * fp * 4)
    y, s, q = pl.pallas_call(
        conv_stats_kernel,
        grid_spec=pltpu.PrefetchScalarGridSpec(
            num_scalar_prefetch=0,
            grid=(NCORES, steps),
            in_specs=[pl.BlockSpec((tm, k), row),
                      pl.BlockSpec((k, fp), lambda c, i: (0, 0))],
            out_specs=[pl.BlockSpec((tm, fp), row), stat_spec, stat_spec]),
        out_shape=(jax.ShapeDtypeStruct((mpad, fp), jnp.bfloat16),
                   stat_shape, stat_shape),
        compiler_params=pltpu.CompilerParams(
            dimension_semantics=("parallel", "arbitrary"),
            vmem_limit_bytes=VMEM_LIMIT),
        cost_estimate=pl.CostEstimate(flops=flops, transcendentals=0,
                                      bytes_accessed=bytes_accessed),
    )(a, w)
    return y, jnp.sum(s, axis=0), jnp.sum(q, axis=0)


def _conv_proj_stats_call(a, w, s_in, ws, tm):
    mpad, k = a.shape
    fp = w.shape[1]
    cin = s_in.shape[1]
    steps = mpad // (NCORES * tm)
    row = lambda c, i: (c * steps + i, 0)
    stat_spec = pl.BlockSpec((None, 1, fp), lambda c, i: (c, 0, 0))
    stat_shape = jax.ShapeDtypeStruct((NCORES, 1, fp), jnp.float32)
    flops = 2 * mpad * (k + cin) * fp
    bytes_accessed = (a.size * a.dtype.itemsize + w.size * w.dtype.itemsize
                      + s_in.size * s_in.dtype.itemsize + ws.size * ws.dtype.itemsize
                      + 2 * mpad * fp * 2 + 4 * NCORES * fp * 4)
    y, ysc, s, q, ss, qs = pl.pallas_call(
        conv_proj_stats_kernel,
        grid_spec=pltpu.PrefetchScalarGridSpec(
            num_scalar_prefetch=0,
            grid=(NCORES, steps),
            in_specs=[pl.BlockSpec((tm, k), row),
                      pl.BlockSpec((k, fp), lambda c, i: (0, 0)),
                      pl.BlockSpec((tm, cin), row),
                      pl.BlockSpec((cin, fp), lambda c, i: (0, 0))],
            out_specs=[pl.BlockSpec((tm, fp), row), pl.BlockSpec((tm, fp), row),
                       stat_spec, stat_spec, stat_spec, stat_spec]),
        out_shape=(jax.ShapeDtypeStruct((mpad, fp), jnp.bfloat16),
                   jax.ShapeDtypeStruct((mpad, fp), jnp.bfloat16),
                   stat_shape, stat_shape, stat_shape, stat_shape),
        compiler_params=pltpu.CompilerParams(
            dimension_semantics=("parallel", "arbitrary"),
            vmem_limit_bytes=VMEM_LIMIT),
        cost_estimate=pl.CostEstimate(flops=flops, transcendentals=0,
                                      bytes_accessed=bytes_accessed),
    )(a, w, s_in, ws)
    return (y, ysc, jnp.sum(s, axis=0), jnp.sum(q, axis=0),
            jnp.sum(ss, axis=0), jnp.sum(qs, axis=0))


def _epilogue_call(kernel, args, tm, out_dtype):
    """Row-tiled affine(+residual)+ReLU pass; args mix (Mpad,Fp) rows and (1,Fp) vectors."""
    mpad, fp = [a.shape for a in args if a.shape[0] != 1][0]
    in_specs = []
    for a in args:
        if a.shape[0] == 1:
            in_specs.append(pl.BlockSpec((1, fp), lambda i: (0, 0)))
        else:
            in_specs.append(pl.BlockSpec((tm, fp), lambda i: (i, 0)))
    return pl.pallas_call(
        kernel,
        grid_spec=pltpu.PrefetchScalarGridSpec(
            num_scalar_prefetch=0,
            grid=(mpad // tm,),
            in_specs=in_specs,
            out_specs=pl.BlockSpec((tm, fp), lambda i: (i, 0))),
        out_shape=jax.ShapeDtypeStruct((mpad, fp), out_dtype),
        compiler_params=pltpu.CompilerParams(
            dimension_semantics=("parallel",),   # splits across TCs on v7x
            vmem_limit_bytes=VMEM_LIMIT),
    )(*args)


# ---------------- XLA-side glue ----------------

def _im2col(x_nhwc, ksize, stride, pad):
    N, H, W, C = x_nhwc.shape
    Ho = (H + 2 * pad - ksize) // stride + 1
    Wo = (W + 2 * pad - ksize) // stride + 1
    xp = jnp.pad(x_nhwc, ((0, 0), (pad, pad), (pad, pad), (0, 0)))
    cols = []
    for ki in range(ksize):
        for kj in range(ksize):
            cols.append(xp[:, ki:ki + stride * Ho:stride,
                           kj:kj + stride * Wo:stride, :])
    patches = jnp.concatenate(cols, axis=-1)   # (N, Ho, Wo, K*K*C), (ki,kj,c) order
    return patches.reshape(N * Ho * Wo, ksize * ksize * C), Ho, Wo


def _round_up(x, m):
    return (x + m - 1) // m * m


def _pick_tm(m, target):
    per_core = -(-m // NCORES)
    tm = min(target, _round_up(per_core, 16))
    return max(16, tm - tm % 16)


def _pad_rows(x, mpad):
    if x.shape[0] == mpad:
        return x
    return jnp.pad(x, ((0, mpad - x.shape[0]),) + ((0, 0),) * (x.ndim - 1))


def _pad_lanes(x, target):
    pad = target - x.shape[-1]
    if pad <= 0:
        return x
    return jnp.pad(x, [(0, 0)] * (x.ndim - 1) + [(0, pad)])


def _fold_bn(s, q, g, b, inv_m):
    # Training-mode BN (biased variance) folded to a per-channel affine (tiny (1,F) math).
    mean = s * inv_m
    var = jnp.maximum(q * inv_m - mean * mean, 0.0)
    scale = g * jax.lax.rsqrt(var + EPS)
    return scale, b - mean * scale


def shallow_block_forward(x_nchw, params, *, stride=1, filter_expand=1, tm=TM_CONV):
    N, Cin, H, W = x_nchw.shape
    F = params["w1"].shape[0]
    Fp = pl.cdiv(F, LANES) * LANES                       # lane-dense channels
    x = jnp.transpose(x_nchw, (0, 2, 3, 1)).astype(jnp.float32)   # NCHW -> NHWC

    # ---- conv1 (3x3, stride, pad=1) + bn1 + relu ----
    a1, Ho, Wo = _im2col(x, 3, stride, 1)
    M = N * Ho * Wo
    tm = _pick_tm(M, tm)
    mpad = _round_up(M, NCORES * tm)                     # zero rows: no effect on stats
    tm_epi = NCORES * tm                                 # always divides mpad

    w1 = _pad_lanes(jnp.transpose(params["w1"], (2, 3, 1, 0)).reshape(9 * Cin, F), Fp)
    # NOTE: conv biases b1/b2 are intentionally NOT passed: a bias before
    # training-mode BatchNorm is cancelled exactly by the mean subtraction.
    y1, s1, q1 = _conv_stats_call(
        _pad_rows(a1, mpad).astype(jnp.bfloat16), w1.astype(jnp.bfloat16), tm)
    sc1, sh1 = _fold_bn(s1, q1,
                        _pad_lanes(params["g1"].reshape(1, F), Fp),
                        _pad_lanes(params["be1"].reshape(1, F), Fp), 1.0 / M)
    h = _epilogue_call(scale_relu_kernel, (y1, sc1, sh1), tm_epi, jnp.bfloat16)

    # ---- conv2 (3x3, stride=1, 'same') + bn2 + shortcut + add + relu ----
    h_nhwc = h[:M, :F].reshape(N, Ho, Wo, F)             # already bf16
    a2, _, _ = _im2col(h_nhwc, 3, 1, 1)
    w2 = _pad_lanes(jnp.transpose(params["w2"], (2, 3, 1, 0)).reshape(9 * F, F), Fp)
    g2 = _pad_lanes(params["g2"].reshape(1, F), Fp)
    be2 = _pad_lanes(params["be2"].reshape(1, F), Fp)

    use_proj = (stride == 2) or (Cin != F * filter_expand)
    if use_proj:
        xs = x[:, ::stride, ::stride, :].reshape(M, Cin)
        ws = _pad_lanes(jnp.transpose(params["ws"][:, :, 0, 0], (1, 0)), Fp)
        y2, ysc, s2, q2, ss, qs = _conv_proj_stats_call(
            _pad_rows(a2, mpad).astype(jnp.bfloat16), w2.astype(jnp.bfloat16),
            _pad_rows(xs, mpad).astype(jnp.bfloat16), ws.astype(jnp.bfloat16), tm)
        sc2, sh2 = _fold_bn(s2, q2, g2, be2, 1.0 / M)
        scs, shs = _fold_bn(ss, qs,
                            _pad_lanes(params["gs"].reshape(1, F), Fp),
                            _pad_lanes(params["bes"].reshape(1, F), Fp), 1.0 / M)
        out = _epilogue_call(scale_add_proj_relu_kernel,
                             (y2, sc2, sh2, ysc, scs, shs), tm_epi, jnp.float32)
    else:
        res = _pad_rows(_pad_lanes(x.reshape(M, Cin), Fp), mpad).astype(jnp.bfloat16)
        y2, s2, q2 = _conv_stats_call(
            _pad_rows(a2, mpad).astype(jnp.bfloat16), w2.astype(jnp.bfloat16), tm)
        sc2, sh2 = _fold_bn(s2, q2, g2, be2, 1.0 / M)
        out = _epilogue_call(scale_add_relu_kernel,
                             (y2, sc2, sh2, res), tm_epi, jnp.float32)

    out = out[:M, :F].reshape(N, Ho, Wo, F)
    return jnp.transpose(out, (0, 3, 1, 2))              # NHWC -> NCHW


# ---------------- pure-JAX reference (for self-check) ----------------

def _reference_forward(x, p, *, stride=1, filter_expand=1):
    def conv(v, w, s, pad):
        return jax.lax.conv_general_dilated(
            v, w, window_strides=(s, s), padding=((pad, pad), (pad, pad)),
            dimension_numbers=("NCHW", "OIHW", "NCHW"))

    def bn(v, g, b):
        m = jnp.mean(v, axis=(0, 2, 3), keepdims=True)
        var = jnp.mean((v - m) ** 2, axis=(0, 2, 3), keepdims=True)
        return ((v - m) * jax.lax.rsqrt(var + EPS) * g.reshape(1, -1, 1, 1)
                + b.reshape(1, -1, 1, 1))

    Cin = x.shape[1]
    F = p["w1"].shape[0]
    h = conv(x, p["w1"], stride, 1) + p["b1"].reshape(1, -1, 1, 1)
    h = jnp.maximum(bn(h, p["g1"], p["be1"]), 0.0)
    y = conv(h, p["w2"], 1, 1) + p["b2"].reshape(1, -1, 1, 1)
    y = bn(y, p["g2"], p["be2"])
    if stride == 2 or Cin != F * filter_expand:
        sc = bn(conv(x, p["ws"], stride, 0), p["gs"], p["bes"])
    else:
        sc = x
    return jnp.maximum(y + sc, 0.0)


def _make_params(key, Cin, F, with_proj):
    ks = jax.random.split(key, 12)
    p = {
        "w1": 0.1 * jax.random.normal(ks[0], (F, Cin, 3, 3), jnp.float32),
        "b1": 0.1 * jax.random.normal(ks[1], (F,), jnp.float32),
        "g1": 1.0 + 0.1 * jax.random.normal(ks[2], (F,), jnp.float32),
        "be1": 0.1 * jax.random.normal(ks[3], (F,), jnp.float32),
        "w2": 0.1 * jax.random.normal(ks[4], (F, F, 3, 3), jnp.float32),
        "b2": 0.1 * jax.random.normal(ks[5], (F,), jnp.float32),
        "g2": 1.0 + 0.1 * jax.random.normal(ks[6], (F,), jnp.float32),
        "be2": 0.1 * jax.random.normal(ks[7], (F,), jnp.float32),
    }
    if with_proj:
        p["ws"] = 0.1 * jax.random.normal(ks[8], (F, Cin, 1, 1), jnp.float32)
        p["gs"] = 1.0 + 0.1 * jax.random.normal(ks[9], (F,), jnp.float32)
        p["bes"] = 0.1 * jax.random.normal(ks[10], (F,), jnp.float32)
    return p


if __name__ == "__main__":
    key = jax.random.PRNGKey(0)
    k1, k2, kx1, kx2 = jax.random.split(key, 4)

    # Case 1: projection shortcut (Cin != filters), stride=1.
    N, Cin, H, W, F = 2, 4, 16, 16, 8
    params = _make_params(k1, Cin, F, with_proj=True)
    x = jax.random.normal(kx1, (N, Cin, H, W), jnp.float32)
    fwd = jax.jit(functools.partial(shallow_block_forward,
                                    stride=1, filter_expand=1))
    y = jax.block_until_ready(fwd(x, params))
    assert y.shape == (N, F, H, W), y.shape
    assert bool(jnp.all(jnp.isfinite(y)))
    assert bool(jnp.all(y >= 0.0))            # final ReLU
    y_ref = _reference_forward(x, params, stride=1, filter_expand=1)
    err = float(jnp.max(jnp.abs(y - y_ref)))
    assert err < 2e-1, f"projection-path max abs err too large: {err}"

    # Case 2: identity shortcut (Cin == filters), stride=1.
    N2, C2, H2, W2 = 2, 8, 8, 8
    params2 = _make_params(k2, C2, C2, with_proj=False)
    x2 = jax.random.normal(kx2, (N2, C2, H2, W2), jnp.float32)
    y2 = jax.block_until_ready(
        jax.jit(functools.partial(shallow_block_forward,
                                  stride=1, filter_expand=1))(x2, params2))
    assert y2.shape == (N2, C2, H2, W2), y2.shape
    assert bool(jnp.all(jnp.isfinite(y2)))
    assert bool(jnp.all(y2 >= 0.0))
    y2_ref = _reference_forward(x2, params2, stride=1, filter_expand=1)
    err2 = float(jnp.max(jnp.abs(y2 - y2_ref)))
    assert err2 < 2e-1, f"identity-path max abs err too large: {err2}"

    # Case 3: strided projection shortcut (stride=2) — downsampling path.
    y3 = jax.block_until_ready(
        jax.jit(functools.partial(shallow_block_forward,
                                  stride=2, filter_expand=1))(x, params))
    assert y3.shape == (N, F, H // 2, W // 2), y3.shape
    assert bool(jnp.all(jnp.isfinite(y3)))
    assert bool(jnp.all(y3 >= 0.0))
    y3_ref = _reference_forward(x, params, stride=2, filter_expand=1)
    err3 = float(jnp.max(jnp.abs(y3 - y3_ref)))
    assert err3 < 2e-1, f"stride-2 path max abs err too large: {err3}"

    print("KERNEL_OK")
</pallas_src>

<mosaic_0001>
module attributes {stable_mosaic.version = 11 : i64} {
  func.func @conv_stats_kernel(%arg0: i32, %arg1: i32, %arg2: memref<256x36xbf16, #tpu.memory_space<vmem>>, %arg3: memref<36x128xbf16, #tpu.memory_space<vmem>>, %arg4: memref<256x128xbf16, #tpu.memory_space<vmem>>, %arg5: memref<1x1x128xf32, #tpu.memory_space<vmem>>, %arg6: memref<1x1x128xf32, #tpu.memory_space<vmem>>) attributes {dimension_semantics = [#tpu.dimension_semantics<parallel>, #tpu.dimension_semantics<arbitrary>], iteration_bounds = array<i64: 2, 1>, scalar_prefetch = 0 : i64, scratch_operands = 0 : i64, tpu.core_type = #tpu.core_type<tc>, window_params = [{transform_indices = @transform_0, window_bounds = array<i64: 256, 36>}, {pipeline_mode = #tpu.pipeline_mode<synchronous>, transform_indices = @transform_1, window_bounds = array<i64: 36, 128>}, {transform_indices = @transform_2, window_bounds = array<i64: 256, 128>}, {transform_indices = @transform_3, window_bounds = array<i64: 1, 1, 128>}, {transform_indices = @transform_4, window_bounds = array<i64: 1, 1, 128>}]} {
    %c0 = arith.constant 0 : index
    %c0_0 = arith.constant 0 : index
    %0 = vector.load %arg2[%c0, %c0_0] : memref<256x36xbf16, #tpu.memory_space<vmem>>, vector<256x36xbf16>
    %c0_1 = arith.constant 0 : index
    %c0_2 = arith.constant 0 : index
    %1 = vector.load %arg3[%c0_1, %c0_2] : memref<36x128xbf16, #tpu.memory_space<vmem>>, vector<36x128xbf16>
    %cst = arith.constant dense<0.000000e+00> : vector<256x128xf32>
    %2 = tpu.matmul %0, %1, %cst {dimension_numbers = #tpu.dot_dimension_numbers<[1], [0], [0], [1], [0, 0, 1, 1], [], []>} : vector<256x36xbf16>, vector<36x128xbf16>, vector<256x128xf32> -> vector<256x128xf32>
    %3 = arith.truncf %2 : vector<256x128xf32> to vector<256x128xbf16>
    %c0_3 = arith.constant 0 : index
    %c0_4 = arith.constant 0 : index
    %4 = vector.load %arg4[%c0_3, %c0_4] : memref<256x128xbf16, #tpu.memory_space<vmem>>, vector<256x128xbf16>
    tpu.vector_store %arg4[%c0_3, %c0_4], %3 {strides = array<i32>} : memref<256x128xbf16, #tpu.memory_space<vmem>>, vector<256x128xbf16>,
    %c0_i32 = arith.constant 0 : i32
    %5 = arith.cmpi eq, %arg1, %c0_i32 : i32
    %6 = arith.extui %5 : i1 to i32
    %c0_i32_5 = arith.constant 0 : i32
    %7 = arith.cmpi ne, %6, %c0_i32_5 : i32
    scf.if %7 {
      %cst_20 = arith.constant 0.000000e+00 : f32
      %25 = vector.broadcast %cst_20 : f32 to vector<1x128xf32>
      %c0_21 = arith.constant 0 : index
      %c0_22 = arith.constant 0 : index
      %c0_23 = arith.constant 0 : index
      %26 = vector.load %arg5[%c0_21, %c0_22, %c0_23] : memref<1x1x128xf32, #tpu.memory_space<vmem>>, vector<1x1x128xf32>
      %27 = vector.shape_cast %26 : vector<1x1x128xf32> to vector<1x128xf32>
      %28 = vector.shape_cast %25 : vector<1x128xf32> to vector<1x1x128xf32>
      tpu.vector_store %arg5[%c0_21, %c0_22, %c0_23], %28 {strides = array<i32>} : memref<1x1x128xf32, #tpu.memory_space<vmem>>, vector<1x1x128xf32>,
      %cst_24 = arith.constant 0.000000e+00 : f32
      %29 = vector.broadcast %cst_24 : f32 to vector<1x128xf32>
      %c0_25 = arith.constant 0 : index
      %c0_26 = arith.constant 0 : index
      %c0_27 = arith.constant 0 : index
      %30 = vector.load %arg6[%c0_25, %c0_26, %c0_27] : memref<1x1x128xf32, #tpu.memory_space<vmem>>, vector<1x1x128xf32>
      %31 = vector.shape_cast %30 : vector<1x1x128xf32> to vector<1x128xf32>
      %32 = vector.shape_cast %29 : vector<1x128xf32> to vector<1x1x128xf32>
      tpu.vector_store %arg6[%c0_25, %c0_26, %c0_27], %32 {strides = array<i32>} : memref<1x1x128xf32, #tpu.memory_space<vmem>>, vector<1x1x128xf32>,
    } else {
    }
    %c0_6 = arith.constant 0 : index
    %c0_7 = arith.constant 0 : index
    %c0_8 = arith.constant 0 : index
    %8 = vector.load %arg5[%c0_6, %c0_7, %c0_8] : memref<1x1x128xf32, #tpu.memory_space<vmem>>, vector<1x1x128xf32>
    %9 = vector.shape_cast %8 : vector<1x1x128xf32> to vector<1x128xf32>
    %cst_9 = arith.constant dense<0.000000e+00> : vector<128xf32>
    %10 = vector.multi_reduction <add>, %2, %cst_9 [0] : vector<256x128xf32> to vector<128xf32>
    %11 = vector.shape_cast %10 : vector<128xf32> to vector<1x128xf32>
    %12 = arith.addf %9, %11 : vector<1x128xf32>
    %c0_10 = arith.constant 0 : index
    %c0_11 = arith.constant 0 : index
    %c0_12 = arith.constant 0 : index
    %13 = vector.load %arg5[%c0_10, %c0_11, %c0_12] : memref<1x1x128xf32, #tpu.memory_space<vmem>>, vector<1x1x128xf32>
    %14 = vector.shape_cast %13 : vector<1x1x128xf32> to vector<1x128xf32>
    %15 = vector.shape_cast %12 : vector<1x128xf32> to vector<1x1x128xf32>
    tpu.vector_store %arg5[%c0_10, %c0_11, %c0_12], %15 {strides = array<i32>} : memref<1x1x128xf32, #tpu.memory_space<vmem>>, vector<1x1x128xf32>,
    %c0_13 = arith.constant 0 : index
    %c0_14 = arith.constant 0 : index
    %c0_15 = arith.constant 0 : index
    %16 = vector.load %arg6[%c0_13, %c0_14, %c0_15] : memref<1x1x128xf32, #tpu.memory_space<vmem>>, vector<1x1x128xf32>
    %17 = vector.shape_cast %16 : vector<1x1x128xf32> to vector<1x128xf32>
    %18 = arith.mulf %2, %2 : vector<256x128xf32>
    %cst_16 = arith.constant dense<0.000000e+00> : vector<128xf32>
    %19 = vector.multi_reduction <add>, %18, %cst_16 [0] : vector<256x128xf32> to vector<128xf32>
    %20 = vector.shape_cast %19 : vector<128xf32> to vector<1x128xf32>
    %21 = arith.addf %17, %20 : vector<1x128xf32>
    %c0_17 = arith.constant 0 : index
    %c0_18 = arith.constant 0 : index
    %c0_19 = arith.constant 0 : index
    %22 = vector.load %arg6[%c0_17, %c0_18, %c0_19] : memref<1x1x128xf32, #tpu.memory_space<vmem>>, vector<1x1x128xf32>
    %23 = vector.shape_cast %22 : vector<1x1x128xf32> to vector<1x128xf32>
    %24 = vector.shape_cast %21 : vector<1x128xf32> to vector<1x1x128xf32>
    tpu.vector_store %arg6[%c0_17, %c0_18, %c0_19], %24 {strides = array<i32>} : memref<1x1x128xf32, #tpu.memory_space<vmem>>, vector<1x1x128xf32>,
    return
  }
  func.func @transform_0(%arg0: i32, %arg1: i32) -> (i32, i32) {
    %c1_i32 = arith.constant 1 : i32
    %0 = arith.muli %arg0, %c1_i32 : i32
    %1 = arith.addi %0, %arg1 : i32
    %c0_i32 = arith.constant 0 : i32
    %c0_i32_0 = arith.constant 0 : i32
    return %1, %c0_i32 : i32, i32
  }
  func.func @transform_1(%arg0: i32, %arg1: i32) -> (i32, i32) {
    %c0_i32 = arith.constant 0 : i32
    %c0_i32_0 = arith.constant 0 : i32
    %c0_i32_1 = arith.constant 0 : i32
    return %c0_i32, %c0_i32_0 : i32, i32
  }
  func.func @transform_2(%arg0: i32, %arg1: i32) -> (i32, i32) {
    %c1_i32 = arith.constant 1 : i32
    %0 = arith.muli %arg0, %c1_i32 : i32
    %1 = arith.addi %0, %arg1 : i32
    %c0_i32 = arith.constant 0 : i32
    %c0_i32_0 = arith.constant 0 : i32
    return %1, %c0_i32 : i32, i32
  }
  func.func @transform_3(%arg0: i32, %arg1: i32) -> (i32, i32, i32) {
    %c0_i32 = arith.constant 0 : i32
    %c0_i32_0 = arith.constant 0 : i32
    %c0_i32_1 = arith.constant 0 : i32
    return %arg0, %c0_i32, %c0_i32_0 : i32, i32, i32
  }
  func.func @transform_4(%arg0: i32, %arg1: i32) -> (i32, i32, i32) {
    %c0_i32 = arith.constant 0 : i32
    %c0_i32_0 = arith.constant 0 : i32
    %c0_i32_1 = arith.constant 0 : i32
    return %arg0, %c0_i32, %c0_i32_0 : i32, i32, i32
  }
}

module attributes {stable_mosaic.version = 11 : i64} {
  func.func @scale_relu_kernel(%arg0: i32, %arg1: memref<512x128xbf16, #tpu.memory_space<vmem>>, %arg2: memref<1x128xf32, #tpu.memory_space<vmem>>, %arg3: memref<1x128xf32, #tpu.memory_space<vmem>>, %arg4: memref<512x128xbf16, #tpu.memory_space<vmem>>) attributes {dimension_semantics = [#tpu.dimension_semantics<parallel>], iteration_bounds = array<i64: 1>, scalar_prefetch = 0 : i64, scratch_operands = 0 : i64, tpu.core_type = #tpu.core_type<tc>, window_params = [{transform_indices = @transform_0, window_bounds = array<i64: 512, 128>}, {pipeline_mode = #tpu.pipeline_mode<synchronous>, transform_indices = @transform_1, window_bounds = array<i64: 1, 128>}, {pipeline_mode = #tpu.pipeline_mode<synchronous>, transform_indices = @transform_2, window_bounds = array<i64: 1, 128>}, {transform_indices = @transform_3, window_bounds = array<i64: 512, 128>}]} {
    %c0 = arith.constant 0 : index
    %c0_0 = arith.constant 0 : index
    %0 = vector.load %arg1[%c0, %c0_0] : memref<512x128xbf16, #tpu.memory_space<vmem>>, vector<512x128xbf16>
    %1 = arith.extf %0 : vector<512x128xbf16> to vector<512x128xf32>
    %c0_1 = arith.constant 0 : index
    %c0_2 = arith.constant 0 : index
    %2 = vector.load %arg2[%c0_1, %c0_2] : memref<1x128xf32, #tpu.memory_space<vmem>>, vector<1x128xf32>
    %3 = vector.broadcast %2 : vector<1x128xf32> to vector<512x128xf32>
    %4 = arith.mulf %1, %3 : vector<512x128xf32>
    %c0_3 = arith.constant 0 : index
    %c0_4 = arith.constant 0 : index
    %5 = vector.load %arg3[%c0_3, %c0_4] : memref<1x128xf32, #tpu.memory_space<vmem>>, vector<1x128xf32>
    %6 = vector.broadcast %5 : vector<1x128xf32> to vector<512x128xf32>
    %7 = arith.addf %4, %6 : vector<512x128xf32>
    %cst = arith.constant 0.000000e+00 : f32
    %8 = vector.broadcast %cst : f32 to vector<512x128xf32>
    %9 = arith.maximumf %7, %8 : vector<512x128xf32>
    %10 = arith.truncf %9 : vector<512x128xf32> to vector<512x128xbf16>
    %c0_5 = arith.constant 0 : index
    %c0_6 = arith.constant 0 : index
    %11 = vector.load %arg4[%c0_5, %c0_6] : memref<512x128xbf16, #tpu.memory_space<vmem>>, vector<512x128xbf16>
    tpu.vector_store %arg4[%c0_5, %c0_6], %10 {strides = array<i32>} : memref<512x128xbf16, #tpu.memory_space<vmem>>, vector<512x128xbf16>,
    return
  }
  func.func @transform_0(%arg0: i32) -> (i32, i32) {
    %c0_i32 = arith.constant 0 : i32
    %c0_i32_0 = arith.constant 0 : i32
    return %arg0, %c0_i32 : i32, i32
  }
  func.func @transform_1(%arg0: i32) -> (i32, i32) {
    %c0_i32 = arith.constant 0 : i32
    %c0_i32_0 = arith.constant 0 : i32
    %c0_i32_1 = arith.constant 0 : i32
    return %c0_i32, %c0_i32_0 : i32, i32
  }
  func.func @transform_2(%arg0: i32) -> (i32, i32) {
    %c0_i32 = arith.constant 0 : i32
    %c0_i32_0 = arith.constant 0 : i32
    %c0_i32_1 = arith.constant 0 : i32
    return %c0_i32, %c0_i32_0 : i32, i32
  }
  func.func @transform_3(%arg0: i32) -> (i32, i32) {
    %c0_i32 = arith.constant 0 : i32
    %c0_i32_0 = arith.constant 0 : i32
    return %arg0, %c0_i32 : i32, i32
  }
}

module attributes {stable_mosaic.version = 11 : i64} {
  func.func @conv_proj_stats_kernel(%arg0: i32, %arg1: i32, %arg2: memref<256x72xbf16, #tpu.memory_space<vmem>>, %arg3: memref<72x128xbf16, #tpu.memory_space<vmem>>, %arg4: memref<256x4xbf16, #tpu.memory_space<vmem>>, %arg5: memref<4x128xbf16, #tpu.memory_space<vmem>>, %arg6: memref<256x128xbf16, #tpu.memory_space<vmem>>, %arg7: memref<256x128xbf16, #tpu.memory_space<vmem>>, %arg8: memref<1x1x128xf32, #tpu.memory_space<vmem>>, %arg9: memref<1x1x128xf32, #tpu.memory_space<vmem>>, %arg10: memref<1x1x128xf32, #tpu.memory_space<vmem>>, %arg11: memref<1x1x128xf32, #tpu.memory_space<vmem>>) attributes {dimension_semantics = [#tpu.dimension_semantics<parallel>, #tpu.dimension_semantics<arbitrary>], iteration_bounds = array<i64: 2, 1>, scalar_prefetch = 0 : i64, scratch_operands = 0 : i64, tpu.core_type = #tpu.core_type<tc>, window_params = [{transform_indices = @transform_0, window_bounds = array<i64: 256, 72>}, {pipeline_mode = #tpu.pipeline_mode<synchronous>, transform_indices = @transform_1, window_bounds = array<i64: 72, 128>}, {transform_indices = @transform_2, window_bounds = array<i64: 256, 4>}, {pipeline_mode = #tpu.pipeline_mode<synchronous>, transform_indices = @transform_3, window_bounds = array<i64: 4, 128>}, {transform_indices = @transform_4, window_bounds = array<i64: 256, 128>}, {transform_indices = @transform_5, window_bounds = array<i64: 256, 128>}, {transform_indices = @transform_6, window_bounds = array<i64: 1, 1, 128>}, {transform_indices = @transform_7, window_bounds = array<i64: 1, 1, 128>}, {transform_indices = @transform_8, window_bounds = array<i64: 1, 1, 128>}, {transform_indices = @transform_9, window_bounds = array<i64: 1, 1, 128>}]} {
    %c0 = arith.constant 0 : index
    %c0_0 = arith.constant 0 : index
    %0 = vector.load %arg2[%c0, %c0_0] : memref<256x72xbf16, #tpu.memory_space<vmem>>, vector<256x72xbf16>
    %c0_1 = arith.constant 0 : index
    %c0_2 = arith.constant 0 : index
    %1 = vector.load %arg3[%c0_1, %c0_2] : memref<72x128xbf16, #tpu.memory_space<vmem>>, vector<72x128xbf16>
    %cst = arith.constant dense<0.000000e+00> : vector<256x128xf32>
    %2 = tpu.matmul %0, %1, %cst {dimension_numbers = #tpu.dot_dimension_numbers<[1], [0], [0], [1], [0, 0, 1, 1], [], []>} : vector<256x72xbf16>, vector<72x128xbf16>, vector<256x128xf32> -> vector<256x128xf32>
    %c0_3 = arith.constant 0 : index
    %c0_4 = arith.constant 0 : index
    %3 = vector.load %arg4[%c0_3, %c0_4] : memref<256x4xbf16, #tpu.memory_space<vmem>>, vector<256x4xbf16>
    %c0_5 = arith.constant 0 : index
    %c0_6 = arith.constant 0 : index
    %4 = vector.load %arg5[%c0_5, %c0_6] : memref<4x128xbf16, #tpu.memory_space<vmem>>, vector<4x128xbf16>
    %cst_7 = arith.constant dense<0.000000e+00> : vector<256x128xf32>
    %5 = tpu.matmul %3, %4, %cst_7 {dimension_numbers = #tpu.dot_dimension_numbers<[1], [0], [0], [1], [0, 0, 1, 1], [], []>} : vector<256x4xbf16>, vector<4x128xbf16>, vector<256x128xf32> -> vector<256x128xf32>
    %6 = arith.truncf %2 : vector<256x128xf32> to vector<256x128xbf16>
    %c0_8 = arith.constant 0 : index
    %c0_9 = arith.constant 0 : index
    %7 = vector.load %arg6[%c0_8, %c0_9] : memref<256x128xbf16, #tpu.memory_space<vmem>>, vector<256x128xbf16>
    tpu.vector_store %arg6[%c0_8, %c0_9], %6 {strides = array<i32>} : memref<256x128xbf16, #tpu.memory_space<vmem>>, vector<256x128xbf16>,
    %8 = arith.truncf %5 : vector<256x128xf32> to vector<256x128xbf16>
    %c0_10 = arith.constant 0 : index
    %c0_11 = arith.constant 0 : index
    %9 = vector.load %arg7[%c0_10, %c0_11] : memref<256x128xbf16, #tpu.memory_space<vmem>>, vector<256x128xbf16>
    tpu.vector_store %arg7[%c0_10, %c0_11], %8 {strides = array<i32>} : memref<256x128xbf16, #tpu.memory_space<vmem>>, vector<256x128xbf16>,
    %c0_i32 = arith.constant 0 : i32
    %10 = arith.cmpi eq, %arg1, %c0_i32 : i32
    %11 = arith.extui %10 : i1 to i32
    %c0_i32_12 = arith.constant 0 : i32
    %12 = arith.cmpi ne, %11, %c0_i32_12 : i32
    scf.if %12 {
      %cst_41 = arith.constant 0.000000e+00 : f32
      %47 = vector.broadcast %cst_41 : f32 to vector<1x128xf32>
      %c0_42 = arith.constant 0 : index
      %c0_43 = arith.constant 0 : index
      %c0_44 = arith.constant 0 : index
      %48 = vector.load %arg8[%c0_42, %c0_43, %c0_44] : memref<1x1x128xf32, #tpu.memory_space<vmem>>, vector<1x1x128xf32>
      %49 = vector.shape_cast %48 : vector<1x1x128xf32> to vector<1x128xf32>
      %50 = vector.shape_cast %47 : vector<1x128xf32> to vector<1x1x128xf32>
      tpu.vector_store %arg8[%c0_42, %c0_43, %c0_44], %50 {strides = array<i32>} : memref<1x1x128xf32, #tpu.memory_space<vmem>>, vector<1x1x128xf32>,
      %cst_45 = arith.constant 0.000000e+00 : f32
      %51 = vector.broadcast %cst_45 : f32 to vector<1x128xf32>
      %c0_46 = arith.constant 0 : index
      %c0_47 = arith.constant 0 : index
      %c0_48 = arith.constant 0 : index
      %52 = vector.load %arg9[%c0_46, %c0_47, %c0_48] : memref<1x1x128xf32, #tpu.memory_space<vmem>>, vector<1x1x128xf32>
      %53 = vector.shape_cast %52 : vector<1x1x128xf32> to vector<1x128xf32>
      %54 = vector.shape_cast %51 : vector<1x128xf32> to vector<1x1x128xf32>
      tpu.vector_store %arg9[%c0_46, %c0_47, %c0_48], %54 {strides = array<i32>} : memref<1x1x128xf32, #tpu.memory_space<vmem>>, vector<1x1x128xf32>,
      %cst_49 = arith.constant 0.000000e+00 : f32
      %55 = vector.broadcast %cst_49 : f32 to vector<1x128xf32>
      %c0_50 = arith.constant 0 : index
      %c0_51 = arith.constant 0 : index
      %c0_52 = arith.constant 0 : index
      %56 = vector.load %arg10[%c0_50, %c0_51, %c0_52] : memref<1x1x128xf32, #tpu.memory_space<vmem>>, vector<1x1x128xf32>
      %57 = vector.shape_cast %56 : vector<1x1x128xf32> to vector<1x128xf32>
      %58 = vector.shape_cast %55 : vector<1x128xf32> to vector<1x1x128xf32>
      tpu.vector_store %arg10[%c0_50, %c0_51, %c0_52], %58 {strides = array<i32>} : memref<1x1x128xf32, #tpu.memory_space<vmem>>, vector<1x1x128xf32>,
      %cst_53 = arith.constant 0.000000e+00 : f32
      %59 = vector.broadcast %cst_53 : f32 to vector<1x128xf32>
      %c0_54 = arith.constant 0 : index
      %c0_55 = arith.constant 0 : index
      %c0_56 = arith.constant 0 : index
      %60 = vector.load %arg11[%c0_54, %c0_55, %c0_56] : memref<1x1x128xf32, #tpu.memory_space<vmem>>, vector<1x1x128xf32>
      %61 = vector.shape_cast %60 : vector<1x1x128xf32> to vector<1x128xf32>
      %62 = vector.shape_cast %59 : vector<1x128xf32> to vector<1x1x128xf32>
      tpu.vector_store %arg11[%c0_54, %c0_55, %c0_56], %62 {strides = array<i32>} : memref<1x1x128xf32, #tpu.memory_space<vmem>>, vector<1x1x128xf32>,
    } else {
    }
    %c0_13 = arith.constant 0 : index
    %c0_14 = arith.constant 0 : index
    %c0_15 = arith.constant 0 : index
    %13 = vector.load %arg8[%c0_13, %c0_14, %c0_15] : memref<1x1x128xf32, #tpu.memory_space<vmem>>, vector<1x1x128xf32>
    %14 = vector.shape_cast %13 : vector<1x1x128xf32> to vector<1x128xf32>
    %cst_16 = arith.constant dense<0.000000e+00> : vector<128xf32>
    %15 = vector.multi_reduction <add>, %2, %cst_16 [0] : vector<256x128xf32> to vector<128xf32>
    %16 = vector.shape_cast %15 : vector<128xf32> to vector<1x128xf32>
    %17 = arith.addf %14, %16 : vector<1x128xf32>
    %c0_17 = arith.constant 0 : index
    %c0_18 = arith.constant 0 : index
    %c0_19 = arith.constant 0 : index
    %18 = vector.load %arg8[%c0_17, %c0_18, %c0_19] : memref<1x1x128xf32, #tpu.memory_space<vmem>>, vector<1x1x128xf32>
    %19 = vector.shape_cast %18 : vector<1x1x128xf32> to vector<1x128xf32>
    %20 = vector.shape_cast %17 : vector<1x128xf32> to vector<1x1x128xf32>
    tpu.vector_store %arg8[%c0_17, %c0_18, %c0_19], %20 {strides = array<i32>} : memref<1x1x128xf32, #tpu.memory_space<vmem>>, vector<1x1x128xf32>,
    %c0_20 = arith.constant 0 : index
    %c0_21 = arith.constant 0 : index
    %c0_22 = arith.constant 0 : index
    %21 = vector.load %arg9[%c0_20, %c0_21, %c0_22] : memref<1x1x128xf32, #tpu.memory_space<vmem>>, vector<1x1x128xf32>
    %22 = vector.shape_cast %21 : vector<1x1x128xf32> to vector<1x128xf32>
    %23 = arith.mulf %2, %2 : vector<256x128xf32>
    %cst_23 = arith.constant dense<0.000000e+00> : vector<128xf32>
    %24 = vector.multi_reduction <add>, %23, %cst_23 [0] : vector<256x128xf32> to vector<128xf32>
    %25 = vector.shape_cast %24 : vector<128xf32> to vector<1x128xf32>
    %26 = arith.addf %22, %25 : vector<1x128xf32>
    %c0_24 = arith.constant 0 : index
    %c0_25 = arith.constant 0 : index
    %c0_26 = arith.constant 0 : index
    %27 = vector.load %arg9[%c0_24, %c0_25, %c0_26] : memref<1x1x128xf32, #tpu.memory_space<vmem>>, vector<1x1x128xf32>
    %28 = vector.shape_cast %27 : vector<1x1x128xf32> to vector<1x128xf32>
    %29 = vector.shape_cast %26 : vector<1x128xf32> to vector<1x1x128xf32>
    tpu.vector_store %arg9[%c0_24, %c0_25, %c0_26], %29 {strides = array<i32>} : memref<1x1x128xf32, #tpu.memory_space<vmem>>, vector<1x1x128xf32>,
    %c0_27 = arith.constant 0 : index
    %c0_28 = arith.constant 0 : index
    %c0_29 = arith.constant 0 : index
    %30 = vector.load %arg10[%c0_27, %c0_28, %c0_29] : memref<1x1x128xf32, #tpu.memory_space<vmem>>, vector<1x1x128xf32>
    %31 = vector.shape_cast %30 : vector<1x1x128xf32> to vector<1x128xf32>
    %cst_30 = arith.constant dense<0.000000e+00> : vector<128xf32>
    %32 = vector.multi_reduction <add>, %5, %cst_30 [0] : vector<256x128xf32> to vector<128xf32>
    %33 = vector.shape_cast %32 : vector<128xf32> to vector<1x128xf32>
    %34 = arith.addf %31, %33 : vector<1x128xf32>
    %c0_31 = arith.constant 0 : index
    %c0_32 = arith.constant 0 : index
    %c0_33 = arith.constant 0 : index
    %35 = vector.load %arg10[%c0_31, %c0_32, %c0_33] : memref<1x1x128xf32, #tpu.memory_space<vmem>>, vector<1x1x128xf32>
    %36 = vector.shape_cast %35 : vector<1x1x128xf32> to vector<1x128xf32>
    %37 = vector.shape_cast %34 : vector<1x128xf32> to vector<1x1x128xf32>
    tpu.vector_store %arg10[%c0_31, %c0_32, %c0_33], %37 {strides = array<i32>} : memref<1x1x128xf32, #tpu.memory_space<vmem>>, vector<1x1x128xf32>,
    %c0_34 = arith.constant 0 : index
    %c0_35 = arith.constant 0 : index
    %c0_36 = arith.constant 0 : index
    %38 = vector.load %arg11[%c0_34, %c0_35, %c0_36] : memref<1x1x128xf32, #tpu.memory_space<vmem>>, vector<1x1x128xf32>
    %39 = vector.shape_cast %38 : vector<1x1x128xf32> to vector<1x128xf32>
    %40 = arith.mulf %5, %5 : vector<256x128xf32>
    %cst_37 = arith.constant dense<0.000000e+00> : vector<128xf32>
    %41 = vector.multi_reduction <add>, %40, %cst_37 [0] : vector<256x128xf32> to vector<128xf32>
    %42 = vector.shape_cast %41 : vector<128xf32> to vector<1x128xf32>
    %43 = arith.addf %39, %42 : vector<1x128xf32>
    %c0_38 = arith.constant 0 : index
    %c0_39 = arith.constant 0 : index
    %c0_40 = arith.constant 0 : index
    %44 = vector.load %arg11[%c0_38, %c0_39, %c0_40] : memref<1x1x128xf32, #tpu.memory_space<vmem>>, vector<1x1x128xf32>
    %45 = vector.shape_cast %44 : vector<1x1x128xf32> to vector<1x128xf32>
    %46 = vector.shape_cast %43 : vector<1x128xf32> to vector<1x1x128xf32>
    tpu.vector_store %arg11[%c0_38, %c0_39, %c0_40], %46 {strides = array<i32>} : memref<1x1x128xf32, #tpu.memory_space<vmem>>, vector<1x1x128xf32>,
    return
  }
  func.func @transform_0(%arg0: i32, %arg1: i32) -> (i32, i32) {
    %c1_i32 = arith.constant 1 : i32
    %0 = arith.muli %arg0, %c1_i32 : i32
    %1 = arith.addi %0, %arg1 : i32
    %c0_i32 = arith.constant 0 : i32
    %c0_i32_0 = arith.constant 0 : i32
    return %1, %c0_i32 : i32, i32
  }
  func.func @transform_1(%arg0: i32, %arg1: i32) -> (i32, i32) {
    %c0_i32 = arith.constant 0 : i32
    %c0_i32_0 = arith.constant 0 : i32
    %c0_i32_1 = arith.constant 0 : i32
    return %c0_i32, %c0_i32_0 : i32, i32
  }
  func.func @transform_2(%arg0: i32, %arg1: i32) -> (i32, i32) {
    %c1_i32 = arith.constant 1 : i32
    %0 = arith.muli %arg0, %c1_i32 : i32
    %1 = arith.addi %0, %arg1 : i32
    %c0_i32 = arith.constant 0 : i32
    %c0_i32_0 = arith.constant 0 : i32
    return %1, %c0_i32 : i32, i32
  }
  func.func @transform_3(%arg0: i32, %arg1: i32) -> (i32, i32) {
    %c0_i32 = arith.constant 0 : i32
    %c0_i32_0 = arith.constant 0 : i32
    %c0_i32_1 = arith.constant 0 : i32
    return %c0_i32, %c0_i32_0 : i32, i32
  }
  func.func @transform_4(%arg0: i32, %arg1: i32) -> (i32, i32) {
    %c1_i32 = arith.constant 1 : i32
    %0 = arith.muli %arg0, %c1_i32 : i32
    %1 = arith.addi %0, %arg1 : i32
    %c0_i32 = arith.constant 0 : i32
    %c0_i32_0 = arith.constant 0 : i32
    return %1, %c0_i32 : i32, i32
  }
  func.func @transform_5(%arg0: i32, %arg1: i32) -> (i32, i32) {
    %c1_i32 = arith.constant 1 : i32
    %0 = arith.muli %arg0, %c1_i32 : i32
    %1 = arith.addi %0, %arg1 : i32
    %c0_i32 = arith.constant 0 : i32
    %c0_i32_0 = arith.constant 0 : i32
    return %1, %c0_i32 : i32, i32
  }
  func.func @transform_6(%arg0: i32, %arg1: i32) -> (i32, i32, i32) {
    %c0_i32 = arith.constant 0 : i32
    %c0_i32_0 = arith.constant 0 : i32
    %c0_i32_1 = arith.constant 0 : i32
    return %arg0, %c0_i32, %c0_i32_0 : i32, i32, i32
  }
  func.func @transform_7(%arg0: i32, %arg1: i32) -> (i32, i32, i32) {
    %c0_i32 = arith.constant 0 : i32
    %c0_i32_0 = arith.constant 0 : i32
    %c0_i32_1 = arith.constant 0 : i32
    return %arg0, %c0_i32, %c0_i32_0 : i32, i32, i32
  }
  func.func @transform_8(%arg0: i32, %arg1: i32) -> (i32, i32, i32) {
    %c0_i32 = arith.constant 0 : i32
    %c0_i32_0 = arith.constant 0 : i32
    %c0_i32_1 = arith.constant 0 : i32
    return %arg0, %c0_i32, %c0_i32_0 : i32, i32, i32
  }
  func.func @transform_9(%arg0: i32, %arg1: i32) -> (i32, i32, i32) {
    %c0_i32 = arith.constant 0 : i32
    %c0_i32_0 = arith.constant 0 : i32
    %c0_i32_1 = arith.constant 0 : i32
    return %arg0, %c0_i32, %c0_i32_0 : i32, i32, i32
  }
}

module attributes {stable_mosaic.version = 11 : i64} {
  func.func @scale_add_proj_relu_kernel(%arg0: i32, %arg1: memref<512x128xbf16, #tpu.memory_space<vmem>>, %arg2: memref<1x128xf32, #tpu.memory_space<vmem>>, %arg3: memref<1x128xf32, #tpu.memory_space<vmem>>, %arg4: memref<512x128xbf16, #tpu.memory_space<vmem>>, %arg5: memref<1x128xf32, #tpu.memory_space<vmem>>, %arg6: memref<1x128xf32, #tpu.memory_space<vmem>>, %arg7: memref<512x128xf32, #tpu.memory_space<vmem>>) attributes {dimension_semantics = [#tpu.dimension_semantics<parallel>], iteration_bounds = array<i64: 1>, scalar_prefetch = 0 : i64, scratch_operands = 0 : i64, tpu.core_type = #tpu.core_type<tc>, window_params = [{transform_indices = @transform_0, window_bounds = array<i64: 512, 128>}, {pipeline_mode = #tpu.pipeline_mode<synchronous>, transform_indices = @transform_1, window_bounds = array<i64: 1, 128>}, {pipeline_mode = #tpu.pipeline_mode<synchronous>, transform_indices = @transform_2, window_bounds = array<i64: 1, 128>}, {transform_indices = @transform_3, window_bounds = array<i64: 512, 128>}, {pipeline_mode = #tpu.pipeline_mode<synchronous>, transform_indices = @transform_4, window_bounds = array<i64: 1, 128>}, {pipeline_mode = #tpu.pipeline_mode<synchronous>, transform_indices = @transform_5, window_bounds = array<i64: 1, 128>}, {transform_indices = @transform_6, window_bounds = array<i64: 512, 128>}]} {
    %c0 = arith.constant 0 : index
    %c0_0 = arith.constant 0 : index
    %0 = vector.load %arg1[%c0, %c0_0] : memref<512x128xbf16, #tpu.memory_space<vmem>>, vector<512x128xbf16>
    %1 = arith.extf %0 : vector<512x128xbf16> to vector<512x128xf32>
    %c0_1 = arith.constant 0 : index
    %c0_2 = arith.constant 0 : index
    %2 = vector.load %arg4[%c0_1, %c0_2] : memref<512x128xbf16, #tpu.memory_space<vmem>>, vector<512x128xbf16>
    %3 = arith.extf %2 : vector<512x128xbf16> to vector<512x128xf32>
    %c0_3 = arith.constant 0 : index
    %c0_4 = arith.constant 0 : index
    %4 = vector.load %arg2[%c0_3, %c0_4] : memref<1x128xf32, #tpu.memory_space<vmem>>, vector<1x128xf32>
    %5 = vector.broadcast %4 : vector<1x128xf32> to vector<512x128xf32>
    %6 = arith.mulf %1, %5 : vector<512x128xf32>
    %c0_5 = arith.constant 0 : index
    %c0_6 = arith.constant 0 : index
    %7 = vector.load %arg3[%c0_5, %c0_6] : memref<1x128xf32, #tpu.memory_space<vmem>>, vector<1x128xf32>
    %8 = vector.broadcast %7 : vector<1x128xf32> to vector<512x128xf32>
    %9 = arith.addf %6, %8 : vector<512x128xf32>
    %c0_7 = arith.constant 0 : index
    %c0_8 = arith.constant 0 : index
    %10 = vector.load %arg5[%c0_7, %c0_8] : memref<1x128xf32, #tpu.memory_space<vmem>>, vector<1x128xf32>
    %11 = vector.broadcast %10 : vector<1x128xf32> to vector<512x128xf32>
    %12 = arith.mulf %3, %11 : vector<512x128xf32>
    %c0_9 = arith.constant 0 : index
    %c0_10 = arith.constant 0 : index
    %13 = vector.load %arg6[%c0_9, %c0_10] : memref<1x128xf32, #tpu.memory_space<vmem>>, vector<1x128xf32>
    %14 = vector.broadcast %13 : vector<1x128xf32> to vector<512x128xf32>
    %15 = arith.addf %12, %14 : vector<512x128xf32>
    %16 = arith.addf %9, %15 : vector<512x128xf32>
    %cst = arith.constant 0.000000e+00 : f32
    %17 = vector.broadcast %cst : f32 to vector<512x128xf32>
    %18 = arith.maximumf %16, %17 : vector<512x128xf32>
    %c0_11 = arith.constant 0 : index
    %c0_12 = arith.constant 0 : index
    %19 = vector.load %arg7[%c0_11, %c0_12] : memref<512x128xf32, #tpu.memory_space<vmem>>, vector<512x128xf32>
    tpu.vector_store %arg7[%c0_11, %c0_12], %18 {strides = array<i32>} : memref<512x128xf32, #tpu.memory_space<vmem>>, vector<512x128xf32>,
    return
  }
  func.func @transform_0(%arg0: i32) -> (i32, i32) {
    %c0_i32 = arith.constant 0 : i32
    %c0_i32_0 = arith.constant 0 : i32
    return %arg0, %c0_i32 : i32, i32
  }
  func.func @transform_1(%arg0: i32) -> (i32, i32) {
    %c0_i32 = arith.constant 0 : i32
    %c0_i32_0 = arith.constant 0 : i32
    %c0_i32_1 = arith.constant 0 : i32
    return %c0_i32, %c0_i32_0 : i32, i32
  }
  func.func @transform_2(%arg0: i32) -> (i32, i32) {
    %c0_i32 = arith.constant 0 : i32
    %c0_i32_0 = arith.constant 0 : i32
    %c0_i32_1 = arith.constant 0 : i32
    return %c0_i32, %c0_i32_0 : i32, i32
  }
  func.func @transform_3(%arg0: i32) -> (i32, i32) {
    %c0_i32 = arith.constant 0 : i32
    %c0_i32_0 = arith.constant 0 : i32
    return %arg0, %c0_i32 : i32, i32
  }
  func.func @transform_4(%arg0: i32) -> (i32, i32) {
    %c0_i32 = arith.constant 0 : i32
    %c0_i32_0 = arith.constant 0 : i32
    %c0_i32_1 = arith.constant 0 : i32
    return %c0_i32, %c0_i32_0 : i32, i32
  }
  func.func @transform_5(%arg0: i32) -> (i32, i32) {
    %c0_i32 = arith.constant 0 : i32
    %c0_i32_0 = arith.constant 0 : i32
    %c0_i32_1 = arith.constant 0 : i32
    return %c0_i32, %c0_i32_0 : i32, i32
  }
  func.func @transform_6(%arg0: i32) -> (i32, i32) {
    %c0_i32 = arith.constant 0 : i32
    %c0_i32_0 = arith.constant 0 : i32
    return %arg0, %c0_i32 : i32, i32
  }
}

</mosaic_0001>

<bundles_post_ra>
// kernel: shallow_block_forward.5
= control target key start
LH: loop header
LB: loop body
LE: loop exit
PB: predicated region body
PF: predicated region fallthrough
CT: control target
= control target key end

     0   :  { %s1502_s0 = inlined_call_operand.vmem [shape: bf16[512,128], index: 0, kind: input, shape index: {}]   ;;  %s1503_s1 = inlined_call_operand.vmem [shape: f32[1,128], index: 1, kind: input, shape index: {}]   ;;  %s1504_s2 = inlined_call_operand.vmem [shape: f32[1,128], index: 2, kind: input, shape index: {}]   ;;  %s1505_s3 = inlined_call_operand.vmem [shape: bf16[512,128], index: 3, kind: output, shape index: {}]  }
   0x1   :  { %v803_v0 = vld [vmem:[%s1502_s0] sm:$0xff]   ;;  %v1090_v4 = vld [vmem:[%s1502_s0 + $0x8] sm:$0xff]   ;;  %v1091_v5 = vld [vmem:[%s1502_s0 + $0x10] sm:$0xff]  }
   0x2   :  { %v1178_v1 = vld [vmem:[%s1503_s1] ss:$0 sm:$0xff]  ;;  %v804_v2 = vunpack.c.l.bf16 %v803_v0  ;;  %v805_v3 = vunpack.c.h.bf16 %v803_v0  ;;  %v1092_v6 = vld [vmem:[%s1502_s0 + $0x18] sm:$0xff]   ;;  %v808_v8 = vunpack.c.l.bf16 %v1090_v4  ;;  %v809_v9 = vunpack.c.h.bf16 %v1090_v4  ;;  %v1094_v33 = vld [vmem:[%s1502_s0 + $0x28] sm:$0xff]  }
   0x3   :  { %v1192_v7 = vld [vmem:[%s1504_s2] ss:$0 sm:$0xff]  ;;  %v812_v10 = vunpack.c.l.bf16 %v1091_v5  ;;  %v813_v11 = vunpack.c.h.bf16 %v1091_v5  ;;  %v816_v14 = vunpack.c.l.bf16 %v1092_v6  ;;  %v817_v15 = vunpack.c.h.bf16 %v1092_v6  ;;  %v1095_v38 = vld [vmem:[%s1502_s0 + $0x30] sm:$0xff]   ;;  %v1096_v43 = vld [vmem:[%s1502_s0 + $0x38] sm:$0xff]  }
   0x4   :  { %v149_v12 = vmul.f32 %v804_v2, %v1178_v1  ;;  %v150_v13 = vmul.f32 %v805_v3, %v1178_v1  ;;  %v151_v16 = vmul.f32 %v808_v8, %v1178_v1  ;;  %v152_v17 = vmul.f32 %v809_v9, %v1178_v1  ;;  %v1093_v28 = vld [vmem:[%s1502_s0 + $0x20] sm:$0xff]  }
   0x5   :  { %v153_v18 = vmul.f32 %v812_v10, %v1178_v1  ;;  %v154_v19 = vmul.f32 %v813_v11, %v1178_v1  ;;  %v155_v22 = vmul.f32 %v816_v14, %v1178_v1  ;;  %v156_v23 = vmul.f32 %v817_v15, %v1178_v1  ;;  %v1097_v0 = vld [vmem:[%s1502_s0 + $0x40] sm:$0xff]   ;;  %v1098_v11 = vld [vmem:[%s1502_s0 + $0x48] sm:$0xff]  }
   0x6   :  { %v220_v20 = vadd.f32 %v1192_v7, %v149_v12  ;;  %v221_v21 = vadd.f32 %v1192_v7, %v150_v13  ;;  %v222_v24 = vadd.f32 %v1192_v7, %v151_v16  ;;  %v223_v25 = vadd.f32 %v1192_v7, %v152_v17  ;;  %v1099_v16 = vld [vmem:[%s1502_s0 + $0x50] sm:$0xff]  }
   0x7   :  { %v224_v26 = vadd.f32 %v1192_v7, %v153_v18  ;;  %v225_v27 = vadd.f32 %v1192_v7, %v154_v19  ;;  %v226_v31 = vadd.f32 %v1192_v7, %v155_v22  ;;  %v227_v32 = vadd.f32 %v1192_v7, %v156_v23 }
   0x8   :  { %v284_v29 = vmax.f32 %v220_v20, 0.0  ;;  %v285_v30 = vmax.f32 %v221_v21, 0.0  ;;  %v286_v34 = vmax.f32 %v222_v24, 0.0  ;;  %v287_v35 = vmax.f32 %v223_v25, 0.0  ;;  %v1100_v25 = vld [vmem:[%s1502_s0 + $0x58] sm:$0xff]  }
   0x9   :  { %v288_v36 = vmax.f32 %v224_v26, 0.0  ;;  %v289_v37 = vmax.f32 %v225_v27, 0.0  ;;  %v290_v40 = vmax.f32 %v226_v31, 0.0  ;;  %v291_v41 = vmax.f32 %v227_v32, 0.0 }
   0xa   :  { %v933_v39 = vpack.c.bf16 %v285_v30, %v284_v29  ;;  %v820_v42 = vunpack.c.l.bf16 %v1093_v28  ;;  %v938_v44 = vpack.c.bf16 %v287_v35, %v286_v34  ;;  %v821_v46 = vunpack.c.h.bf16 %v1093_v28 }
   0xb   :  { %v943_v45 = vpack.c.bf16 %v289_v37, %v288_v36  ;;  %v824_v47 = vunpack.c.l.bf16 %v1094_v33  ;;  %v948_v48 = vpack.c.bf16 %v291_v41, %v290_v40  ;;  %v825_v50 = vunpack.c.h.bf16 %v1094_v33 }
   0xc   :  { %934 = vst [vmem:[%s1505_s3] sm:$0xff] %v933_v39   ;;  %v157_v49 = vmul.f32 %v820_v42, %v1178_v1  ;;  %v828_v51 = vunpack.c.l.bf16 %v1095_v38  ;;  %1121 = vst [vmem:[%s1505_s3 + $0x8] sm:$0xff] %v938_v44   ;;  %v158_v52 = vmul.f32 %v821_v46, %v1178_v1  ;;  %v829_v54 = vunpack.c.h.bf16 %v1095_v38  ;;  %v1101_v38 = vld [vmem:[%s1502_s0 + $0x60] sm:$0xff]  }
   0xd   :  { %1122 = vst [vmem:[%s1505_s3 + $0x10] sm:$0xff] %v943_v45   ;;  %v159_v53 = vmul.f32 %v824_v47, %v1178_v1  ;;  %v832_v55 = vunpack.c.l.bf16 %v1096_v43  ;;  %1123 = vst [vmem:[%s1505_s3 + $0x18] sm:$0xff] %v948_v48   ;;  %v160_v57 = vmul.f32 %v825_v50, %v1178_v1  ;;  %v833_v59 = vunpack.c.h.bf16 %v1096_v43 }
   0xe   :  { %v228_v56 = vadd.f32 %v1192_v7, %v157_v49  ;;  %v161_v58 = vmul.f32 %v828_v51, %v1178_v1  ;;  %v229_v60 = vadd.f32 %v1192_v7, %v158_v52  ;;  %v162_v62 = vmul.f32 %v829_v54, %v1178_v1  ;;  %v1102_v51 = vld [vmem:[%s1502_s0 + $0x68] sm:$0xff]  }
   0xf   :  { %v230_v61 = vadd.f32 %v1192_v7, %v159_v53  ;;  %v163_v63 = vmul.f32 %v832_v55, %v1178_v1  ;;  %v231_v3 = vadd.f32 %v1192_v7, %v160_v57  ;;  %v164_v5 = vmul.f32 %v833_v59, %v1178_v1 }
  0x10   :  { %v292_v2 = vmax.f32 %v228_v56, 0.0  ;;  %v232_v4 = vadd.f32 %v1192_v7, %v161_v58  ;;  %v293_v6 = vmax.f32 %v229_v60, 0.0  ;;  %v233_v9 = vadd.f32 %v1192_v7, %v162_v62  ;;  %v1103_v60 = vld [vmem:[%s1502_s0 + $0x70] sm:$0xff]  }
  0x11   :  { %v294_v8 = vmax.f32 %v230_v61, 0.0  ;;  %v234_v10 = vadd.f32 %v1192_v7, %v163_v63  ;;  %v295_v12 = vmax.f32 %v231_v3, 0.0  ;;  %v235_v14 = vadd.f32 %v1192_v7, %v164_v5 }
  0x12   :  { %v296_v13 = vmax.f32 %v232_v4, 0.0  ;;  %v836_v15 = vunpack.c.l.bf16 %v1097_v0  ;;  %v953_v17 = vpack.c.bf16 %v293_v6, %v292_v2  ;;  %v297_v18 = vmax.f32 %v233_v9, 0.0  ;;  %v1104_v2 = vld [vmem:[%s1502_s0 + $0x78] sm:$0xff]  }
  0x13   :  { %v298_v19 = vmax.f32 %v234_v10, 0.0  ;;  %v837_v20 = vunpack.c.h.bf16 %v1097_v0  ;;  %v958_v21 = vpack.c.bf16 %v295_v12, %v294_v8  ;;  %v299_v22 = vmax.f32 %v235_v14, 0.0  ;;  %v1105_v12 = vld [vmem:[%s1502_s0 + $0x80] sm:$0xff]  }
  0x14   :  { %v165_v23 = vmul.f32 %v836_v15, %v1178_v1  ;;  %v840_v24 = vunpack.c.l.bf16 %v1098_v11  ;;  %1124 = vst [vmem:[%s1505_s3 + $0x20] sm:$0xff] %v953_v17   ;;  %v963_v26 = vpack.c.bf16 %v297_v18, %v296_v13  ;;  %v841_v28 = vunpack.c.h.bf16 %v1098_v11 }
  0x15   :  { %v166_v27 = vmul.f32 %v837_v20, %v1178_v1  ;;  %v844_v29 = vunpack.c.l.bf16 %v1099_v16  ;;  %1125 = vst [vmem:[%s1505_s3 + $0x28] sm:$0xff] %v958_v21   ;;  %v968_v30 = vpack.c.bf16 %v299_v22, %v298_v19  ;;  %v845_v33 = vunpack.c.h.bf16 %v1099_v16 }
  0x16   :  { %v236_v31 = vadd.f32 %v1192_v7, %v165_v23  ;;  %v167_v32 = vmul.f32 %v840_v24, %v1178_v1  ;;  %1126 = vst [vmem:[%s1505_s3 + $0x30] sm:$0xff] %v963_v26   ;;  %v168_v35 = vmul.f32 %v841_v28, %v1178_v1  ;;  %v848_v37 = vunpack.c.l.bf16 %v1100_v25 }
  0x17   :  { %v237_v34 = vadd.f32 %v1192_v7, %v166_v27  ;;  %v169_v36 = vmul.f32 %v844_v29, %v1178_v1  ;;  %1127 = vst [vmem:[%s1505_s3 + $0x38] sm:$0xff] %v968_v30   ;;  %v170_v41 = vmul.f32 %v845_v33, %v1178_v1  ;;  %v849_v42 = vunpack.c.h.bf16 %v1100_v25  ;;  %v1106_v29 = vld [vmem:[%s1502_s0 + $0x88] sm:$0xff]  }
  0x18   :  { %v300_v39 = vmax.f32 %v236_v31, 0.0  ;;  %v238_v40 = vadd.f32 %v1192_v7, %v167_v32  ;;  %v239_v44 = vadd.f32 %v1192_v7, %v168_v35  ;;  %v171_v46 = vmul.f32 %v848_v37, %v1178_v1 }
  0x19   :  { %v301_v43 = vmax.f32 %v237_v34, 0.0  ;;  %v240_v45 = vadd.f32 %v1192_v7, %v169_v36  ;;  %v241_v48 = vadd.f32 %v1192_v7, %v170_v41  ;;  %v172_v49 = vmul.f32 %v849_v42, %v1178_v1  ;;  %v1107_v34 = vld [vmem:[%s1502_s0 + $0x90] sm:$0xff]  }
  0x1a   :  { %v302_v47 = vmax.f32 %v238_v40, 0.0  ;;  %v852_v50 = vunpack.c.l.bf16 %v1101_v38  ;;  %v303_v53 = vmax.f32 %v239_v44, 0.0  ;;  %v242_v55 = vadd.f32 %v1192_v7, %v171_v46 }
  0x1b   :  { %v973_v52 = vpack.c.bf16 %v301_v43, %v300_v39  ;;  %v304_v54 = vmax.f32 %v240_v45, 0.0  ;;  %v305_v56 = vmax.f32 %v241_v48, 0.0  ;;  %v243_v57 = vadd.f32 %v1192_v7, %v172_v49  ;;  %v1108_v43 = vld [vmem:[%s1502_s0 + $0x98] sm:$0xff]  }
  0x1c   :  { %v853_v58 = vunpack.c.h.bf16 %v1101_v38  ;;  %v173_v59 = vmul.f32 %v852_v50, %v1178_v1  ;;  %v978_v61 = vpack.c.bf16 %v303_v53, %v302_v47  ;;  %v306_v62 = vmax.f32 %v242_v55, 0.0 }
  0x1d   :  { %1128 = vst [vmem:[%s1505_s3 + $0x40] sm:$0xff] %v973_v52   ;;  %v856_v63 = vunpack.c.l.bf16 %v1102_v51  ;;  %v857_v0 = vunpack.c.h.bf16 %v1102_v51  ;;  %v983_v3 = vpack.c.bf16 %v305_v56, %v304_v54  ;;  %v307_v4 = vmax.f32 %v243_v57, 0.0  ;;  %v1109_v56 = vld [vmem:[%s1502_s0 + $0xa0] sm:$0xff]  }
  0x1e   :  { %v174_v5 = vmul.f32 %v853_v58, %v1178_v1  ;;  %v244_v6 = vadd.f32 %v1192_v7, %v173_v59  ;;  %1129 = vst [vmem:[%s1505_s3 + $0x48] sm:$0xff] %v978_v61   ;;  %v860_v10 = vunpack.c.l.bf16 %v1103_v60  ;;  %v861_v11 = vunpack.c.h.bf16 %v1103_v60 }
  0x1f   :  { %v175_v8 = vmul.f32 %v856_v63, %v1178_v1  ;;  %v176_v9 = vmul.f32 %v857_v0, %v1178_v1  ;;  %1130 = vst [vmem:[%s1505_s3 + $0x50] sm:$0xff] %v983_v3   ;;  %v988_v13 = vpack.c.bf16 %v307_v4, %v306_v62  ;;  %v864_v16 = vunpack.c.l.bf16 %v1104_v2 }
  0x20   :  { %v245_v14 = vadd.f32 %v1192_v7, %v174_v5  ;;  %v308_v15 = vmax.f32 %v244_v6, 0.0  ;;  %v177_v19 = vmul.f32 %v860_v10, %v1178_v1  ;;  %v178_v20 = vmul.f32 %v861_v11, %v1178_v1 }
  0x21   :  { %v246_v17 = vadd.f32 %v1192_v7, %v175_v8  ;;  %v247_v18 = vadd.f32 %v1192_v7, %v176_v9  ;;  %1131 = vst [vmem:[%s1505_s3 + $0x58] sm:$0xff] %v988_v13   ;;  %v865_v22 = vunpack.c.h.bf16 %v1104_v2  ;;  %v179_v23 = vmul.f32 %v864_v16, %v1178_v1  ;;  %v1110_v2 = vld [vmem:[%s1502_s0 + $0xa8] sm:$0xff]   ;;  %v1111_v16 = vld [vmem:[%s1502_s0 + $0xb0] sm:$0xff]  }
  0x22   :  { %v309_v21 = vmax.f32 %v245_v14, 0.0  ;;  %v868_v24 = vunpack.c.l.bf16 %v1105_v12  ;;  %v248_v27 = vadd.f32 %v1192_v7, %v177_v19  ;;  %v249_v28 = vadd.f32 %v1192_v7, %v178_v20 }
  0x23   :  { %v310_v25 = vmax.f32 %v246_v17, 0.0  ;;  %v311_v26 = vmax.f32 %v247_v18, 0.0  ;;  %v180_v31 = vmul.f32 %v865_v22, %v1178_v1  ;;  %v250_v32 = vadd.f32 %v1192_v7, %v179_v23 }
  0x24   :  { %v993_v30 = vpack.c.bf16 %v309_v21, %v308_v15  ;;  %v869_v33 = vunpack.c.h.bf16 %v1105_v12  ;;  %v312_v36 = vmax.f32 %v248_v27, 0.0  ;;  %v313_v37 = vmax.f32 %v249_v28, 0.0  ;;  %v1112_v21 = vld [vmem:[%s1502_s0 + $0xb8] sm:$0xff]  }
  0x25   :  { %v998_v35 = vpack.c.bf16 %v311_v26, %v310_v25  ;;  %v181_v38 = vmul.f32 %v868_v24, %v1178_v1  ;;  %v251_v39 = vadd.f32 %v1192_v7, %v180_v31  ;;  %v314_v40 = vmax.f32 %v250_v32, 0.0 }
  0x26   :  { %1132 = vst [vmem:[%s1505_s3 + $0x60] sm:$0xff] %v993_v30   ;;  %v182_v41 = vmul.f32 %v869_v33, %v1178_v1  ;;  %v872_v42 = vunpack.c.l.bf16 %v1106_v29  ;;  %v1003_v44 = vpack.c.bf16 %v313_v37, %v312_v36  ;;  %v873_v46 = vunpack.c.h.bf16 %v1106_v29 }
  0x27   :  { %1133 = vst [vmem:[%s1505_s3 + $0x68] sm:$0xff] %v998_v35   ;;  %v252_v45 = vadd.f32 %v1192_v7, %v181_v38  ;;  %v876_v47 = vunpack.c.l.bf16 %v1107_v34  ;;  %v315_v48 = vmax.f32 %v251_v39, 0.0  ;;  %v877_v51 = vunpack.c.h.bf16 %v1107_v34  ;;  %v1113_v34 = vld [vmem:[%s1502_s0 + $0xc0] sm:$0xff]  }
  0x28   :  { %v253_v49 = vadd.f32 %v1192_v7, %v182_v41  ;;  %v183_v50 = vmul.f32 %v872_v42, %v1178_v1  ;;  %1134 = vst [vmem:[%s1505_s3 + $0x70] sm:$0xff] %v1003_v44   ;;  %v184_v53 = vmul.f32 %v873_v46, %v1178_v1  ;;  %v880_v55 = vunpack.c.l.bf16 %v1108_v43 }
  0x29   :  { %v316_v52 = vmax.f32 %v252_v45, 0.0  ;;  %v185_v54 = vmul.f32 %v876_v47, %v1178_v1  ;;  %v1008_v57 = vpack.c.bf16 %v315_v48, %v314_v40  ;;  %v186_v60 = vmul.f32 %v877_v51, %v1178_v1  ;;  %v1114_v47 = vld [vmem:[%s1502_s0 + $0xc8] sm:$0xff]  }
  0x2a   :  { %v317_v58 = vmax.f32 %v253_v49, 0.0  ;;  %v254_v59 = vadd.f32 %v1192_v7, %v183_v50  ;;  %v255_v61 = vadd.f32 %v1192_v7, %v184_v53  ;;  %v881_v63 = vunpack.c.h.bf16 %v1108_v43 }
  0x2b   :  { %v256_v62 = vadd.f32 %v1192_v7, %v185_v54  ;;  %v187_v0 = vmul.f32 %v880_v55, %v1178_v1  ;;  %1135 = vst [vmem:[%s1505_s3 + $0x78] sm:$0xff] %v1008_v57   ;;  %v257_v5 = vadd.f32 %v1192_v7, %v186_v60  ;;  %v884_v6 = vunpack.c.l.bf16 %v1109_v56 }
  0x2c   :  { %v1013_v3 = vpack.c.bf16 %v317_v58, %v316_v52  ;;  %v318_v4 = vmax.f32 %v254_v59, 0.0  ;;  %v319_v8 = vmax.f32 %v255_v61, 0.0  ;;  %v188_v10 = vmul.f32 %v881_v63, %v1178_v1  ;;  %v1115_v52 = vld [vmem:[%s1502_s0 + $0xd0] sm:$0xff]   ;;  %v1116_v61 = vld [vmem:[%s1502_s0 + $0xd8] sm:$0xff]  }
  0x2d   :  { %v320_v9 = vmax.f32 %v256_v62, 0.0  ;;  %v258_v11 = vadd.f32 %v1192_v7, %v187_v0  ;;  %v321_v12 = vmax.f32 %v257_v5, 0.0  ;;  %v885_v13 = vunpack.c.h.bf16 %v1109_v56 }
  0x2e   :  { %1136 = vst [vmem:[%s1505_s3 + $0x80] sm:$0xff] %v1013_v3   ;;  %v189_v14 = vmul.f32 %v884_v6, %v1178_v1  ;;  %v888_v15 = vunpack.c.l.bf16 %v1110_v2  ;;  %v1018_v17 = vpack.c.bf16 %v319_v8, %v318_v4  ;;  %v259_v18 = vadd.f32 %v1192_v7, %v188_v10 }
  0x2f   :  { %v322_v19 = vmax.f32 %v258_v11, 0.0  ;;  %v889_v20 = vunpack.c.h.bf16 %v1110_v2  ;;  %v1023_v22 = vpack.c.bf16 %v321_v12, %v320_v9  ;;  %v190_v23 = vmul.f32 %v885_v13, %v1178_v1  ;;  %v1117_v12 = vld [vmem:[%s1502_s0 + $0xe0] sm:$0xff]  }
  0x30   :  { %v260_v24 = vadd.f32 %v1192_v7, %v189_v14  ;;  %v191_v25 = vmul.f32 %v888_v15, %v1178_v1  ;;  %1137 = vst [vmem:[%s1505_s3 + $0x88] sm:$0xff] %v1018_v17   ;;  %v323_v26 = vmax.f32 %v259_v18, 0.0  ;;  %v892_v28 = vunpack.c.l.bf16 %v1111_v16 }
  0x31   :  { %v192_v27 = vmul.f32 %v889_v20, %v1178_v1  ;;  %v893_v29 = vunpack.c.h.bf16 %v1111_v16  ;;  %1138 = vst [vmem:[%s1505_s3 + $0x90] sm:$0xff] %v1023_v22   ;;  %v261_v30 = vadd.f32 %v1192_v7, %v190_v23  ;;  %v896_v33 = vunpack.c.l.bf16 %v1112_v21 }
  0x32   :  { %v324_v31 = vmax.f32 %v260_v24, 0.0  ;;  %v262_v32 = vadd.f32 %v1192_v7, %v191_v25  ;;  %v1028_v35 = vpack.c.bf16 %v323_v26, %v322_v19  ;;  %v193_v37 = vmul.f32 %v892_v28, %v1178_v1 }
  0x33   :  { %v263_v36 = vadd.f32 %v1192_v7, %v192_v27  ;;  %v194_v38 = vmul.f32 %v893_v29, %v1178_v1  ;;  %v325_v39 = vmax.f32 %v261_v30, 0.0  ;;  %v897_v41 = vunpack.c.h.bf16 %v1112_v21  ;;  %v1118_v21 = vld [vmem:[%s1502_s0 + $0xe8] sm:$0xff]  }
  0x34   :  { %v326_v40 = vmax.f32 %v262_v32, 0.0  ;;  %v195_v42 = vmul.f32 %v896_v33, %v1178_v1  ;;  %1139 = vst [vmem:[%s1505_s3 + $0x98] sm:$0xff] %v1028_v35   ;;  %v264_v44 = vadd.f32 %v1192_v7, %v193_v37  ;;  %v900_v46 = vunpack.c.l.bf16 %v1113_v34 }
  0x35   :  { %v327_v43 = vmax.f32 %v263_v36, 0.0  ;;  %v265_v45 = vadd.f32 %v1192_v7, %v194_v38  ;;  %v1033_v48 = vpack.c.bf16 %v325_v39, %v324_v31  ;;  %v196_v49 = vmul.f32 %v897_v41, %v1178_v1  ;;  %v1120_v39 = vld [vmem:[%s1502_s0 + $0xf8] sm:$0xff]  }
  0x36   :  { %v266_v50 = vadd.f32 %v1192_v7, %v195_v42  ;;  %v901_v51 = vunpack.c.h.bf16 %v1113_v34  ;;  %v328_v54 = vmax.f32 %v264_v44, 0.0  ;;  %v197_v56 = vmul.f32 %v900_v46, %v1178_v1  ;;  %v1119_v34 = vld [vmem:[%s1502_s0 + $0xf0] sm:$0xff]  }
  0x37   :  { %v1038_v53 = vpack.c.bf16 %v327_v43, %v326_v40  ;;  %v329_v55 = vmax.f32 %v265_v45, 0.0  ;;  %1140 = vst [vmem:[%s1505_s3 + $0xa0] sm:$0xff] %v1033_v48   ;;  %v267_v57 = vadd.f32 %v1192_v7, %v196_v49  ;;  %v904_v60 = vunpack.c.l.bf16 %v1114_v47 }
  0x38   :  { %v330_v58 = vmax.f32 %v266_v50, 0.0  ;;  %v198_v59 = vmul.f32 %v901_v51, %v1178_v1  ;;  %v268_v63 = vadd.f32 %v1192_v7, %v197_v56  ;;  %v905_v0 = vunpack.c.h.bf16 %v1114_v47 }
  0x39   :  { %1141 = vst [vmem:[%s1505_s3 + $0xa8] sm:$0xff] %v1038_v53   ;;  %v1043_v62 = vpack.c.bf16 %v329_v55, %v328_v54  ;;  %v908_v2 = vunpack.c.l.bf16 %v1115_v52  ;;  %v331_v3 = vmax.f32 %v267_v57, 0.0  ;;  %v199_v5 = vmul.f32 %v904_v60, %v1178_v1 }
  0x3a   :  { %v269_v4 = vadd.f32 %v1192_v7, %v198_v59  ;;  %v909_v6 = vunpack.c.h.bf16 %v1115_v52  ;;  %v332_v8 = vmax.f32 %v268_v63, 0.0  ;;  %v200_v9 = vmul.f32 %v905_v0, %v1178_v1 }
  0x3b   :  { %1142 = vst [vmem:[%s1505_s3 + $0xb0] sm:$0xff] %v1043_v62   ;;  %v201_v10 = vmul.f32 %v908_v2, %v1178_v1  ;;  %v912_v11 = vunpack.c.l.bf16 %v1116_v61  ;;  %v1048_v13 = vpack.c.bf16 %v331_v3, %v330_v58  ;;  %v270_v15 = vadd.f32 %v1192_v7, %v199_v5 }
  0x3c   :  { %v333_v14 = vmax.f32 %v269_v4, 0.0  ;;  %v202_v16 = vmul.f32 %v909_v6, %v1178_v1  ;;  %v271_v17 = vadd.f32 %v1192_v7, %v200_v9  ;;  %v913_v19 = vunpack.c.h.bf16 %v1116_v61 }
  0x3d   :  { %v272_v18 = vadd.f32 %v1192_v7, %v201_v10  ;;  %v203_v20 = vmul.f32 %v912_v11, %v1178_v1  ;;  %1143 = vst [vmem:[%s1505_s3 + $0xb8] sm:$0xff] %v1048_v13   ;;  %v334_v23 = vmax.f32 %v270_v15, 0.0  ;;  %v916_v25 = vunpack.c.l.bf16 %v1117_v12 }
  0x3e   :  { %v1053_v22 = vpack.c.bf16 %v333_v14, %v332_v8  ;;  %v273_v24 = vadd.f32 %v1192_v7, %v202_v16  ;;  %v335_v26 = vmax.f32 %v271_v17, 0.0  ;;  %v204_v28 = vmul.f32 %v913_v19, %v1178_v1 }
  0x3f   :  { %v336_v27 = vmax.f32 %v272_v18, 0.0  ;;  %v274_v29 = vadd.f32 %v1192_v7, %v203_v20  ;;  %v917_v31 = vunpack.c.h.bf16 %v1117_v12  ;;  %v205_v32 = vmul.f32 %v916_v25, %v1178_v1 }
  0x40   :  { %1144 = vst [vmem:[%s1505_s3 + $0xc0] sm:$0xff] %v1053_v22   ;;  %v337_v30 = vmax.f32 %v273_v24, 0.0  ;;  %v920_v33 = vunpack.c.l.bf16 %v1118_v21  ;;  %v1058_v35 = vpack.c.bf16 %v335_v26, %v334_v23  ;;  %v275_v36 = vadd.f32 %v1192_v7, %v204_v28 }
  0x41   :  { %v338_v37 = vmax.f32 %v274_v29, 0.0  ;;  %v921_v38 = vunpack.c.h.bf16 %v1118_v21  ;;  %v206_v41 = vmul.f32 %v917_v31, %v1178_v1  ;;  %v276_v42 = vadd.f32 %v1192_v7, %v205_v32 }
  0x42   :  { %v1063_v40 = vpack.c.bf16 %v337_v30, %v336_v27  ;;  %v207_v43 = vmul.f32 %v920_v33, %v1178_v1  ;;  %1145 = vst [vmem:[%s1505_s3 + $0xc8] sm:$0xff] %v1058_v35   ;;  %v339_v44 = vmax.f32 %v275_v36, 0.0  ;;  %v924_v46 = vunpack.c.l.bf16 %v1119_v34 }
  0x43   :  { %v208_v45 = vmul.f32 %v921_v38, %v1178_v1  ;;  %v925_v47 = vunpack.c.h.bf16 %v1119_v34  ;;  %v277_v48 = vadd.f32 %v1192_v7, %v206_v41  ;;  %v340_v49 = vmax.f32 %v276_v42, 0.0 }
  0x44   :  { %1146 = vst [vmem:[%s1505_s3 + $0xd0] sm:$0xff] %v1063_v40   ;;  %v278_v50 = vadd.f32 %v1192_v7, %v207_v43  ;;  %v928_v51 = vunpack.c.l.bf16 %v1120_v39  ;;  %v1068_v52 = vpack.c.bf16 %v339_v44, %v338_v37  ;;  %v209_v54 = vmul.f32 %v924_v46, %v1178_v1 }
  0x45   :  { %v279_v53 = vadd.f32 %v1192_v7, %v208_v45  ;;  %v210_v55 = vmul.f32 %v925_v47, %v1178_v1  ;;  %v341_v56 = vmax.f32 %v277_v48, 0.0  ;;  %v929_v58 = vunpack.c.h.bf16 %v1120_v39 }
  0x46   :  { %v342_v57 = vmax.f32 %v278_v50, 0.0  ;;  %v211_v59 = vmul.f32 %v928_v51, %v1178_v1  ;;  %1147 = vst [vmem:[%s1505_s3 + $0xd8] sm:$0xff] %v1068_v52   ;;  %v280_v61 = vadd.f32 %v1192_v7, %v209_v54 }
  0x47   :  { %v343_v60 = vmax.f32 %v279_v53, 0.0  ;;  %v281_v62 = vadd.f32 %v1192_v7, %v210_v55  ;;  %v1073_v63 = vpack.c.bf16 %v341_v56, %v340_v49  ;;  %v212_v0 = vmul.f32 %v929_v58, %v1178_v1 }
  0x48   :  { %v282_v2 = vadd.f32 %v1192_v7, %v211_v59  ;;  %v344_v4 = vmax.f32 %v280_v61, 0.0 }
  0x49   :  { %v1078_v3 = vpack.c.bf16 %v343_v60, %v342_v57  ;;  %v345_v5 = vmax.f32 %v281_v62, 0.0  ;;  %1148 = vst [vmem:[%s1505_s3 + $0xe0] sm:$0xff] %v1073_v63   ;;  %v283_v6 = vadd.f32 %v1192_v7, %v212_v0 }
  0x4a   :  { %v346_v8 = vmax.f32 %v282_v2, 0.0 }
  0x4b   :  { %1149 = vst [vmem:[%s1505_s3 + $0xe8] sm:$0xff] %v1078_v3   ;;  %v1083_v9 = vpack.c.bf16 %v345_v5, %v344_v4  ;;  %v347_v10 = vmax.f32 %v283_v6, 0.0 }
  0x4d   :  { %1150 = vst [vmem:[%s1505_s3 + $0xf0] sm:$0xff] %v1083_v9   ;;  %v1088_v1 = vpack.c.bf16 %v347_v10, %v346_v8 }
  0x4f   :  { %1151 = vst [vmem:[%s1505_s3 + $0xf8] sm:$0xff] %v1088_v1  }

// kernel: shallow_block_forward.4
= control target key start
LH: loop header
LB: loop body
LE: loop exit
PB: predicated region body
PF: predicated region fallthrough
CT: control target
= control target key end

     0   :  { %s1349_s15 = smov 0   ;;  %s1351_s16 = smov 0   ;;  %s1537_s0 = inlined_call_operand.vmem [shape: bf16[512,36], index: 0, kind: input, shape index: {}]   ;;  %s1538_s1 = inlined_call_operand.vmem [shape: bf16[36,128], index: 1, kind: input, shape index: {}]   ;;  %s1539_s2 = inlined_call_operand.vmem [shape: bf16[512,128], index: 2, kind: output, shape index: {0}]   ;;  %s1540_s3 = inlined_call_operand.vmem [shape: f32[2,1,128], index: 3, kind: output, shape index: {1}]   ;;  %s1541_s4 = inlined_call_operand.vmem [shape: f32[2,1,128], index: 4, kind: output, shape index: {2}]  }
   0x1   :  { %s1353_s17 = smov 0  }
   0x2 LB: > { %s27_s18 = sadd.s32 1, %s1317_s16  ;;  %p989_p0 = scmp.ge.s32.totalorder %s1321_s17, 1  ;;  %s1321_s17 = sphi %s1353_s17, %s15_s17   ;;  %s1317_s16 = sphi %s1351_s16, %s1543_s16   ;;  %s1313_s15 = sphi %s1349_s15, %s1542_s15  }
   0x3   : > { %p29_p1 = scmp.ge.s32.totalorder %s27_s18, 2  ;;  %p186_p2 = scmp.lt.s32.totalorder %s1321_s17, 3 }
   0x5   : > { %s1545_s18 = smov (%p29_p1, %s27_s18), 0  ;;  %p187_p3 = pnand %p989_p0, %p186_p2 }
   0x6   : > { %v1280_v0 = vld [vmem:[%s1538_s1] sm:$0xff] (!%p187_p3)   ;;  %v1281_v1 = vld [vmem:[%s1538_s1 + $0x8] sm:$0xff] (!%p187_p3)   ;;  %s990_s23 = sshll.u32 (!%p187_p3), %s1313_s15, 5  ;;  %v1282_v2 = vld [vmem:[%s1538_s1 + $0x10] ss:$0 sps:$4 sm:$0x33] (!%p187_p3)  }
   0x7   : > { %190 = sbr.rel (%p187_p3) target bundleno = 313 (0x139), region = 28  ;;  %1209 = vmatprep.subr.bf16.mxu0 (!%p187_p3), %v1280_v0  ;;  %p222_p4 = scmp.lt.s32.totalorder (!%p187_p3), %s990_s23, 63  ;;  %1247 = vmatprep.subr.bf16.mxu1 (!%p187_p3), %v1280_v0  ;;  %vm424_vm0 = vcmask (!%p187_p3), 1041408   ;;  %vm375_vm1 = vcmask (!%p187_p3), 293888   ;;  %v1323_v20 = vmov (!%p187_p3), 0.0  }
   0x8   : > { %1210 = vmatpush3.bf16.msra.mxu0 (!%p187_p3), %v1280_v0  ;;  %1250 = vmatpush3.bf16.msra.mxu1 (!%p187_p3), %v1280_v0  ;;  %v426_v3 = vsel (!%p187_p3), %vm424_vm0, %v1282_v2, 0  ;;  %p236_p5 = scmp.lt.s32.totalorder (!%p187_p3), %s1313_s15, 1 }
   0x9   : > { %1211 = vmatprep.subr.bf16.mxu0 (!%p187_p3), %v1281_v1  ;;  %1248 = vmatprep.subr.bf16.mxu1 (!%p187_p3), %v1281_v1 }
   0xc   : > { %1212 = vmatpush3.bf16.msra.mxu0 (!%p187_p3), %v1281_v1  ;;  %1251 = vmatpush3.bf16.msra.mxu1 (!%p187_p3), %v1281_v1 }
   0xd   : > { %1253 = vmatprep.subr.msk.bf16.mxu0 (!%p187_p3), %vm424_vm0, %v1282_v2  ;;  %1254 = vmatprep.subr.msk.bf16.mxu1 (!%p187_p3), %vm424_vm0, %v1282_v2 }
   0xe   : > { %s1547_s23 = smov (!%p222_p4, %s990_s23), 63  ;;  %s1549_s15 = smov (!%p236_p5, %s1313_s15), 1 }
   0xf   : > { %s991_s26 = sshll.u32 %s1547_s23, 2  ;;  %s1426_s6 = scalar_lea.vmem %s1540_s3, %s1549_s15 }
  0x10   : > { %s1387_s29 = scalar_lea.vmem %s1537_s0, %s991_s26  ;;  %1214 = vmatpush3.bf16.msra.mxu0 %v426_v3  ;;  %1252 = vmatpush3.bf16.msra.mxu1 %v426_v3  ;;  %s1431_s9 = scalar_lea.vmem %s1541_s4, %s1549_s15  ;;  %753 = vst [vmem:[%s1426_s6] sm:$0x1] %v1323_v20 }
  0x11   : > { %v1283_v4 = vld [vmem:[%s1387_s29] sm:$0xff]   ;;  %v1284_v5 = vld [vmem:[%s1387_s29 + $0x8] sm:$0xff]   ;;  %v1285_v6 = vld [vmem:[%s1387_s29 + $0x10] sm:$0xff]   ;;  %754 = vst [vmem:[%s1431_s9] sm:$0x1] %v1323_v20  ;;  %s1440_s12 = scalar_lea.vmem %s1539_s2, %s991_s26 }
  0x12   : > { %1215 = vmatprep.mubr.msk.bf16.mxu0 %vm375_vm1, %v1283_v4  ;;  %v1286_v7 = vld [vmem:[%s1387_s29 + $0x18] sm:$0xff]   ;;  %v1291_v8 = vld [vmem:[%s1387_s29 + $0x40] sm:$0xff]   ;;  %v1292_v9 = vld [vmem:[%s1387_s29 + $0x48] sm:$0xff]  }
  0x13   : > { %1216 = vmatmul.mubr.msk.bf16.vlgmr.msra.gmra.mrb[0].mxu0 %vm375_vm1, %v1284_v5  ;;  %1231 = vmatprep.mubr.msk.bf16.mxu1 %vm375_vm1, %v1291_v8  ;;  %v1293_v10 = vld [vmem:[%s1387_s29 + $0x50] sm:$0xff]   ;;  %v1287_v11 = vld [vmem:[%s1387_s29 + $0x20] sm:$0xff]   ;;  %v1294_v12 = vld [vmem:[%s1387_s29 + $0x58] sm:$0xff]  }
  0x14   : > { %1219 = vmatprep.mubr.msk.bf16.mxu0 %vm375_vm1, %v1285_v6  ;;  %1232 = vmatmul.mubr.msk.bf16.vlgmr.msra.gmra.mrb[0].mxu1 %vm375_vm1, %v1292_v9  ;;  %v1295_v13 = vld [vmem:[%s1387_s29 + $0x60] sm:$0xff]   ;;  %v1288_v14 = vld [vmem:[%s1387_s29 + $0x28] sm:$0xff]   ;;  %v1289_v15 = vld [vmem:[%s1387_s29 + $0x30] sm:$0xff]  }
  0x15   : > { %1235 = vmatprep.mubr.msk.bf16.mxu1 %vm375_vm1, %v1293_v10  ;;  %v1296_v16 = vld [vmem:[%s1387_s29 + $0x68] sm:$0xff]   ;;  %v1297_v17 = vld [vmem:[%s1387_s29 + $0x70] sm:$0xff]   ;;  %v1290_v18 = vld [vmem:[%s1387_s29 + $0x38] sm:$0xff]  }
  0x16   : > { %v1298_v19 = vld [vmem:[%s1387_s29 + $0x78] sm:$0xff]  }
  0x1b   : > { %1220 = vmatmul.mubr.msk.bf16.gmra.mrb[4].mxu0 %vm375_vm1, %v1286_v7 }
  0x1c   : > { %1223 = vmatprep.mubr.msk.bf16.mxu0 %vm375_vm1, %v1287_v11  ;;  %1236 = vmatmul.mubr.msk.bf16.gmra.mrb[4].mxu1 %vm375_vm1, %v1294_v12 }
  0x1d   : > { %1239 = vmatprep.mubr.msk.bf16.mxu1 %vm375_vm1, %v1295_v13 }
  0x23   : > { %1224 = vmatmul.mubr.msk.bf16.gmra.mrb[8].mxu0 %vm375_vm1, %v1288_v14 }
  0x24   : > { %1227 = vmatprep.mubr.msk.bf16.mxu0 %vm375_vm1, %v1289_v15  ;;  %1240 = vmatmul.mubr.msk.bf16.gmra.mrb[8].mxu1 %vm375_vm1, %v1296_v16 }
  0x25   : > { %1243 = vmatprep.mubr.msk.bf16.mxu1 %vm375_vm1, %v1297_v17 }
  0x2b   : > { %1228 = vmatmul.mubr.msk.bf16.gmra.mrb[12].mxu0 %vm375_vm1, %v1290_v18 }
  0x2c   : > { %1244 = vmatmul.mubr.msk.bf16.gmra.mrb[12].mxu1 %vm375_vm1, %v1298_v19 }
  0xe6   : > { %v1217_v21 = vpop.f32.mrb[0].mxu0 }
  0xe7   : > { %v462_v22 = vpop.f32.mrb[1].mxu0  ;;  %v1443_v30 = vpop.f32.mrb[0].mxu1  ;;  %v798_v31 = vmul.f32 %v1217_v21, %v1217_v21 }
  0xe8   : > { %v1218_v23 = vpop.f32.mrb[2].mxu0  ;;  %v796_v26 = vmul.f32 %v462_v22, %v462_v22  ;;  %v1446_v34 = vpop.f32.mrb[1].mxu1 }
  0xe9   : > { %v1103_v24 = vpack.c.bf16 %v1218_v23, %v1217_v21  ;;  %v465_v25 = vpop.f32.mrb[3].mxu0  ;;  %v1448_v35 = vpop.f32.mrb[2].mxu1  ;;  %v799_v36 = vmul.f32 %v1218_v23, %v1218_v23 }
  0xea   : > { %v1098_v27 = vpack.c.bf16 %v465_v25, %v462_v22  ;;  %v756_v28 = vadd.f32 %v465_v25, %v462_v22  ;;  %v797_v29 = vmul.f32 %v465_v25, %v465_v25  ;;  %v1143_v40 = vpack.c.bf16 %v1448_v35, %v1443_v30  ;;  %v1452_v41 = vpop.f32.mrb[3].mxu1 }
  0xeb   : > { %1175 = vst [vmem:[%s1440_s12 + $0x8] sm:$0xff] %v1103_v24   ;;  %v1138_v43 = vpack.c.bf16 %v1452_v41, %v1446_v34 }
  0xec   : > { %1099 = vst [vmem:[%s1440_s12] sm:$0xff] %v1098_v27   ;;  %v757_v32 = vadd.f32 %v1217_v21, %v756_v28  ;;  %v828_v33 = vadd.f32 %v797_v29, %v796_v26  ;;  %1183 = vst [vmem:[%s1440_s12 + $0x48] sm:$0xff] %v1143_v40  }
  0xed   : > { %1182 = vst [vmem:[%s1440_s12 + $0x40] sm:$0xff] %v1138_v43  }
  0xee   : > { %v829_v37 = vadd.f32 %v828_v33, %v798_v31  ;;  %v1221_v38 = vpop.f32.mrb[4].mxu0  ;;  %v758_v39 = vadd.f32 %v1218_v23, %v757_v32 }
  0xef   : > { %v478_v42 = vpop.f32.mrb[5].mxu0  ;;  %v1459_v54 = vpop.f32.mrb[4].mxu1  ;;  %v802_v55 = vmul.f32 %v1221_v38, %v1221_v38 }
  0xf0   : > { %v759_v44 = vadd.f32 %v758_v39, %v478_v42  ;;  %v800_v45 = vmul.f32 %v478_v42, %v478_v42  ;;  %v830_v46 = vadd.f32 %v829_v37, %v799_v36  ;;  %v1222_v47 = vpop.f32.mrb[6].mxu0  ;;  %v1462_v58 = vpop.f32.mrb[5].mxu1 }
  0xf1   : > { %v1113_v48 = vpack.c.bf16 %v1222_v47, %v1221_v38  ;;  %v481_v49 = vpop.f32.mrb[7].mxu0  ;;  %v1464_v59 = vpop.f32.mrb[6].mxu1  ;;  %v803_v60 = vmul.f32 %v1222_v47, %v1222_v47 }
  0xf2   : > { %v831_v50 = vadd.f32 %v830_v46, %v800_v45  ;;  %v1108_v51 = vpack.c.bf16 %v481_v49, %v478_v42  ;;  %v760_v52 = vadd.f32 %v759_v44, %v481_v49  ;;  %v801_v53 = vmul.f32 %v481_v49, %v481_v49  ;;  %v1468_v1 = vpop.f32.mrb[7].mxu1 }
  0xf3   : > { %1177 = vst [vmem:[%s1440_s12 + $0x18] sm:$0xff] %v1113_v48   ;;  %v1153_v0 = vpack.c.bf16 %v1464_v59, %v1459_v54  ;;  %v1148_v3 = vpack.c.bf16 %v1468_v1, %v1462_v58 }
  0xf4   : > { %1176 = vst [vmem:[%s1440_s12 + $0x10] sm:$0xff] %v1108_v51   ;;  %v761_v56 = vadd.f32 %v1221_v38, %v760_v52  ;;  %v832_v57 = vadd.f32 %v831_v50, %v801_v53 }
  0xf5   : > { %1185 = vst [vmem:[%s1440_s12 + $0x58] sm:$0xff] %v1153_v0   ;;  %1184 = vst [vmem:[%s1440_s12 + $0x50] sm:$0xff] %v1148_v3   ;;  %v815_v3 = vmul.f32 %v1448_v35, %v1448_v35 }
  0xf6   : > { %v833_v61 = vadd.f32 %v832_v57, %v802_v55  ;;  %v1225_v62 = vpop.f32.mrb[8].mxu0  ;;  %v762_v63 = vadd.f32 %v1222_v47, %v761_v56  ;;  %v812_v47 = vmul.f32 %v1446_v34, %v1446_v34 }
  0xf7   : > { %v494_v2 = vpop.f32.mrb[9].mxu0  ;;  %v1475_v14 = vpop.f32.mrb[8].mxu1  ;;  %v806_v15 = vmul.f32 %v1225_v62, %v1225_v62 }
  0xf8   : > { %v763_v4 = vadd.f32 %v762_v63, %v494_v2  ;;  %v804_v5 = vmul.f32 %v494_v2, %v494_v2  ;;  %v834_v6 = vadd.f32 %v833_v61, %v803_v60  ;;  %v1226_v7 = vpop.f32.mrb[10].mxu0  ;;  %v1478_v18 = vpop.f32.mrb[9].mxu1  ;;  %v814_v63 = vmul.f32 %v1443_v30, %v1443_v30 }
  0xf9   : > { %v1123_v8 = vpack.c.bf16 %v1226_v7, %v1225_v62  ;;  %v497_v9 = vpop.f32.mrb[11].mxu0  ;;  %v1480_v19 = vpop.f32.mrb[10].mxu1  ;;  %v807_v20 = vmul.f32 %v1226_v7, %v1226_v7 }
  0xfa   : > { %v835_v10 = vadd.f32 %v834_v6, %v804_v5  ;;  %v1118_v11 = vpack.c.bf16 %v497_v9, %v494_v2  ;;  %v764_v12 = vadd.f32 %v763_v4, %v497_v9  ;;  %v805_v13 = vmul.f32 %v497_v9, %v497_v9  ;;  %v561_v25 = vpop.f32.mrb[11].mxu1 }
  0xfb   : > { %1179 = vst [vmem:[%s1440_s12 + $0x28] sm:$0xff] %v1123_v8   ;;  %v1163_v24 = vpack.c.bf16 %v1480_v19, %v1475_v14  ;;  %v1158_v27 = vpack.c.bf16 %v561_v25, %v1478_v18  ;;  %v816_v5 = vmul.f32 %v1462_v58, %v1462_v58  ;;  %v817_v9 = vmul.f32 %v1468_v1, %v1468_v1 }
  0xfc   : > { %1178 = vst [vmem:[%s1440_s12 + $0x20] sm:$0xff] %v1118_v11   ;;  %v765_v16 = vadd.f32 %v1225_v62, %v764_v12  ;;  %v836_v17 = vadd.f32 %v835_v10, %v805_v13  ;;  %v813_v62 = vmul.f32 %v1452_v41, %v1452_v41 }
  0xfd   : > { %1187 = vst [vmem:[%s1440_s12 + $0x68] sm:$0xff] %v1163_v24   ;;  %1186 = vst [vmem:[%s1440_s12 + $0x60] sm:$0xff] %v1158_v27  }
  0xfe   : > { %v837_v21 = vadd.f32 %v836_v17, %v806_v15  ;;  %v1229_v22 = vpop.f32.mrb[12].mxu0  ;;  %v766_v23 = vadd.f32 %v1226_v7, %v765_v16 }
  0xff   : > { %v510_v26 = vpop.f32.mrb[13].mxu0  ;;  %v1245_v42 = vpop.f32.mrb[12].mxu1  ;;  %v810_v43 = vmul.f32 %v1229_v22, %v1229_v22 }
 0x100   : > { %v767_v28 = vadd.f32 %v766_v23, %v510_v26  ;;  %v808_v29 = vmul.f32 %v510_v26, %v510_v26  ;;  %v838_v31 = vadd.f32 %v837_v21, %v807_v20  ;;  %v1230_v32 = vpop.f32.mrb[14].mxu0  ;;  %v574_v46 = vpop.f32.mrb[13].mxu1  ;;  %v821_v20 = vmul.f32 %v561_v25, %v561_v25 }
 0x101   : > { %v1133_v33 = vpack.c.bf16 %v1230_v32, %v1229_v22  ;;  %v513_v36 = vpop.f32.mrb[15].mxu0  ;;  %v1246_v48 = vpop.f32.mrb[14].mxu1  ;;  %v811_v49 = vmul.f32 %v1230_v32, %v1230_v32  ;;  %v822_v21 = vmul.f32 %v1475_v14, %v1475_v14  ;;  %v823_v23 = vmul.f32 %v1480_v19, %v1480_v19 }
 0x102   : > { %v839_v37 = vadd.f32 %v838_v31, %v808_v29  ;;  %v1128_v38 = vpack.c.bf16 %v513_v36, %v510_v26  ;;  %v768_v39 = vadd.f32 %v767_v28, %v513_v36  ;;  %v809_v40 = vmul.f32 %v513_v36, %v513_v36  ;;  %v577_v53 = vpop.f32.mrb[15].mxu1 }
 0x103   : > { %1181 = vst [vmem:[%s1440_s12 + $0x38] sm:$0xff] %v1133_v33   ;;  %v1173_v52 = vpack.c.bf16 %v1246_v48, %v1245_v42  ;;  %v1168_v55 = vpack.c.bf16 %v577_v53, %v574_v46  ;;  %v824_v26 = vmul.f32 %v574_v46, %v574_v46  ;;  %v825_v31 = vmul.f32 %v577_v53, %v577_v53 }
 0x104   : > { %1180 = vst [vmem:[%s1440_s12 + $0x30] sm:$0xff] %v1128_v38   ;;  %v769_v44 = vadd.f32 %v1229_v22, %v768_v39  ;;  %v840_v45 = vadd.f32 %v839_v37, %v809_v40  ;;  %v827_v36 = vmul.f32 %v1246_v48, %v1246_v48 }
 0x105   : > { %1189 = vst [vmem:[%s1440_s12 + $0x78] sm:$0xff] %v1173_v52   ;;  %1188 = vst [vmem:[%s1440_s12 + $0x70] sm:$0xff] %v1168_v55   ;;  %v795_v52 = vld [vmem:[%s1431_s9] sm:$0x1] }
 0x106   : > { %v841_v50 = vadd.f32 %v840_v45, %v810_v43  ;;  %v770_v51 = vadd.f32 %v1230_v32, %v769_v44  ;;  %v826_v32 = vmul.f32 %v1245_v42, %v1245_v42 }
 0x108   : > { %v771_v56 = vadd.f32 %v770_v51, %v1446_v34  ;;  %v842_v57 = vadd.f32 %v841_v50, %v811_v49  ;;  %v755_v50 = vld [vmem:[%s1426_s6] sm:$0x1] }
 0x10a   : > { %v843_v60 = vadd.f32 %v842_v57, %v812_v47  ;;  %v772_v61 = vadd.f32 %v771_v56, %v1452_v41 }
 0x10c   : > { %v773_v0 = vadd.f32 %v1443_v30, %v772_v61  ;;  %v844_v2 = vadd.f32 %v843_v60, %v813_v62  ;;  %v818_v30 = vmul.f32 %v1459_v54, %v1459_v54 }
 0x10e   : > { %v845_v4 = vadd.f32 %v844_v2, %v814_v63  ;;  %v774_v34 = vadd.f32 %v1448_v35, %v773_v0  ;;  %v819_v35 = vmul.f32 %v1464_v59, %v1464_v59 }
 0x110   : > { %v775_v6 = vadd.f32 %v774_v34, %v1462_v58  ;;  %v846_v7 = vadd.f32 %v845_v4, %v815_v3  ;;  %v820_v58 = vmul.f32 %v1478_v18, %v1478_v18 }
 0x112   : > { %v847_v8 = vadd.f32 %v846_v7, %v816_v5  ;;  %v776_v41 = vadd.f32 %v775_v6, %v1468_v1 }
 0x114   : > { %v777_v10 = vadd.f32 %v1459_v54, %v776_v41  ;;  %v848_v11 = vadd.f32 %v847_v8, %v817_v9 }
 0x116   : > { %v849_v12 = vadd.f32 %v848_v11, %v818_v30  ;;  %v778_v13 = vadd.f32 %v1464_v59, %v777_v10 }
 0x118   : > { %v779_v15 = vadd.f32 %v778_v13, %v1478_v18  ;;  %v850_v16 = vadd.f32 %v849_v12, %v819_v35 }
 0x11a   : > { %v851_v17 = vadd.f32 %v850_v16, %v820_v58  ;;  %v780_v1 = vadd.f32 %v779_v15, %v561_v25 }
 0x11c   : > { %v781_v54 = vadd.f32 %v1475_v14, %v780_v1  ;;  %v852_v22 = vadd.f32 %v851_v17, %v821_v20 }
 0x11e   : > { %v853_v24 = vadd.f32 %v852_v22, %v822_v21  ;;  %v782_v59 = vadd.f32 %v1480_v19, %v781_v54 }
 0x120   : > { %v783_v27 = vadd.f32 %v782_v59, %v574_v46  ;;  %v854_v28 = vadd.f32 %v853_v24, %v823_v23 }
 0x122   : > { %v855_v18 = vadd.f32 %v854_v28, %v824_v26  ;;  %v784_v29 = vadd.f32 %v783_v27, %v577_v53 }
 0x124   : > { %v785_v25 = vadd.f32 %v1245_v42, %v784_v29  ;;  %v856_v33 = vadd.f32 %v855_v18, %v825_v31 }
 0x126   : > { %v786_v14 = vadd.f32 %v1246_v48, %v785_v25  ;;  %v857_v37 = vadd.f32 %v856_v33, %v826_v32 }
 0x128   : > { %v787_v38 = vrot.slane %v786_v14, 4  ;;  %v858_v39 = vadd.f32 %v857_v37, %v827_v36 }
 0x12a   : > { %v788_v40 = vadd.f32 %v787_v38, %v786_v14  ;;  %v859_v19 = vrot.slane %v858_v39, 4 }
 0x12c   : > { %v789_v43 = vrot.slane %v788_v40, 2  ;;  %v860_v44 = vadd.f32 %v859_v19, %v858_v39 }
 0x12e   : > { %v790_v45 = vadd.f32 %v789_v43, %v788_v40  ;;  %v861_v46 = vrot.slane %v860_v44, 2 }
 0x130   : > { %v791_v47 = vrot.slane %v790_v45, 1  ;;  %v862_v49 = vadd.f32 %v861_v46, %v860_v44 }
 0x132   : > { %v792_v51 = vadd.f32 %v791_v47, %v790_v45  ;;  %v863_v42 = vrot.slane %v862_v49, 1 }
 0x134   : > { %v793_v53 = vadd.f32 %v792_v51, %v755_v50  ;;  %v864_v55 = vadd.f32 %v863_v42, %v862_v49 }
 0x136   : > { %794 = vst [vmem:[%s1426_s6] sm:$0x1] %v793_v53  ;;  %v865_v48 = vadd.f32 %v864_v55, %v795_v52 }
 0x138   : > { %866 = vst [vmem:[%s1431_s9] sm:$0x1] %v865_v48 }
 0x139 PF: > { %s15_s17 = sadd.s32 1, %s1321_s17   ;;  %s1542_s15 = smov %s1317_s16 }
 0x13a   : > { %p12_p6 = scmp.ge.s32.totalorder %s15_s17, 4   ;;  %s1543_s16 = smov %s1545_s18 }
 0x13c   :  { %14 = sbr.rel (!%p12_p6) target bundleno = 2 (0x2), region = 86 }

// kernel: shallow_block_forward.7
= control target key start
LH: loop header
LB: loop body
LE: loop exit
PB: predicated region body
PF: predicated region fallthrough
CT: control target
= control target key end

     0   :  { %s1800_s0 = inlined_call_operand.vmem [shape: bf16[512,128], index: 0, kind: input, shape index: {}]   ;;  %s1801_s1 = inlined_call_operand.vmem [shape: f32[1,128], index: 1, kind: input, shape index: {}]   ;;  %s1802_s2 = inlined_call_operand.vmem [shape: f32[1,128], index: 2, kind: input, shape index: {}]   ;;  %s1803_s3 = inlined_call_operand.vmem [shape: bf16[512,128], index: 3, kind: input, shape index: {}]   ;;  %s1804_s4 = inlined_call_operand.vmem [shape: f32[1,128], index: 4, kind: input, shape index: {}]   ;;  %s1805_s5 = inlined_call_operand.vmem [shape: f32[1,128], index: 5, kind: input, shape index: {}]   ;;  %s1806_s6 = inlined_call_operand.vmem [shape: f32[512,128], index: 6, kind: output, shape index: {}]  }
   0x1   :  { %v764_v0 = vld [vmem:[%s1800_s0] sm:$0xff]   ;;  %v1019_v10 = vld [vmem:[%s1800_s0 + $0x8] sm:$0xff]   ;;  %v1020_v20 = vld [vmem:[%s1800_s0 + $0x10] sm:$0xff]  }
   0x2   :  { %v892_v1 = vld [vmem:[%s1803_s3] sm:$0xff]   ;;  %v765_v3 = vunpack.c.l.bf16 %v764_v0  ;;  %v766_v7 = vunpack.c.h.bf16 %v764_v0  ;;  %v1050_v11 = vld [vmem:[%s1803_s3 + $0x8] sm:$0xff]   ;;  %v769_v16 = vunpack.c.l.bf16 %v1019_v10  ;;  %v770_v18 = vunpack.c.h.bf16 %v1019_v10  ;;  %v1051_v21 = vld [vmem:[%s1803_s3 + $0x10] sm:$0xff]  }
   0x3   :  { %v1129_v2 = vld [vmem:[%s1801_s1] ss:$0 sm:$0xff]  ;;  %v893_v4 = vunpack.c.l.bf16 %v892_v1  ;;  %v894_v8 = vunpack.c.h.bf16 %v892_v1  ;;  %v897_v17 = vunpack.c.l.bf16 %v1050_v11  ;;  %v898_v19 = vunpack.c.h.bf16 %v1050_v11  ;;  %v1021_v38 = vld [vmem:[%s1800_s0 + $0x18] sm:$0xff]  }
   0x4   :  { %v1134_v5 = vld [vmem:[%s1802_s2] ss:$0 sm:$0xff]  ;;  %v286_v12 = vmul.f32 %v765_v3, %v1129_v2  ;;  %v287_v14 = vmul.f32 %v766_v7, %v1129_v2  ;;  %v288_v26 = vmul.f32 %v769_v16, %v1129_v2  ;;  %v289_v28 = vmul.f32 %v770_v18, %v1129_v2  ;;  %v1052_v39 = vld [vmem:[%s1803_s3 + $0x18] sm:$0xff]  }
   0x5   :  { %v1139_v6 = vld [vmem:[%s1804_s4] ss:$0 sm:$0xff]  ;;  %v773_v32 = vunpack.c.l.bf16 %v1020_v20  ;;  %v901_v33 = vunpack.c.l.bf16 %v1051_v21  ;;  %v774_v46 = vunpack.c.h.bf16 %v1020_v20  ;;  %v902_v47 = vunpack.c.h.bf16 %v1051_v21 }
   0x6   :  { %v1144_v9 = vld [vmem:[%s1805_s5] ss:$0 sm:$0xff]  ;;  %v428_v13 = vmul.f32 %v893_v4, %v1139_v6  ;;  %v429_v15 = vmul.f32 %v894_v8, %v1139_v6  ;;  %v357_v22 = vadd.f32 %v1134_v5, %v286_v12  ;;  %v358_v24 = vadd.f32 %v1134_v5, %v287_v14  ;;  %v1023_v14 = vld [vmem:[%s1800_s0 + $0x28] sm:$0xff]  }
   0x7   :  { %v430_v27 = vmul.f32 %v897_v17, %v1139_v6  ;;  %v431_v29 = vmul.f32 %v898_v19, %v1139_v6  ;;  %v359_v34 = vadd.f32 %v1134_v5, %v288_v26  ;;  %v360_v36 = vadd.f32 %v1134_v5, %v289_v28  ;;  %v1022_v52 = vld [vmem:[%s1800_s0 + $0x20] sm:$0xff]   ;;  %v1054_v19 = vld [vmem:[%s1803_s3 + $0x28] sm:$0xff]  }
   0x8   :  { %v499_v23 = vadd.f32 %v1144_v9, %v428_v13  ;;  %v500_v25 = vadd.f32 %v1144_v9, %v429_v15  ;;  %v290_v42 = vmul.f32 %v773_v32, %v1129_v2  ;;  %v432_v43 = vmul.f32 %v901_v33, %v1139_v6  ;;  %v1053_v61 = vld [vmem:[%s1803_s3 + $0x20] sm:$0xff]   ;;  %v1024_v32 = vld [vmem:[%s1800_s0 + $0x30] sm:$0xff]  }
   0x9   :  { %v501_v35 = vadd.f32 %v1144_v9, %v430_v27  ;;  %v502_v37 = vadd.f32 %v1144_v9, %v431_v29  ;;  %v777_v50 = vunpack.c.l.bf16 %v1021_v38  ;;  %v905_v51 = vunpack.c.l.bf16 %v1052_v39 }
   0xa   :  { %v563_v30 = vadd.f32 %v499_v23, %v357_v22  ;;  %v564_v31 = vadd.f32 %v500_v25, %v358_v24  ;;  %v361_v48 = vadd.f32 %v1134_v5, %v290_v42  ;;  %v503_v49 = vadd.f32 %v1144_v9, %v432_v43 }
   0xb   :  { %v565_v44 = vadd.f32 %v501_v35, %v359_v34  ;;  %v566_v45 = vadd.f32 %v502_v37, %v360_v36  ;;  %v291_v55 = vmul.f32 %v774_v46, %v1129_v2  ;;  %v433_v56 = vmul.f32 %v902_v47, %v1139_v6  ;;  %v1055_v37 = vld [vmem:[%s1803_s3 + $0x30] sm:$0xff]   ;;  %v1025_v46 = vld [vmem:[%s1800_s0 + $0x38] sm:$0xff]  }
   0xc   :  { %v627_v40 = vmax.f32 %v563_v30, 0.0  ;;  %v628_v41 = vmax.f32 %v564_v31, 0.0  ;;  %v567_v57 = vadd.f32 %v503_v49, %v361_v48  ;;  %v292_v58 = vmul.f32 %v777_v50, %v1129_v2 }
   0xd   :  { %v629_v53 = vmax.f32 %v565_v44, 0.0  ;;  %v630_v54 = vmax.f32 %v566_v45, 0.0  ;;  %v434_v59 = vmul.f32 %v905_v51, %v1139_v6  ;;  %v778_v60 = vunpack.c.h.bf16 %v1021_v38  ;;  %v1056_v51 = vld [vmem:[%s1803_s3 + $0x38] sm:$0xff]  }
   0xe   :  { %691 = vst [vmem:[%s1806_s6] sm:$0xff] %v627_v40  ;;  %692 = vst [vmem:[%s1806_s6 + $0x8] sm:$0xff] %v628_v41  ;;  %v362_v62 = vadd.f32 %v1134_v5, %v291_v55  ;;  %v504_v63 = vadd.f32 %v1144_v9, %v433_v56  ;;  %v906_v0 = vunpack.c.h.bf16 %v1052_v39  ;;  %v781_v1 = vunpack.c.l.bf16 %v1022_v52 }
   0xf   :  { %693 = vst [vmem:[%s1806_s6 + $0x10] sm:$0xff] %v629_v53  ;;  %694 = vst [vmem:[%s1806_s6 + $0x18] sm:$0xff] %v630_v54  ;;  %v631_v3 = vmax.f32 %v567_v57, 0.0  ;;  %v363_v4 = vadd.f32 %v1134_v5, %v292_v58  ;;  %v505_v7 = vadd.f32 %v1144_v9, %v434_v59  ;;  %v293_v8 = vmul.f32 %v778_v60, %v1129_v2 }
  0x10   :  { %v568_v10 = vadd.f32 %v504_v63, %v362_v62  ;;  %v435_v11 = vmul.f32 %v906_v0, %v1139_v6  ;;  %v909_v12 = vunpack.c.l.bf16 %v1053_v61  ;;  %v294_v13 = vmul.f32 %v781_v1, %v1129_v2 }
  0x11   :  { %695 = vst [vmem:[%s1806_s6 + $0x20] sm:$0xff] %v631_v3  ;;  %v569_v15 = vadd.f32 %v505_v7, %v363_v4  ;;  %v364_v16 = vadd.f32 %v1134_v5, %v293_v8  ;;  %v782_v17 = vunpack.c.h.bf16 %v1022_v52  ;;  %v910_v18 = vunpack.c.h.bf16 %v1053_v61  ;;  %v1026_v7 = vld [vmem:[%s1800_s0 + $0x40] sm:$0xff]  }
  0x12   :  { %v632_v20 = vmax.f32 %v568_v10, 0.0  ;;  %v506_v21 = vadd.f32 %v1144_v9, %v435_v11  ;;  %v365_v22 = vadd.f32 %v1134_v5, %v294_v13  ;;  %v436_v23 = vmul.f32 %v909_v12, %v1139_v6  ;;  %v1057_v8 = vld [vmem:[%s1803_s3 + $0x40] sm:$0xff]  }
  0x13   :  { %v633_v24 = vmax.f32 %v569_v15, 0.0  ;;  %v295_v25 = vmul.f32 %v782_v17, %v1129_v2  ;;  %v437_v26 = vmul.f32 %v910_v18, %v1139_v6  ;;  %v785_v27 = vunpack.c.l.bf16 %v1023_v14 }
  0x14   :  { %696 = vst [vmem:[%s1806_s6 + $0x28] sm:$0xff] %v632_v20  ;;  %v570_v28 = vadd.f32 %v506_v21, %v364_v16  ;;  %v507_v29 = vadd.f32 %v1144_v9, %v436_v23  ;;  %v913_v30 = vunpack.c.l.bf16 %v1054_v19  ;;  %v786_v31 = vunpack.c.h.bf16 %v1023_v14 }
  0x15   :  { %697 = vst [vmem:[%s1806_s6 + $0x30] sm:$0xff] %v633_v24  ;;  %v366_v33 = vadd.f32 %v1134_v5, %v295_v25  ;;  %v508_v34 = vadd.f32 %v1144_v9, %v437_v26  ;;  %v296_v35 = vmul.f32 %v785_v27, %v1129_v2  ;;  %v914_v36 = vunpack.c.h.bf16 %v1054_v19  ;;  %v1027_v26 = vld [vmem:[%s1800_s0 + $0x48] sm:$0xff]  }
  0x16   :  { %v634_v38 = vmax.f32 %v570_v28, 0.0  ;;  %v571_v39 = vadd.f32 %v507_v29, %v365_v22  ;;  %v438_v40 = vmul.f32 %v913_v30, %v1139_v6  ;;  %v297_v41 = vmul.f32 %v786_v31, %v1129_v2  ;;  %v1058_v31 = vld [vmem:[%s1803_s3 + $0x48] sm:$0xff]  }
  0x17   :  { %v572_v42 = vadd.f32 %v508_v34, %v366_v33  ;;  %v367_v43 = vadd.f32 %v1134_v5, %v296_v35  ;;  %v439_v44 = vmul.f32 %v914_v36, %v1139_v6  ;;  %v789_v45 = vunpack.c.l.bf16 %v1024_v32 }
  0x18   :  { %698 = vst [vmem:[%s1806_s6 + $0x38] sm:$0xff] %v634_v38  ;;  %v635_v47 = vmax.f32 %v571_v39, 0.0  ;;  %v509_v48 = vadd.f32 %v1144_v9, %v438_v40  ;;  %v368_v49 = vadd.f32 %v1134_v5, %v297_v41  ;;  %v917_v50 = vunpack.c.l.bf16 %v1055_v37  ;;  %v1028_v40 = vld [vmem:[%s1800_s0 + $0x50] sm:$0xff]  }
  0x19   :  { %v636_v52 = vmax.f32 %v572_v42, 0.0  ;;  %v510_v53 = vadd.f32 %v1144_v9, %v439_v44  ;;  %v298_v54 = vmul.f32 %v789_v45, %v1129_v2  ;;  %v790_v55 = vunpack.c.h.bf16 %v1024_v32 }
  0x1a   :  { %699 = vst [vmem:[%s1806_s6 + $0x40] sm:$0xff] %v635_v47  ;;  %v573_v56 = vadd.f32 %v509_v48, %v367_v43  ;;  %v440_v57 = vmul.f32 %v917_v50, %v1139_v6  ;;  %v918_v58 = vunpack.c.h.bf16 %v1055_v37  ;;  %v793_v59 = vunpack.c.l.bf16 %v1025_v46 }
  0x1b   :  { %700 = vst [vmem:[%s1806_s6 + $0x48] sm:$0xff] %v636_v52  ;;  %v574_v60 = vadd.f32 %v510_v53, %v368_v49  ;;  %v369_v61 = vadd.f32 %v1134_v5, %v298_v54  ;;  %v299_v62 = vmul.f32 %v790_v55, %v1129_v2  ;;  %v921_v63 = vunpack.c.l.bf16 %v1056_v51  ;;  %v1059_v49 = vld [vmem:[%s1803_s3 + $0x50] sm:$0xff]  }
  0x1c   :  { %v637_v0 = vmax.f32 %v573_v56, 0.0  ;;  %v511_v1 = vadd.f32 %v1144_v9, %v440_v57  ;;  %v441_v3 = vmul.f32 %v918_v58, %v1139_v6  ;;  %v300_v4 = vmul.f32 %v793_v59, %v1129_v2 }
  0x1d   :  { %v638_v10 = vmax.f32 %v574_v60, 0.0  ;;  %v370_v11 = vadd.f32 %v1134_v5, %v299_v62  ;;  %v442_v12 = vmul.f32 %v921_v63, %v1139_v6  ;;  %v794_v13 = vunpack.c.h.bf16 %v1025_v46  ;;  %v1029_v62 = vld [vmem:[%s1800_s0 + $0x58] sm:$0xff]  }
  0x1e   :  { %701 = vst [vmem:[%s1806_s6 + $0x50] sm:$0xff] %v637_v0  ;;  %v575_v14 = vadd.f32 %v511_v1, %v369_v61  ;;  %v512_v15 = vadd.f32 %v1144_v9, %v441_v3  ;;  %v371_v16 = vadd.f32 %v1134_v5, %v300_v4  ;;  %v922_v17 = vunpack.c.h.bf16 %v1056_v51  ;;  %v1060_v4 = vld [vmem:[%s1803_s3 + $0x58] sm:$0xff]  }
  0x1f   :  { %702 = vst [vmem:[%s1806_s6 + $0x58] sm:$0xff] %v638_v10  ;;  %v513_v18 = vadd.f32 %v1144_v9, %v442_v12  ;;  %v301_v19 = vmul.f32 %v794_v13, %v1129_v2  ;;  %v797_v20 = vunpack.c.l.bf16 %v1026_v7  ;;  %v925_v21 = vunpack.c.l.bf16 %v1057_v8 }
  0x20   :  { %v639_v22 = vmax.f32 %v575_v14, 0.0  ;;  %v576_v23 = vadd.f32 %v512_v15, %v370_v11  ;;  %v443_v24 = vmul.f32 %v922_v17, %v1139_v6  ;;  %v798_v25 = vunpack.c.h.bf16 %v1026_v7 }
  0x21   :  { %v577_v27 = vadd.f32 %v513_v18, %v371_v16  ;;  %v372_v28 = vadd.f32 %v1134_v5, %v301_v19  ;;  %v302_v29 = vmul.f32 %v797_v20, %v1129_v2  ;;  %v444_v30 = vmul.f32 %v925_v21, %v1139_v6  ;;  %v1030_v20 = vld [vmem:[%s1800_s0 + $0x60] sm:$0xff]  }
  0x22   :  { %703 = vst [vmem:[%s1806_s6 + $0x60] sm:$0xff] %v639_v22  ;;  %v640_v32 = vmax.f32 %v576_v23, 0.0  ;;  %v514_v33 = vadd.f32 %v1144_v9, %v443_v24  ;;  %v926_v34 = vunpack.c.h.bf16 %v1057_v8  ;;  %v303_v35 = vmul.f32 %v798_v25, %v1129_v2  ;;  %v1061_v21 = vld [vmem:[%s1803_s3 + $0x60] sm:$0xff]  }
  0x23   :  { %v641_v36 = vmax.f32 %v577_v27, 0.0  ;;  %v373_v37 = vadd.f32 %v1134_v5, %v302_v29  ;;  %v515_v38 = vadd.f32 %v1144_v9, %v444_v30  ;;  %v801_v39 = vunpack.c.l.bf16 %v1027_v26 }
  0x24   :  { %704 = vst [vmem:[%s1806_s6 + $0x68] sm:$0xff] %v640_v32  ;;  %v578_v41 = vadd.f32 %v514_v33, %v372_v28  ;;  %v374_v42 = vadd.f32 %v1134_v5, %v303_v35  ;;  %v445_v43 = vmul.f32 %v926_v34, %v1139_v6  ;;  %v929_v44 = vunpack.c.l.bf16 %v1058_v31  ;;  %v1031_v34 = vld [vmem:[%s1800_s0 + $0x68] sm:$0xff]  }
  0x25   :  { %705 = vst [vmem:[%s1806_s6 + $0x70] sm:$0xff] %v641_v36  ;;  %v579_v45 = vadd.f32 %v515_v38, %v373_v37  ;;  %v304_v46 = vmul.f32 %v801_v39, %v1129_v2  ;;  %v802_v47 = vunpack.c.h.bf16 %v1027_v26  ;;  %v930_v48 = vunpack.c.h.bf16 %v1058_v31  ;;  %v1062_v39 = vld [vmem:[%s1803_s3 + $0x68] sm:$0xff]  }
  0x26   :  { %v642_v50 = vmax.f32 %v578_v41, 0.0  ;;  %v516_v51 = vadd.f32 %v1144_v9, %v445_v43  ;;  %v446_v52 = vmul.f32 %v929_v44, %v1139_v6  ;;  %v805_v53 = vunpack.c.l.bf16 %v1028_v40 }
  0x27   :  { %v643_v54 = vmax.f32 %v579_v45, 0.0  ;;  %v375_v55 = vadd.f32 %v1134_v5, %v304_v46  ;;  %v305_v56 = vmul.f32 %v802_v47, %v1129_v2  ;;  %v447_v57 = vmul.f32 %v930_v48, %v1139_v6 }
  0x28   :  { %706 = vst [vmem:[%s1806_s6 + $0x78] sm:$0xff] %v642_v50  ;;  %v580_v58 = vadd.f32 %v516_v51, %v374_v42  ;;  %v517_v59 = vadd.f32 %v1144_v9, %v446_v52  ;;  %v933_v60 = vunpack.c.l.bf16 %v1059_v49  ;;  %v306_v61 = vmul.f32 %v805_v53, %v1129_v2 }
  0x29   :  { %707 = vst [vmem:[%s1806_s6 + $0x80] sm:$0xff] %v643_v54  ;;  %v376_v63 = vadd.f32 %v1134_v5, %v305_v56  ;;  %v518_v0 = vadd.f32 %v1144_v9, %v447_v57  ;;  %v806_v1 = vunpack.c.h.bf16 %v1028_v40  ;;  %v934_v3 = vunpack.c.h.bf16 %v1059_v49  ;;  %v1032_v56 = vld [vmem:[%s1800_s0 + $0x70] sm:$0xff]  }
  0x2a   :  { %v644_v7 = vmax.f32 %v580_v58, 0.0  ;;  %v581_v8 = vadd.f32 %v517_v59, %v375_v55  ;;  %v377_v10 = vadd.f32 %v1134_v5, %v306_v61  ;;  %v448_v11 = vmul.f32 %v933_v60, %v1139_v6  ;;  %v1063_v61 = vld [vmem:[%s1803_s3 + $0x70] sm:$0xff]  }
  0x2b   :  { %v582_v12 = vadd.f32 %v518_v0, %v376_v63  ;;  %v307_v13 = vmul.f32 %v806_v1, %v1129_v2  ;;  %v449_v14 = vmul.f32 %v934_v3, %v1139_v6  ;;  %v809_v15 = vunpack.c.l.bf16 %v1029_v62 }
  0x2c   :  { %708 = vst [vmem:[%s1806_s6 + $0x88] sm:$0xff] %v644_v7  ;;  %v645_v16 = vmax.f32 %v581_v8, 0.0  ;;  %v519_v17 = vadd.f32 %v1144_v9, %v448_v11  ;;  %v937_v18 = vunpack.c.l.bf16 %v1060_v4  ;;  %v810_v19 = vunpack.c.h.bf16 %v1029_v62 }
  0x2d   :  { %v646_v22 = vmax.f32 %v582_v12, 0.0  ;;  %v378_v23 = vadd.f32 %v1134_v5, %v307_v13  ;;  %v520_v24 = vadd.f32 %v1144_v9, %v449_v14  ;;  %v308_v25 = vmul.f32 %v809_v15, %v1129_v2  ;;  %v1033_v14 = vld [vmem:[%s1800_s0 + $0x78] sm:$0xff]  }
  0x2e   :  { %709 = vst [vmem:[%s1806_s6 + $0x90] sm:$0xff] %v645_v16  ;;  %v583_v26 = vadd.f32 %v519_v17, %v377_v10  ;;  %v450_v27 = vmul.f32 %v937_v18, %v1139_v6  ;;  %v938_v28 = vunpack.c.h.bf16 %v1060_v4  ;;  %v309_v29 = vmul.f32 %v810_v19, %v1129_v2  ;;  %v1064_v19 = vld [vmem:[%s1803_s3 + $0x78] sm:$0xff]  }
  0x2f   :  { %710 = vst [vmem:[%s1806_s6 + $0x98] sm:$0xff] %v646_v22  ;;  %v584_v30 = vadd.f32 %v520_v24, %v378_v23  ;;  %v379_v31 = vadd.f32 %v1134_v5, %v308_v25  ;;  %v813_v32 = vunpack.c.l.bf16 %v1030_v20  ;;  %v941_v33 = vunpack.c.l.bf16 %v1061_v21 }
  0x30   :  { %v647_v35 = vmax.f32 %v583_v26, 0.0  ;;  %v521_v36 = vadd.f32 %v1144_v9, %v450_v27  ;;  %v380_v37 = vadd.f32 %v1134_v5, %v309_v29  ;;  %v451_v38 = vmul.f32 %v938_v28, %v1139_v6  ;;  %v1034_v28 = vld [vmem:[%s1800_s0 + $0x80] sm:$0xff]  }
  0x31   :  { %v648_v40 = vmax.f32 %v584_v30, 0.0  ;;  %v310_v41 = vmul.f32 %v813_v32, %v1129_v2  ;;  %v452_v42 = vmul.f32 %v941_v33, %v1139_v6  ;;  %v814_v43 = vunpack.c.h.bf16 %v1030_v20 }
  0x32   :  { %711 = vst [vmem:[%s1806_s6 + $0xa0] sm:$0xff] %v647_v35  ;;  %v585_v44 = vadd.f32 %v521_v36, %v379_v31  ;;  %v522_v45 = vadd.f32 %v1144_v9, %v451_v38  ;;  %v942_v46 = vunpack.c.h.bf16 %v1061_v21  ;;  %v817_v47 = vunpack.c.l.bf16 %v1031_v34 }
  0x33   :  { %712 = vst [vmem:[%s1806_s6 + $0xa8] sm:$0xff] %v648_v40  ;;  %v381_v48 = vadd.f32 %v1134_v5, %v310_v41  ;;  %v523_v49 = vadd.f32 %v1144_v9, %v452_v42  ;;  %v311_v50 = vmul.f32 %v814_v43, %v1129_v2  ;;  %v945_v51 = vunpack.c.l.bf16 %v1062_v39 }
  0x34   :  { %v649_v52 = vmax.f32 %v585_v44, 0.0  ;;  %v586_v53 = vadd.f32 %v522_v45, %v380_v37  ;;  %v453_v54 = vmul.f32 %v942_v46, %v1139_v6  ;;  %v312_v55 = vmul.f32 %v817_v47, %v1129_v2  ;;  %v1065_v37 = vld [vmem:[%s1803_s3 + $0x80] sm:$0xff]  }
  0x35   :  { %v587_v57 = vadd.f32 %v523_v49, %v381_v48  ;;  %v382_v58 = vadd.f32 %v1134_v5, %v311_v50  ;;  %v454_v59 = vmul.f32 %v945_v51, %v1139_v6  ;;  %v818_v60 = vunpack.c.h.bf16 %v1031_v34  ;;  %v1035_v50 = vld [vmem:[%s1800_s0 + $0x88] sm:$0xff]  }
  0x36   :  { %713 = vst [vmem:[%s1806_s6 + $0xb0] sm:$0xff] %v649_v52  ;;  %v650_v62 = vmax.f32 %v586_v53, 0.0  ;;  %v524_v63 = vadd.f32 %v1144_v9, %v453_v54  ;;  %v383_v0 = vadd.f32 %v1134_v5, %v312_v55  ;;  %v946_v1 = vunpack.c.h.bf16 %v1062_v39  ;;  %v1066_v51 = vld [vmem:[%s1803_s3 + $0x88] sm:$0xff]  }
  0x37   :  { %v651_v3 = vmax.f32 %v587_v57, 0.0  ;;  %v525_v4 = vadd.f32 %v1144_v9, %v454_v59  ;;  %v313_v7 = vmul.f32 %v818_v60, %v1129_v2  ;;  %v821_v8 = vunpack.c.l.bf16 %v1032_v56 }
  0x38   :  { %714 = vst [vmem:[%s1806_s6 + $0xb8] sm:$0xff] %v650_v62  ;;  %v588_v10 = vadd.f32 %v524_v63, %v382_v58  ;;  %v455_v11 = vmul.f32 %v946_v1, %v1139_v6  ;;  %v949_v12 = vunpack.c.l.bf16 %v1063_v61  ;;  %v822_v13 = vunpack.c.h.bf16 %v1032_v56 }
  0x39   :  { %715 = vst [vmem:[%s1806_s6 + $0xc0] sm:$0xff] %v651_v3  ;;  %v589_v15 = vadd.f32 %v525_v4, %v383_v0  ;;  %v384_v16 = vadd.f32 %v1134_v5, %v313_v7  ;;  %v314_v17 = vmul.f32 %v821_v8, %v1129_v2  ;;  %v950_v18 = vunpack.c.h.bf16 %v1063_v61  ;;  %v1036_v7 = vld [vmem:[%s1800_s0 + $0x90] sm:$0xff]  }
  0x3a   :  { %v652_v20 = vmax.f32 %v588_v10, 0.0  ;;  %v526_v21 = vadd.f32 %v1144_v9, %v455_v11  ;;  %v456_v22 = vmul.f32 %v949_v12, %v1139_v6  ;;  %v315_v23 = vmul.f32 %v822_v13, %v1129_v2  ;;  %v1067_v8 = vld [vmem:[%s1803_s3 + $0x90] sm:$0xff]  }
  0x3b   :  { %v653_v24 = vmax.f32 %v589_v15, 0.0  ;;  %v385_v25 = vadd.f32 %v1134_v5, %v314_v17  ;;  %v457_v26 = vmul.f32 %v950_v18, %v1139_v6  ;;  %v825_v27 = vunpack.c.l.bf16 %v1033_v14 }
  0x3c   :  { %716 = vst [vmem:[%s1806_s6 + $0xc8] sm:$0xff] %v652_v20  ;;  %v590_v29 = vadd.f32 %v526_v21, %v384_v16  ;;  %v527_v30 = vadd.f32 %v1144_v9, %v456_v22  ;;  %v386_v31 = vadd.f32 %v1134_v5, %v315_v23  ;;  %v953_v32 = vunpack.c.l.bf16 %v1064_v19  ;;  %v1037_v22 = vld [vmem:[%s1800_s0 + $0x98] sm:$0xff]  }
  0x3d   :  { %717 = vst [vmem:[%s1806_s6 + $0xd0] sm:$0xff] %v653_v24  ;;  %v528_v33 = vadd.f32 %v1144_v9, %v457_v26  ;;  %v316_v34 = vmul.f32 %v825_v27, %v1129_v2  ;;  %v826_v35 = vunpack.c.h.bf16 %v1033_v14  ;;  %v954_v36 = vunpack.c.h.bf16 %v1064_v19 }
  0x3e   :  { %v654_v38 = vmax.f32 %v590_v29, 0.0  ;;  %v591_v39 = vadd.f32 %v527_v30, %v385_v25  ;;  %v458_v40 = vmul.f32 %v953_v32, %v1139_v6  ;;  %v829_v41 = vunpack.c.l.bf16 %v1034_v28 }
  0x3f   :  { %v592_v42 = vadd.f32 %v528_v33, %v386_v31  ;;  %v387_v43 = vadd.f32 %v1134_v5, %v316_v34  ;;  %v317_v44 = vmul.f32 %v826_v35, %v1129_v2  ;;  %v459_v45 = vmul.f32 %v954_v36, %v1139_v6  ;;  %v1068_v31 = vld [vmem:[%s1803_s3 + $0x98] sm:$0xff]  }
  0x40   :  { %718 = vst [vmem:[%s1806_s6 + $0xd8] sm:$0xff] %v654_v38  ;;  %v655_v46 = vmax.f32 %v591_v39, 0.0  ;;  %v529_v47 = vadd.f32 %v1144_v9, %v458_v40  ;;  %v957_v48 = vunpack.c.l.bf16 %v1065_v37  ;;  %v318_v49 = vmul.f32 %v829_v41, %v1129_v2 }
  0x41   :  { %v656_v52 = vmax.f32 %v592_v42, 0.0  ;;  %v388_v53 = vadd.f32 %v1134_v5, %v317_v44  ;;  %v530_v54 = vadd.f32 %v1144_v9, %v459_v45  ;;  %v830_v55 = vunpack.c.h.bf16 %v1034_v28  ;;  %v1038_v44 = vld [vmem:[%s1800_s0 + $0xa0] sm:$0xff]  }
  0x42   :  { %719 = vst [vmem:[%s1806_s6 + $0xe0] sm:$0xff] %v655_v46  ;;  %v593_v56 = vadd.f32 %v529_v47, %v387_v43  ;;  %v389_v57 = vadd.f32 %v1134_v5, %v318_v49  ;;  %v460_v58 = vmul.f32 %v957_v48, %v1139_v6  ;;  %v958_v59 = vunpack.c.h.bf16 %v1065_v37  ;;  %v1069_v49 = vld [vmem:[%s1803_s3 + $0xa0] sm:$0xff]  }
  0x43   :  { %720 = vst [vmem:[%s1806_s6 + $0xe8] sm:$0xff] %v656_v52  ;;  %v594_v60 = vadd.f32 %v530_v54, %v388_v53  ;;  %v319_v61 = vmul.f32 %v830_v55, %v1129_v2  ;;  %v833_v62 = vunpack.c.l.bf16 %v1035_v50  ;;  %v961_v63 = vunpack.c.l.bf16 %v1066_v51 }
  0x44   :  { %v657_v0 = vmax.f32 %v593_v56, 0.0  ;;  %v531_v1 = vadd.f32 %v1144_v9, %v460_v58  ;;  %v461_v3 = vmul.f32 %v958_v59, %v1139_v6  ;;  %v834_v4 = vunpack.c.h.bf16 %v1035_v50 }
  0x45   :  { %v658_v10 = vmax.f32 %v594_v60, 0.0  ;;  %v390_v11 = vadd.f32 %v1134_v5, %v319_v61  ;;  %v320_v12 = vmul.f32 %v833_v62, %v1129_v2  ;;  %v462_v13 = vmul.f32 %v961_v63, %v1139_v6  ;;  %v1039_v62 = vld [vmem:[%s1800_s0 + $0xa8] sm:$0xff]  }
  0x46   :  { %721 = vst [vmem:[%s1806_s6 + $0xf0] sm:$0xff] %v657_v0  ;;  %v595_v14 = vadd.f32 %v531_v1, %v389_v57  ;;  %v532_v15 = vadd.f32 %v1144_v9, %v461_v3  ;;  %v962_v16 = vunpack.c.h.bf16 %v1066_v51  ;;  %v321_v17 = vmul.f32 %v834_v4, %v1129_v2  ;;  %v1070_v4 = vld [vmem:[%s1803_s3 + $0xa8] sm:$0xff]  }
  0x47   :  { %722 = vst [vmem:[%s1806_s6 + $0xf8] sm:$0xff] %v658_v10  ;;  %v391_v18 = vadd.f32 %v1134_v5, %v320_v12  ;;  %v533_v19 = vadd.f32 %v1144_v9, %v462_v13  ;;  %v837_v20 = vunpack.c.l.bf16 %v1036_v7  ;;  %v965_v21 = vunpack.c.l.bf16 %v1067_v8 }
  0x48   :  { %v659_v23 = vmax.f32 %v595_v14, 0.0  ;;  %v596_v24 = vadd.f32 %v532_v15, %v390_v11  ;;  %v392_v25 = vadd.f32 %v1134_v5, %v321_v17  ;;  %v463_v26 = vmul.f32 %v962_v16, %v1139_v6  ;;  %v1040_v16 = vld [vmem:[%s1800_s0 + $0xb0] sm:$0xff]  }
  0x49   :  { %v597_v27 = vadd.f32 %v533_v19, %v391_v18  ;;  %v322_v28 = vmul.f32 %v837_v20, %v1129_v2  ;;  %v464_v29 = vmul.f32 %v965_v21, %v1139_v6  ;;  %v838_v30 = vunpack.c.h.bf16 %v1036_v7  ;;  %v1071_v21 = vld [vmem:[%s1803_s3 + $0xb0] sm:$0xff]  }
  0x4a   :  { %723 = vst [vmem:[%s1806_s6 + $0x100] sm:$0xff] %v659_v23  ;;  %v660_v32 = vmax.f32 %v596_v24, 0.0  ;;  %v534_v33 = vadd.f32 %v1144_v9, %v463_v26  ;;  %v966_v34 = vunpack.c.h.bf16 %v1067_v8  ;;  %v841_v35 = vunpack.c.l.bf16 %v1037_v22 }
  0x4b   :  { %v661_v36 = vmax.f32 %v597_v27, 0.0  ;;  %v393_v37 = vadd.f32 %v1134_v5, %v322_v28  ;;  %v535_v38 = vadd.f32 %v1144_v9, %v464_v29  ;;  %v323_v39 = vmul.f32 %v838_v30, %v1129_v2 }
  0x4c   :  { %724 = vst [vmem:[%s1806_s6 + $0x108] sm:$0xff] %v660_v32  ;;  %v598_v40 = vadd.f32 %v534_v33, %v392_v25  ;;  %v465_v41 = vmul.f32 %v966_v34, %v1139_v6  ;;  %v969_v42 = vunpack.c.l.bf16 %v1068_v31  ;;  %v324_v43 = vmul.f32 %v841_v35, %v1129_v2 }
  0x4d   :  { %725 = vst [vmem:[%s1806_s6 + $0x110] sm:$0xff] %v661_v36  ;;  %v599_v45 = vadd.f32 %v535_v38, %v393_v37  ;;  %v394_v46 = vadd.f32 %v1134_v5, %v323_v39  ;;  %v842_v47 = vunpack.c.h.bf16 %v1037_v22  ;;  %v970_v48 = vunpack.c.h.bf16 %v1068_v31  ;;  %v1041_v38 = vld [vmem:[%s1800_s0 + $0xb8] sm:$0xff]  }
  0x4e   :  { %v662_v50 = vmax.f32 %v598_v40, 0.0  ;;  %v536_v51 = vadd.f32 %v1144_v9, %v465_v41  ;;  %v395_v52 = vadd.f32 %v1134_v5, %v324_v43  ;;  %v466_v53 = vmul.f32 %v969_v42, %v1139_v6  ;;  %v1072_v39 = vld [vmem:[%s1803_s3 + $0xb8] sm:$0xff]  }
  0x4f   :  { %v663_v54 = vmax.f32 %v599_v45, 0.0  ;;  %v325_v55 = vmul.f32 %v842_v47, %v1129_v2  ;;  %v467_v56 = vmul.f32 %v970_v48, %v1139_v6  ;;  %v845_v57 = vunpack.c.l.bf16 %v1038_v44 }
  0x50   :  { %726 = vst [vmem:[%s1806_s6 + $0x118] sm:$0xff] %v662_v50  ;;  %v600_v58 = vadd.f32 %v536_v51, %v394_v46  ;;  %v537_v59 = vadd.f32 %v1144_v9, %v466_v53  ;;  %v973_v60 = vunpack.c.l.bf16 %v1069_v49  ;;  %v846_v61 = vunpack.c.h.bf16 %v1038_v44 }
  0x51   :  { %727 = vst [vmem:[%s1806_s6 + $0x120] sm:$0xff] %v663_v54  ;;  %v396_v63 = vadd.f32 %v1134_v5, %v325_v55  ;;  %v538_v0 = vadd.f32 %v1144_v9, %v467_v56  ;;  %v326_v1 = vmul.f32 %v845_v57, %v1129_v2  ;;  %v974_v3 = vunpack.c.h.bf16 %v1069_v49  ;;  %v1042_v56 = vld [vmem:[%s1800_s0 + $0xc0] sm:$0xff]  }
  0x52   :  { %v664_v7 = vmax.f32 %v600_v58, 0.0  ;;  %v601_v8 = vadd.f32 %v537_v59, %v395_v52  ;;  %v468_v10 = vmul.f32 %v973_v60, %v1139_v6  ;;  %v327_v11 = vmul.f32 %v846_v61, %v1129_v2  ;;  %v1073_v61 = vld [vmem:[%s1803_s3 + $0xc0] sm:$0xff]  }
  0x53   :  { %v602_v12 = vadd.f32 %v538_v0, %v396_v63  ;;  %v397_v13 = vadd.f32 %v1134_v5, %v326_v1  ;;  %v469_v14 = vmul.f32 %v974_v3, %v1139_v6  ;;  %v849_v15 = vunpack.c.l.bf16 %v1039_v62 }
  0x54   :  { %728 = vst [vmem:[%s1806_s6 + $0x128] sm:$0xff] %v664_v7  ;;  %v665_v17 = vmax.f32 %v601_v8, 0.0  ;;  %v539_v18 = vadd.f32 %v1144_v9, %v468_v10  ;;  %v398_v19 = vadd.f32 %v1134_v5, %v327_v11  ;;  %v977_v20 = vunpack.c.l.bf16 %v1070_v4  ;;  %v1043_v10 = vld [vmem:[%s1800_s0 + $0xc8] sm:$0xff]  }
  0x55   :  { %v666_v22 = vmax.f32 %v602_v12, 0.0  ;;  %v540_v23 = vadd.f32 %v1144_v9, %v469_v14  ;;  %v328_v24 = vmul.f32 %v849_v15, %v1129_v2  ;;  %v850_v25 = vunpack.c.h.bf16 %v1039_v62 }
  0x56   :  { %729 = vst [vmem:[%s1806_s6 + $0x130] sm:$0xff] %v665_v17  ;;  %v603_v26 = vadd.f32 %v539_v18, %v397_v13  ;;  %v470_v27 = vmul.f32 %v977_v20, %v1139_v6  ;;  %v978_v28 = vunpack.c.h.bf16 %v1070_v4  ;;  %v853_v29 = vunpack.c.l.bf16 %v1040_v16 }
  0x57   :  { %730 = vst [vmem:[%s1806_s6 + $0x138] sm:$0xff] %v666_v22  ;;  %v604_v30 = vadd.f32 %v540_v23, %v398_v19  ;;  %v399_v31 = vadd.f32 %v1134_v5, %v328_v24  ;;  %v329_v32 = vmul.f32 %v850_v25, %v1129_v2  ;;  %v981_v33 = vunpack.c.l.bf16 %v1071_v21  ;;  %v1074_v19 = vld [vmem:[%s1803_s3 + $0xc8] sm:$0xff]  }
  0x58   :  { %v667_v34 = vmax.f32 %v603_v26, 0.0  ;;  %v541_v35 = vadd.f32 %v1144_v9, %v470_v27  ;;  %v471_v36 = vmul.f32 %v978_v28, %v1139_v6  ;;  %v330_v37 = vmul.f32 %v853_v29, %v1129_v2 }
  0x59   :  { %v668_v40 = vmax.f32 %v604_v30, 0.0  ;;  %v400_v41 = vadd.f32 %v1134_v5, %v329_v32  ;;  %v472_v42 = vmul.f32 %v981_v33, %v1139_v6  ;;  %v854_v43 = vunpack.c.h.bf16 %v1040_v16  ;;  %v1044_v32 = vld [vmem:[%s1800_s0 + $0xd0] sm:$0xff]  }
  0x5a   :  { %731 = vst [vmem:[%s1806_s6 + $0x140] sm:$0xff] %v667_v34  ;;  %v605_v44 = vadd.f32 %v541_v35, %v399_v31  ;;  %v542_v45 = vadd.f32 %v1144_v9, %v471_v36  ;;  %v401_v46 = vadd.f32 %v1134_v5, %v330_v37  ;;  %v982_v47 = vunpack.c.h.bf16 %v1071_v21  ;;  %v1075_v37 = vld [vmem:[%s1803_s3 + $0xd0] sm:$0xff]  }
  0x5b   :  { %732 = vst [vmem:[%s1806_s6 + $0x148] sm:$0xff] %v668_v40  ;;  %v543_v48 = vadd.f32 %v1144_v9, %v472_v42  ;;  %v331_v49 = vmul.f32 %v854_v43, %v1129_v2  ;;  %v857_v50 = vunpack.c.l.bf16 %v1041_v38  ;;  %v985_v51 = vunpack.c.l.bf16 %v1072_v39 }
  0x5c   :  { %v669_v52 = vmax.f32 %v605_v44, 0.0  ;;  %v606_v53 = vadd.f32 %v542_v45, %v400_v41  ;;  %v473_v54 = vmul.f32 %v982_v47, %v1139_v6  ;;  %v858_v55 = vunpack.c.h.bf16 %v1041_v38 }
  0x5d   :  { %v607_v57 = vadd.f32 %v543_v48, %v401_v46  ;;  %v402_v58 = vadd.f32 %v1134_v5, %v331_v49  ;;  %v332_v59 = vmul.f32 %v857_v50, %v1129_v2  ;;  %v474_v60 = vmul.f32 %v985_v51, %v1139_v6 }
  0x5e   :  { %733 = vst [vmem:[%s1806_s6 + $0x150] sm:$0xff] %v669_v52  ;;  %v670_v62 = vmax.f32 %v606_v53, 0.0  ;;  %v544_v63 = vadd.f32 %v1144_v9, %v473_v54  ;;  %v986_v0 = vunpack.c.h.bf16 %v1072_v39  ;;  %v333_v1 = vmul.f32 %v858_v55, %v1129_v2  ;;  %v1673_v53 = vld [vmem:[%s1801_s1] ss:$0 sm:$0xff] }
  0x5f   :  { %v671_v3 = vmax.f32 %v607_v57, 0.0  ;;  %v403_v4 = vadd.f32 %v1134_v5, %v332_v59  ;;  %v545_v7 = vadd.f32 %v1144_v9, %v474_v60  ;;  %v861_v8 = vunpack.c.l.bf16 %v1042_v56 }
  0x60   :  { %734 = vst [vmem:[%s1806_s6 + $0x158] sm:$0xff] %v670_v62  ;;  %v608_v11 = vadd.f32 %v544_v63, %v402_v58  ;;  %v404_v12 = vadd.f32 %v1134_v5, %v333_v1  ;;  %v475_v13 = vmul.f32 %v986_v0, %v1139_v6  ;;  %v989_v14 = vunpack.c.l.bf16 %v1073_v61  ;;  %v1046_v0 = vld [vmem:[%s1800_s0 + $0xe0] sm:$0xff]  }
  0x61   :  { %735 = vst [vmem:[%s1806_s6 + $0x160] sm:$0xff] %v671_v3  ;;  %v609_v15 = vadd.f32 %v545_v7, %v403_v4  ;;  %v334_v16 = vmul.f32 %v861_v8, %v1129_v2  ;;  %v862_v17 = vunpack.c.h.bf16 %v1042_v56  ;;  %v990_v18 = vunpack.c.h.bf16 %v1073_v61  ;;  %v1682_v56 = vld [vmem:[%s1804_s4] ss:$0 sm:$0xff] }
  0x62   :  { %v672_v20 = vmax.f32 %v608_v11, 0.0  ;;  %v546_v21 = vadd.f32 %v1144_v9, %v475_v13  ;;  %v476_v22 = vmul.f32 %v989_v14, %v1139_v6  ;;  %v865_v23 = vunpack.c.l.bf16 %v1043_v10  ;;  %v1077_v8 = vld [vmem:[%s1803_s3 + $0xe0] sm:$0xff]  }
  0x63   :  { %v673_v24 = vmax.f32 %v609_v15, 0.0  ;;  %v405_v25 = vadd.f32 %v1134_v5, %v334_v16  ;;  %v335_v26 = vmul.f32 %v862_v17, %v1129_v2  ;;  %v477_v27 = vmul.f32 %v990_v18, %v1139_v6 }
  0x64   :  { %736 = vst [vmem:[%s1806_s6 + $0x168] sm:$0xff] %v672_v20  ;;  %v610_v28 = vadd.f32 %v546_v21, %v404_v12  ;;  %v547_v29 = vadd.f32 %v1144_v9, %v476_v22  ;;  %v993_v30 = vunpack.c.l.bf16 %v1074_v19  ;;  %v336_v31 = vmul.f32 %v865_v23, %v1129_v2 }
  0x65   :  { %737 = vst [vmem:[%s1806_s6 + $0x170] sm:$0xff] %v673_v24  ;;  %v406_v33 = vadd.f32 %v1134_v5, %v335_v26  ;;  %v548_v34 = vadd.f32 %v1144_v9, %v477_v27  ;;  %v866_v35 = vunpack.c.h.bf16 %v1043_v10  ;;  %v994_v36 = vunpack.c.h.bf16 %v1074_v19  ;;  %v1047_v26 = vld [vmem:[%s1800_s0 + $0xe8] sm:$0xff]  }
  0x66   :  { %v674_v38 = vmax.f32 %v610_v28, 0.0  ;;  %v611_v39 = vadd.f32 %v547_v29, %v405_v25  ;;  %v407_v40 = vadd.f32 %v1134_v5, %v336_v31  ;;  %v478_v41 = vmul.f32 %v993_v30, %v1139_v6  ;;  %v1045_v5 = vld [vmem:[%s1800_s0 + $0xd8] sm:$0xff]   ;;  %v1078_v31 = vld [vmem:[%s1803_s3 + $0xe8] sm:$0xff]  }
  0x67   :  { %v612_v42 = vadd.f32 %v548_v34, %v406_v33  ;;  %v337_v43 = vmul.f32 %v866_v35, %v1129_v2  ;;  %v479_v44 = vmul.f32 %v994_v36, %v1139_v6  ;;  %v869_v45 = vunpack.c.l.bf16 %v1044_v32  ;;  %v1076_v2 = vld [vmem:[%s1803_s3 + $0xd8] sm:$0xff]   ;;  %v1661_v6 = vld [vmem:[%s1802_s2] ss:$0 sm:$0xff] }
  0x68   :  { %738 = vst [vmem:[%s1806_s6 + $0x178] sm:$0xff] %v674_v38  ;;  %v675_v46 = vmax.f32 %v611_v39, 0.0  ;;  %v549_v47 = vadd.f32 %v1144_v9, %v478_v41  ;;  %v997_v48 = vunpack.c.l.bf16 %v1075_v37  ;;  %v870_v49 = vunpack.c.h.bf16 %v1044_v32  ;;  %v1667_v9 = vld [vmem:[%s1805_s5] ss:$0 sm:$0xff] }
  0x69   :  { %v676_v50 = vmax.f32 %v612_v42, 0.0  ;;  %v408_v51 = vadd.f32 %v1661_v6, %v337_v43  ;;  %v550_v52 = vadd.f32 %v1667_v9, %v479_v44  ;;  %v338_v54 = vmul.f32 %v1673_v53, %v869_v45  ;;  %v1048_v44 = vld [vmem:[%s1800_s0 + $0xf0] sm:$0xff]  }
  0x6a   :  { %739 = vst [vmem:[%s1806_s6 + $0x180] sm:$0xff] %v675_v46  ;;  %v613_v55 = vadd.f32 %v549_v47, %v407_v40  ;;  %v480_v57 = vmul.f32 %v1682_v56, %v997_v48  ;;  %v998_v58 = vunpack.c.h.bf16 %v1075_v37  ;;  %v339_v59 = vmul.f32 %v1673_v53, %v870_v49  ;;  %v1079_v49 = vld [vmem:[%s1803_s3 + $0xf0] sm:$0xff]  }
  0x6b   :  { %740 = vst [vmem:[%s1806_s6 + $0x188] sm:$0xff] %v676_v50  ;;  %v614_v60 = vadd.f32 %v550_v52, %v408_v51  ;;  %v409_v61 = vadd.f32 %v1661_v6, %v338_v54  ;;  %v873_v62 = vunpack.c.l.bf16 %v1045_v5  ;;  %v1001_v63 = vunpack.c.l.bf16 %v1076_v2 }
  0x6c   :  { %v677_v1 = vmax.f32 %v613_v55, 0.0  ;;  %v551_v3 = vadd.f32 %v1667_v9, %v480_v57  ;;  %v410_v4 = vadd.f32 %v1661_v6, %v339_v59  ;;  %v481_v7 = vmul.f32 %v1682_v56, %v998_v58  ;;  %v1049_v58 = vld [vmem:[%s1800_s0 + $0xf8] sm:$0xff]  }
  0x6d   :  { %v678_v10 = vmax.f32 %v614_v60, 0.0  ;;  %v340_v11 = vmul.f32 %v1673_v53, %v873_v62  ;;  %v482_v12 = vmul.f32 %v1682_v56, %v1001_v63  ;;  %v874_v13 = vunpack.c.h.bf16 %v1045_v5 }
  0x6e   :  { %741 = vst [vmem:[%s1806_s6 + $0x190] sm:$0xff] %v677_v1  ;;  %v615_v14 = vadd.f32 %v551_v3, %v409_v61  ;;  %v552_v15 = vadd.f32 %v1667_v9, %v481_v7  ;;  %v1002_v16 = vunpack.c.h.bf16 %v1076_v2  ;;  %v877_v17 = vunpack.c.l.bf16 %v1046_v0 }
  0x6f   :  { %742 = vst [vmem:[%s1806_s6 + $0x198] sm:$0xff] %v678_v10  ;;  %v411_v18 = vadd.f32 %v1661_v6, %v340_v11  ;;  %v553_v19 = vadd.f32 %v1667_v9, %v482_v12  ;;  %v341_v20 = vmul.f32 %v1673_v53, %v874_v13  ;;  %v1005_v21 = vunpack.c.l.bf16 %v1077_v8 }
  0x70   :  { %v679_v22 = vmax.f32 %v615_v14, 0.0  ;;  %v616_v23 = vadd.f32 %v552_v15, %v410_v4  ;;  %v483_v24 = vmul.f32 %v1682_v56, %v1002_v16  ;;  %v342_v25 = vmul.f32 %v1673_v53, %v877_v17  ;;  %v1080_v4 = vld [vmem:[%s1803_s3 + $0xf8] sm:$0xff]  }
  0x71   :  { %v617_v27 = vadd.f32 %v553_v19, %v411_v18  ;;  %v412_v28 = vadd.f32 %v1661_v6, %v341_v20  ;;  %v484_v29 = vmul.f32 %v1682_v56, %v1005_v21  ;;  %v878_v30 = vunpack.c.h.bf16 %v1046_v0 }
  0x72   :  { %743 = vst [vmem:[%s1806_s6 + $0x1a0] sm:$0xff] %v679_v22  ;;  %v680_v32 = vmax.f32 %v616_v23, 0.0  ;;  %v554_v33 = vadd.f32 %v1667_v9, %v483_v24  ;;  %v413_v34 = vadd.f32 %v1661_v6, %v342_v25  ;;  %v1006_v35 = vunpack.c.h.bf16 %v1077_v8 }
  0x73   :  { %v681_v36 = vmax.f32 %v617_v27, 0.0  ;;  %v555_v37 = vadd.f32 %v1667_v9, %v484_v29  ;;  %v343_v38 = vmul.f32 %v1673_v53, %v878_v30  ;;  %v881_v39 = vunpack.c.l.bf16 %v1047_v26 }
  0x74   :  { %744 = vst [vmem:[%s1806_s6 + $0x1a8] sm:$0xff] %v680_v32  ;;  %v618_v40 = vadd.f32 %v554_v33, %v412_v28  ;;  %v485_v41 = vmul.f32 %v1682_v56, %v1006_v35  ;;  %v1009_v42 = vunpack.c.l.bf16 %v1078_v31  ;;  %v882_v43 = vunpack.c.h.bf16 %v1047_v26 }
  0x75   :  { %745 = vst [vmem:[%s1806_s6 + $0x1b0] sm:$0xff] %v681_v36  ;;  %v619_v45 = vadd.f32 %v555_v37, %v413_v34  ;;  %v414_v46 = vadd.f32 %v1661_v6, %v343_v38  ;;  %v344_v47 = vmul.f32 %v1673_v53, %v881_v39  ;;  %v1010_v48 = vunpack.c.h.bf16 %v1078_v31 }
  0x76   :  { %v682_v5 = vmax.f32 %v618_v40, 0.0  ;;  %v556_v2 = vadd.f32 %v1667_v9, %v485_v41  ;;  %v486_v50 = vmul.f32 %v1682_v56, %v1009_v42  ;;  %v345_v51 = vmul.f32 %v1673_v53, %v882_v43 }
  0x77   :  { %v683_v52 = vmax.f32 %v619_v45, 0.0  ;;  %v415_v54 = vadd.f32 %v1661_v6, %v344_v47  ;;  %v487_v55 = vmul.f32 %v1682_v56, %v1010_v48  ;;  %v885_v57 = vunpack.c.l.bf16 %v1048_v44 }
  0x78   :  { %746 = vst [vmem:[%s1806_s6 + $0x1b8] sm:$0xff] %v682_v5  ;;  %v620_v59 = vadd.f32 %v556_v2, %v414_v46  ;;  %v557_v60 = vadd.f32 %v1667_v9, %v486_v50  ;;  %v416_v61 = vadd.f32 %v1661_v6, %v345_v51  ;;  %v1013_v62 = vunpack.c.l.bf16 %v1079_v49 }
  0x79   :  { %747 = vst [vmem:[%s1806_s6 + $0x1c0] sm:$0xff] %v683_v52  ;;  %v558_v63 = vadd.f32 %v1667_v9, %v487_v55  ;;  %v346_v0 = vmul.f32 %v1673_v53, %v885_v57  ;;  %v886_v1 = vunpack.c.h.bf16 %v1048_v44  ;;  %v1014_v3 = vunpack.c.h.bf16 %v1079_v49 }
  0x7a   :  { %v684_v7 = vmax.f32 %v620_v59, 0.0  ;;  %v621_v8 = vadd.f32 %v557_v60, %v415_v54  ;;  %v488_v10 = vmul.f32 %v1682_v56, %v1013_v62  ;;  %v889_v11 = vunpack.c.l.bf16 %v1049_v58 }
  0x7b   :  { %v622_v12 = vadd.f32 %v558_v63, %v416_v61  ;;  %v417_v13 = vadd.f32 %v1661_v6, %v346_v0  ;;  %v347_v14 = vmul.f32 %v1673_v53, %v886_v1  ;;  %v489_v15 = vmul.f32 %v1682_v56, %v1014_v3 }
  0x7c   :  { %748 = vst [vmem:[%s1806_s6 + $0x1c8] sm:$0xff] %v684_v7  ;;  %v685_v16 = vmax.f32 %v621_v8, 0.0  ;;  %v559_v17 = vadd.f32 %v1667_v9, %v488_v10  ;;  %v1017_v18 = vunpack.c.l.bf16 %v1080_v4  ;;  %v348_v19 = vmul.f32 %v1673_v53, %v889_v11 }
  0x7d   :  { %v686_v20 = vmax.f32 %v622_v12, 0.0  ;;  %v418_v21 = vadd.f32 %v1661_v6, %v347_v14  ;;  %v560_v22 = vadd.f32 %v1667_v9, %v489_v15  ;;  %v890_v23 = vunpack.c.h.bf16 %v1049_v58 }
  0x7e   :  { %749 = vst [vmem:[%s1806_s6 + $0x1d0] sm:$0xff] %v685_v16  ;;  %v623_v24 = vadd.f32 %v559_v17, %v417_v13  ;;  %v419_v25 = vadd.f32 %v1661_v6, %v348_v19  ;;  %v490_v26 = vmul.f32 %v1682_v56, %v1017_v18  ;;  %v1018_v27 = vunpack.c.h.bf16 %v1080_v4 }
  0x7f   :  { %750 = vst [vmem:[%s1806_s6 + $0x1d8] sm:$0xff] %v686_v20  ;;  %v624_v28 = vadd.f32 %v560_v22, %v418_v21  ;;  %v349_v29 = vmul.f32 %v1673_v53, %v890_v23 }
  0x80   :  { %v687_v30 = vmax.f32 %v623_v24, 0.0  ;;  %v561_v31 = vadd.f32 %v1667_v9, %v490_v26  ;;  %v491_v32 = vmul.f32 %v1682_v56, %v1018_v27 }
  0x81   :  { %v688_v33 = vmax.f32 %v624_v28, 0.0  ;;  %v420_v34 = vadd.f32 %v1661_v6, %v349_v29 }
  0x82   :  { %751 = vst [vmem:[%s1806_s6 + $0x1e0] sm:$0xff] %v687_v30  ;;  %v625_v35 = vadd.f32 %v561_v31, %v419_v25  ;;  %v562_v36 = vadd.f32 %v1667_v9, %v491_v32 }
  0x83   :  { %752 = vst [vmem:[%s1806_s6 + $0x1e8] sm:$0xff] %v688_v33 }
  0x84   :  { %v689_v53 = vmax.f32 %v625_v35, 0.0  ;;  %v626_v37 = vadd.f32 %v562_v36, %v420_v34 }
  0x86   :  { %753 = vst [vmem:[%s1806_s6 + $0x1f0] sm:$0xff] %v689_v53  ;;  %v690_v56 = vmax.f32 %v626_v37, 0.0 }
  0x88   :  { %754 = vst [vmem:[%s1806_s6 + $0x1f8] sm:$0xff] %v690_v56 }

// kernel: shallow_block_forward.6
= control target key start
LH: loop header
LB: loop body
LE: loop exit
PB: predicated region body
PF: predicated region fallthrough
CT: control target
= control target key end

     0   :  { %s2554_s30 = smov 0   ;;  %s2556_s10 = smov 0   ;;  %s2758_s0 = inlined_call_operand.vmem [shape: bf16[512,72], index: 0, kind: input, shape index: {}]   ;;  %s2759_s1 = inlined_call_operand.vmem [shape: bf16[72,128], index: 1, kind: input, shape index: {}]   ;;  %s2760_s2 = inlined_call_operand.vmem [shape: bf16[512,4], index: 2, kind: input, shape index: {}]   ;;  %s2761_s3 = inlined_call_operand.vmem [shape: bf16[4,128], index: 3, kind: input, shape index: {}]   ;;  %s2762_s4 = inlined_call_operand.vmem [shape: bf16[512,128], index: 4, kind: output, shape index: {0}]   ;;  %s2763_s5 = inlined_call_operand.vmem [shape: bf16[512,128], index: 5, kind: output, shape index: {1}]   ;;  %s2764_s6 = inlined_call_operand.vmem [shape: f32[2,1,128], index: 6, kind: output, shape index: {2}]   ;;  %s2765_s7 = inlined_call_operand.vmem [shape: f32[2,1,128], index: 7, kind: output, shape index: {3}]   ;;  %s2766_s8 = inlined_call_operand.vmem [shape: f32[2,1,128], index: 8, kind: output, shape index: {4}]   ;;  %s2767_s9 = inlined_call_operand.vmem [shape: f32[2,1,128], index: 9, kind: output, shape index: {5}]  }
   0x1   :  { %s2558_s11 = smov 0  }
   0x2 LB: > { %s32_s12 = sadd.s32 1, %s2497_s10  ;;  %p1903_p0 = scmp.ge.s32.totalorder %s2501_s11, 1  ;;  %s2501_s11 = sphi %s2558_s11, %s20_s11   ;;  %s2497_s10 = sphi %s2556_s10, %s2769_s10   ;;  %s2493_s30 = sphi %s2554_s30, %s2768_s30  }
   0x3   : > { %p34_p1 = scmp.ge.s32.totalorder %s32_s12, 2  ;;  %p334_p2 = scmp.lt.s32.totalorder %s2501_s11, 3 }
   0x5   : > { %s2771_s12 = smov (%p34_p1, %s32_s12), 0  ;;  %p335_p3 = pnand %p1903_p0, %p334_p2 }
   0x6   : > { %v2442_v0 = vld [vmem:[%s2759_s1] sm:$0xff] (!%p335_p3)   ;;  %vm965_vm0 = vcmask (!%p335_p3), 1041408   ;;  %v2443_v1 = vld [vmem:[%s2759_s1 + $0x8] sm:$0xff] (!%p335_p3)   ;;  %s1904_s17 = sshll.u32 (!%p335_p3), %s2493_s30, 5  ;;  %v2445_v4 = vld [vmem:[%s2759_s1 + $0x10] sm:$0xff] (!%p335_p3)   ;;  %vm916_vm1 = vcmask (!%p335_p3), 31744  }
   0x7   : > { %338 = sbr.rel (%p335_p3) target bundleno = 324 (0x144), region = 36  ;;  %2339 = vmatprep.subr.bf16.mxu0 (!%p335_p3), %v2442_v0  ;;  %v835_v2 = vld [vmem:[%s2761_s3] sm:$0x3] (!%p335_p3)  ;;  %p398_p4 = scmp.lt.s32.totalorder (!%p335_p3), %s1904_s17, 63  ;;  %v2447_v5 = vld [vmem:[%s2759_s1 + $0x18] sm:$0xff] (!%p335_p3)   ;;  %vm589_vm2 = vcmask (!%p335_p3), 588800  }
   0x8   : > { %2340 = vmatpush3.bf16.msra.mxu0 (!%p335_p3), %v2442_v0  ;;  %2416 = vmatprep.subr.msk.bf16.mxu1 (!%p335_p3), %vm965_vm0, %v835_v2  ;;  %v967_v3 = vsel (!%p335_p3), %vm965_vm0, %v835_v2, 0  ;;  %v2449_v9 = vld [vmem:[%s2759_s1 + $0x20] ss:$0 sps:$4 sm:$0xff] (!%p335_p3)   ;;  %vm638_vm3 = vcmask (!%p335_p3), 1043456   ;;  %p428_p5 = scmp.lt.s32.totalorder (!%p335_p3), %s2493_s30, 1  ;;  %v2503_v40 = vmov (!%p335_p3), 0.0  }
   0x9   : > { %2341 = vmatprep.subr.bf16.mxu0 (!%p335_p3), %v2443_v1  ;;  %2382 = vmatpush3.bf16.msra.mxu1 (!%p335_p3), %v967_v3  ;;  %v640_v12 = vsel (!%p335_p3), %vm638_vm3, %v2449_v9, 0 }
   0xc   : > { %2342 = vmatpush3.bf16.msra.mxu0 (!%p335_p3), %v2443_v1 }
   0xd   : > { %2343 = vmatprep.subr.bf16.mxu0 (!%p335_p3), %v2445_v4 }
   0xe   : > { %s2773_s17 = smov (!%p398_p4, %s1904_s17), 63  ;;  %s2775_s30 = smov (!%p428_p5, %s2493_s30), 1 }
   0xf   : > { %s2587_s22 = sshll.u32 %s2773_s17, 2  ;;  %s2676_s18 = scalar_lea.vmem %s2766_s8, %s2775_s30 }
  0x10   : > { %s2593_s25 = scalar_lea.vmem %s2760_s2, %s2587_s22  ;;  %s2604_s13 = scalar_lea.vmem %s2758_s0, %s2587_s22  ;;  %2344 = vmatpush3.bf16.msra.mxu0 %v2445_v4  ;;  %1456 = vst [vmem:[%s2676_s18] sm:$0x1] %v2503_v40 }
  0x11   : > { %v2444_v6 = vld [vmem:[%s2593_s25] sm:$0xff]   ;;  %v2446_v7 = vld [vmem:[%s2593_s25 + $0x8] sm:$0xff]   ;;  %v2448_v8 = vld [vmem:[%s2593_s25 + $0x10] sm:$0xff]   ;;  %2345 = vmatprep.subr.bf16.mxu0 %v2447_v5  ;;  %s2681_s21 = scalar_lea.vmem %s2767_s9, %s2775_s30  ;;  %s2693_s28 = scalar_lea.vmem %s2765_s7, %s2775_s30 }
  0x12   : > { %2383 = vmatprep.mubr.msk.bf16.mxu1 %vm916_vm1, %v2444_v6  ;;  %v2451_v10 = vld [vmem:[%s2604_s13] sm:$0xff]   ;;  %v2450_v11 = vld [vmem:[%s2593_s25 + $0x18] sm:$0xff]   ;;  %v2452_v14 = vld [vmem:[%s2604_s13 + $0x8] sm:$0xff]   ;;  %1457 = vst [vmem:[%s2681_s21] sm:$0x1] %v2503_v40  ;;  %s2701_s14 = scalar_lea.vmem %s2763_s5, %s2587_s22  ;;  %s2710_s16 = scalar_lea.vmem %s2762_s4, %s2587_s22 }
  0x13   : > { %2384 = vmatmul.mubr.msk.bf16.vlgmr.msra.gmra.mrb[0].mxu1 %vm916_vm1, %v2446_v7  ;;  %2349 = vmatprep.mubr.msk.bf16.mxu0 %vm589_vm2, %v2451_v10  ;;  %v2453_v13 = vld [vmem:[%s2593_s25 + $0x20] sm:$0xff]   ;;  %v2455_v15 = vld [vmem:[%s2604_s13 + $0x10] sm:$0xff]   ;;  %v2454_v16 = vld [vmem:[%s2593_s25 + $0x28] sm:$0xff]   ;;  %1455 = vst [vmem:[%s2693_s28] sm:$0x1] %v2503_v40 }
  0x14   : > { %2387 = vmatprep.mubr.msk.bf16.mxu1 %vm916_vm1, %v2448_v8  ;;  %2346 = vmatpush3.bf16.msra.mxu0 %v2447_v5  ;;  %v2457_v17 = vld [vmem:[%s2593_s25 + $0x30] sm:$0xff]   ;;  %v2456_v18 = vld [vmem:[%s2604_s13 + $0x18] sm:$0xff]   ;;  %v2459_v19 = vld [vmem:[%s2604_s13 + $0x20] sm:$0xff]  }
  0x15   : > { %2415 = vmatprep.subr.msk.bf16.mxu0 %vm638_vm3, %v2449_v9  ;;  %v2458_v20 = vld [vmem:[%s2593_s25 + $0x38] sm:$0xff]   ;;  %v2461_v21 = vld [vmem:[%s2593_s25 + $0x40] sm:$0xff]   ;;  %v2460_v22 = vld [vmem:[%s2604_s13 + $0x28] sm:$0xff]  }
  0x16   : > { %v2463_v23 = vld [vmem:[%s2604_s13 + $0x30] sm:$0xff]   ;;  %v2462_v24 = vld [vmem:[%s2593_s25 + $0x48] sm:$0xff]   ;;  %v2464_v26 = vld [vmem:[%s2604_s13 + $0x38] sm:$0xff]  }
  0x17   : > { %v2465_v25 = vld [vmem:[%s2593_s25 + $0x50] sm:$0xff]   ;;  %v2467_v27 = vld [vmem:[%s2604_s13 + $0x40] sm:$0xff]   ;;  %v2466_v28 = vld [vmem:[%s2593_s25 + $0x58] sm:$0xff]  }
  0x18   : > { %2348 = vmatpush3.bf16.msra.mxu0 %v640_v12  ;;  %v2469_v29 = vld [vmem:[%s2593_s25 + $0x60] sm:$0xff]   ;;  %v2468_v30 = vld [vmem:[%s2604_s13 + $0x48] sm:$0xff]   ;;  %v2471_v31 = vld [vmem:[%s2604_s13 + $0x50] sm:$0xff]  }
  0x19   : > { %v2470_v32 = vld [vmem:[%s2593_s25 + $0x68] sm:$0xff]   ;;  %v2473_v33 = vld [vmem:[%s2593_s25 + $0x70] sm:$0xff]   ;;  %v2472_v34 = vld [vmem:[%s2604_s13 + $0x58] sm:$0xff]  }
  0x1a   : > { %v2475_v35 = vld [vmem:[%s2604_s13 + $0x60] sm:$0xff]   ;;  %v2474_v36 = vld [vmem:[%s2593_s25 + $0x78] sm:$0xff]   ;;  %v2476_v37 = vld [vmem:[%s2604_s13 + $0x68] sm:$0xff]   ;;  %s2688_s25 = scalar_lea.vmem %s2764_s6, %s2775_s30 }
  0x1b   : > { %2388 = vmatmul.mubr.msk.bf16.gmra.mrb[4].mxu1 %vm916_vm1, %v2450_v11  ;;  %2350 = vmatmul.mubr.msk.bf16.vlgmr.msra.gmra.mrb[0].mxu0 %vm589_vm2, %v2452_v14  ;;  %v2477_v38 = vld [vmem:[%s2604_s13 + $0x70] sm:$0xff]   ;;  %v2478_v39 = vld [vmem:[%s2604_s13 + $0x78] sm:$0xff]   ;;  %1454 = vst [vmem:[%s2688_s25] sm:$0x1] %v2503_v40 }
  0x1c   : > { %2391 = vmatprep.mubr.msk.bf16.mxu1 %vm916_vm1, %v2453_v13  ;;  %2353 = vmatprep.mubr.msk.bf16.mxu0 %vm589_vm2, %v2455_v15 }
  0x23   : > { %2392 = vmatmul.mubr.msk.bf16.gmra.mrb[8].mxu1 %vm916_vm1, %v2454_v16  ;;  %2354 = vmatmul.mubr.msk.bf16.gmra.mrb[4].mxu0 %vm589_vm2, %v2456_v18 }
  0x24   : > { %2395 = vmatprep.mubr.msk.bf16.mxu1 %vm916_vm1, %v2457_v17  ;;  %2357 = vmatprep.mubr.msk.bf16.mxu0 %vm589_vm2, %v2459_v19 }
  0x2b   : > { %2396 = vmatmul.mubr.msk.bf16.gmra.mrb[12].mxu1 %vm916_vm1, %v2458_v20  ;;  %2358 = vmatmul.mubr.msk.bf16.gmra.mrb[8].mxu0 %vm589_vm2, %v2460_v22 }
  0x2c   : > { %2399 = vmatprep.mubr.msk.bf16.mxu1 %vm916_vm1, %v2461_v21  ;;  %2361 = vmatprep.mubr.msk.bf16.mxu0 %vm589_vm2, %v2463_v23 }
  0x33   : > { %2400 = vmatmul.mubr.msk.bf16.gmra.mrb[16].mxu1 %vm916_vm1, %v2462_v24  ;;  %2362 = vmatmul.mubr.msk.bf16.gmra.mrb[12].mxu0 %vm589_vm2, %v2464_v26 }
  0x34   : > { %2403 = vmatprep.mubr.msk.bf16.mxu1 %vm916_vm1, %v2465_v25  ;;  %2365 = vmatprep.mubr.msk.bf16.mxu0 %vm589_vm2, %v2467_v27 }
  0x3b   : > { %2404 = vmatmul.mubr.msk.bf16.gmra.mrb[20].mxu1 %vm916_vm1, %v2466_v28  ;;  %2366 = vmatmul.mubr.msk.bf16.gmra.mrb[16].mxu0 %vm589_vm2, %v2468_v30 }
  0x3c   : > { %2407 = vmatprep.mubr.msk.bf16.mxu1 %vm916_vm1, %v2469_v29  ;;  %2369 = vmatprep.mubr.msk.bf16.mxu0 %vm589_vm2, %v2471_v31 }
  0x43   : > { %2408 = vmatmul.mubr.msk.bf16.gmra.mrb[24].mxu1 %vm916_vm1, %v2470_v32  ;;  %2370 = vmatmul.mubr.msk.bf16.gmra.mrb[20].mxu0 %vm589_vm2, %v2472_v34 }
  0x44   : > { %2411 = vmatprep.mubr.msk.bf16.mxu1 %vm916_vm1, %v2473_v33  ;;  %2373 = vmatprep.mubr.msk.bf16.mxu0 %vm589_vm2, %v2475_v35 }
  0x4b   : > { %2412 = vmatmul.mubr.msk.bf16.gmra.mrb[28].mxu1 %vm916_vm1, %v2474_v36  ;;  %2374 = vmatmul.mubr.msk.bf16.gmra.mrb[24].mxu0 %vm589_vm2, %v2476_v37 }
  0x4c   : > { %2377 = vmatprep.mubr.msk.bf16.mxu0 %vm589_vm2, %v2477_v38 }
  0x53   : > { %2378 = vmatmul.mubr.msk.bf16.gmra.mrb[28].mxu0 %vm589_vm2, %v2478_v39 }
  0xe6   : > { %v2385_v41 = vpop.f32.mrb[0].mxu1 }
  0xe7   : > { %v1003_v42 = vpop.f32.mrb[1].mxu1  ;;  %v1613_v47 = vmul.f32 %v2385_v41, %v2385_v41 }
  0xe8   : > { %v1611_v43 = vmul.f32 %v1003_v42, %v1003_v42  ;;  %v2386_v44 = vpop.f32.mrb[2].mxu1 }
  0xe9   : > { %v2199_v45 = vpack.c.bf16 %v2386_v44, %v2385_v41  ;;  %v1006_v46 = vpop.f32.mrb[3].mxu1  ;;  %v1614_v51 = vmul.f32 %v2386_v44, %v2386_v44 }
  0xea   : > { %v2194_v48 = vpack.c.bf16 %v1006_v46, %v1003_v42  ;;  %v1571_v49 = vadd.f32 %v1006_v46, %v1003_v42  ;;  %v1612_v50 = vmul.f32 %v1006_v46, %v1006_v46 }
  0xeb   : > { %2286 = vst [vmem:[%s2701_s14 + $0x8] sm:$0xff] %v2199_v45  }
  0xec   : > { %2195 = vst [vmem:[%s2701_s14] sm:$0xff] %v2194_v48   ;;  %v1572_v52 = vadd.f32 %v2385_v41, %v1571_v49  ;;  %v1643_v53 = vadd.f32 %v1612_v50, %v1611_v43 }
  0xee   : > { %v1644_v54 = vadd.f32 %v1643_v53, %v1613_v47  ;;  %v2389_v55 = vpop.f32.mrb[4].mxu1  ;;  %v1573_v56 = vadd.f32 %v2386_v44, %v1572_v52  ;;  %v2351_v1 = vpop.f32.mrb[0].mxu0 }
  0xef   : > { %v1019_v57 = vpop.f32.mrb[5].mxu1  ;;  %v1617_v62 = vmul.f32 %v2389_v55, %v2389_v55  ;;  %v676_v6 = vpop.f32.mrb[1].mxu0  ;;  %v1501_v20 = vmul.f32 %v2351_v1, %v2351_v1 }
  0xf0   : > { %v1574_v58 = vadd.f32 %v1573_v56, %v1019_v57  ;;  %v1615_v59 = vmul.f32 %v1019_v57, %v1019_v57  ;;  %v1645_v60 = vadd.f32 %v1644_v54, %v1614_v51  ;;  %v2390_v61 = vpop.f32.mrb[6].mxu1  ;;  %v2352_v7 = vpop.f32.mrb[2].mxu0  ;;  %v1499_v13 = vmul.f32 %v676_v6, %v676_v6 }
  0xf1   : > { %v2209_v63 = vpack.c.bf16 %v2390_v61, %v2389_v55  ;;  %v1022_v0 = vpop.f32.mrb[7].mxu1  ;;  %v1618_v8 = vmul.f32 %v2390_v61, %v2390_v61  ;;  %v2119_v11 = vpack.c.bf16 %v2352_v7, %v2351_v1  ;;  %v679_v12 = vpop.f32.mrb[3].mxu0  ;;  %v1502_v24 = vmul.f32 %v2352_v7, %v2352_v7 }
  0xf2   : > { %v1646_v2 = vadd.f32 %v1645_v60, %v1615_v59  ;;  %v2204_v3 = vpack.c.bf16 %v1022_v0, %v1019_v57  ;;  %v1575_v4 = vadd.f32 %v1574_v58, %v1022_v0  ;;  %v1616_v5 = vmul.f32 %v1022_v0, %v1022_v0 }
  0xf3   : > { %2288 = vst [vmem:[%s2701_s14 + $0x18] sm:$0xff] %v2209_v63   ;;  %v2114_v14 = vpack.c.bf16 %v679_v12, %v676_v6  ;;  %v1459_v15 = vadd.f32 %v679_v12, %v676_v6  ;;  %v1500_v16 = vmul.f32 %v679_v12, %v679_v12  ;;  %2271 = vst [vmem:[%s2710_s16 + $0x8] sm:$0xff] %v2119_v11  }
  0xf4   : > { %2287 = vst [vmem:[%s2701_s14 + $0x10] sm:$0xff] %v2204_v3   ;;  %v1576_v9 = vadd.f32 %v2389_v55, %v1575_v4  ;;  %v1647_v10 = vadd.f32 %v1646_v2, %v1616_v5 }
  0xf5   : > { %2115 = vst [vmem:[%s2710_s16] sm:$0xff] %v2114_v14   ;;  %v1460_v21 = vadd.f32 %v2351_v1, %v1459_v15  ;;  %v1531_v22 = vadd.f32 %v1500_v16, %v1499_v13 }
  0xf6   : > { %v1648_v17 = vadd.f32 %v1647_v10, %v1617_v62  ;;  %v2393_v18 = vpop.f32.mrb[8].mxu1  ;;  %v1577_v19 = vadd.f32 %v2390_v61, %v1576_v9  ;;  %v2355_v33 = vpop.f32.mrb[4].mxu0 }
  0xf7   : > { %v1035_v23 = vpop.f32.mrb[9].mxu1  ;;  %v1532_v29 = vadd.f32 %v1531_v22, %v1501_v20  ;;  %v1621_v30 = vmul.f32 %v2393_v18, %v2393_v18  ;;  %v1461_v34 = vadd.f32 %v2352_v7, %v1460_v21  ;;  %v692_v39 = vpop.f32.mrb[5].mxu0  ;;  %v1505_v56 = vmul.f32 %v2355_v33, %v2355_v33 }
  0xf8   : > { %v1578_v25 = vadd.f32 %v1577_v19, %v1035_v23  ;;  %v1619_v26 = vmul.f32 %v1035_v23, %v1035_v23  ;;  %v1649_v27 = vadd.f32 %v1648_v17, %v1618_v8  ;;  %v2394_v28 = vpop.f32.mrb[10].mxu1  ;;  %v1503_v41 = vmul.f32 %v692_v39, %v692_v39  ;;  %v2356_v43 = vpop.f32.mrb[6].mxu0 }
  0xf9   : > { %v2219_v31 = vpack.c.bf16 %v2394_v28, %v2393_v18  ;;  %v1038_v32 = vpop.f32.mrb[11].mxu1  ;;  %v1462_v40 = vadd.f32 %v1461_v34, %v692_v39  ;;  %v1533_v42 = vadd.f32 %v1532_v29, %v1502_v24  ;;  %v1622_v44 = vmul.f32 %v2394_v28, %v2394_v28  ;;  %v695_v48 = vpop.f32.mrb[7].mxu0 }
  0xfa   : > { %v1650_v35 = vadd.f32 %v1649_v27, %v1619_v26  ;;  %v2214_v36 = vpack.c.bf16 %v1038_v32, %v1035_v23  ;;  %v1579_v37 = vadd.f32 %v1578_v25, %v1038_v32  ;;  %v1620_v38 = vmul.f32 %v1038_v32, %v1038_v32 }
  0xfb   : > { %2290 = vst [vmem:[%s2701_s14 + $0x28] sm:$0xff] %v2219_v31   ;;  %v2129_v47 = vpack.c.bf16 %v2356_v43, %v2355_v33  ;;  %v1534_v49 = vadd.f32 %v1533_v42, %v1503_v41  ;;  %v2124_v50 = vpack.c.bf16 %v695_v48, %v692_v39  ;;  %v1463_v51 = vadd.f32 %v1462_v40, %v695_v48 }
  0xfc   : > { %2289 = vst [vmem:[%s2701_s14 + $0x20] sm:$0xff] %v2214_v36   ;;  %v1580_v45 = vadd.f32 %v2393_v18, %v1579_v37  ;;  %v1651_v46 = vadd.f32 %v1650_v35, %v1620_v38  ;;  %v1504_v52 = vmul.f32 %v695_v48, %v695_v48  ;;  %v1506_v60 = vmul.f32 %v2356_v43, %v2356_v43 }
  0xfd   : > { %2273 = vst [vmem:[%s2710_s16 + $0x18] sm:$0xff] %v2129_v47   ;;  %2272 = vst [vmem:[%s2710_s16 + $0x10] sm:$0xff] %v2124_v50   ;;  %v1464_v57 = vadd.f32 %v2355_v33, %v1463_v51 }
  0xfe   : > { %v1652_v53 = vadd.f32 %v1651_v46, %v1621_v30  ;;  %v2397_v54 = vpop.f32.mrb[12].mxu1  ;;  %v1581_v55 = vadd.f32 %v2394_v28, %v1580_v45  ;;  %v1535_v58 = vadd.f32 %v1534_v49, %v1504_v52  ;;  %v2359_v5 = vpop.f32.mrb[8].mxu0 }
  0xff   : > { %v1051_v59 = vpop.f32.mrb[13].mxu1  ;;  %v1625_v2 = vmul.f32 %v2397_v54, %v2397_v54  ;;  %v1465_v6 = vadd.f32 %v2356_v43, %v1464_v57  ;;  %v708_v11 = vpop.f32.mrb[9].mxu0  ;;  %v1509_v28 = vmul.f32 %v2359_v5, %v2359_v5 }
 0x100   : > { %v1582_v61 = vadd.f32 %v1581_v55, %v1051_v59  ;;  %v1623_v62 = vmul.f32 %v1051_v59, %v1051_v59  ;;  %v1653_v63 = vadd.f32 %v1652_v53, %v1622_v44  ;;  %v2398_v0 = vpop.f32.mrb[14].mxu1  ;;  %v1536_v1 = vadd.f32 %v1535_v58, %v1505_v56  ;;  %v2360_v15 = vpop.f32.mrb[10].mxu0 }
 0x101   : > { %v2229_v3 = vpack.c.bf16 %v2398_v0, %v2397_v54  ;;  %v1054_v4 = vpop.f32.mrb[15].mxu1  ;;  %v1466_v12 = vadd.f32 %v1465_v6, %v708_v11  ;;  %v1507_v13 = vmul.f32 %v708_v11, %v708_v11  ;;  %v1626_v16 = vmul.f32 %v2398_v0, %v2398_v0  ;;  %v711_v20 = vpop.f32.mrb[11].mxu0 }
 0x102   : > { %v1654_v7 = vadd.f32 %v1653_v63, %v1623_v62  ;;  %v2224_v8 = vpack.c.bf16 %v1054_v4, %v1051_v59  ;;  %v1583_v9 = vadd.f32 %v1582_v61, %v1054_v4  ;;  %v1624_v10 = vmul.f32 %v1054_v4, %v1054_v4 }
 0x103   : > { %2292 = vst [vmem:[%s2701_s14 + $0x38] sm:$0xff] %v2229_v3   ;;  %v1537_v14 = vadd.f32 %v1536_v1, %v1506_v60  ;;  %v2139_v19 = vpack.c.bf16 %v2360_v15, %v2359_v5  ;;  %v2134_v22 = vpack.c.bf16 %v711_v20, %v708_v11  ;;  %v1467_v23 = vadd.f32 %v1466_v12, %v711_v20 }
 0x104   : > { %2291 = vst [vmem:[%s2701_s14 + $0x30] sm:$0xff] %v2224_v8   ;;  %v1584_v17 = vadd.f32 %v2397_v54, %v1583_v9  ;;  %v1655_v18 = vadd.f32 %v1654_v7, %v1624_v10  ;;  %v1508_v24 = vmul.f32 %v711_v20, %v711_v20  ;;  %v1510_v32 = vmul.f32 %v2360_v15, %v2360_v15 }
 0x105   : > { %v1538_v21 = vadd.f32 %v1537_v14, %v1507_v13  ;;  %2275 = vst [vmem:[%s2710_s16 + $0x28] sm:$0xff] %v2139_v19   ;;  %2274 = vst [vmem:[%s2710_s16 + $0x20] sm:$0xff] %v2134_v22   ;;  %v1468_v29 = vadd.f32 %v2359_v5, %v1467_v23 }
 0x106   : > { %v1656_v25 = vadd.f32 %v1655_v18, %v1625_v2  ;;  %v2401_v26 = vpop.f32.mrb[16].mxu1  ;;  %v1585_v27 = vadd.f32 %v2398_v0, %v1584_v17  ;;  %v2363_v41 = vpop.f32.mrb[12].mxu0 }
 0x107   : > { %v1539_v30 = vadd.f32 %v1538_v21, %v1508_v24  ;;  %v1067_v31 = vpop.f32.mrb[17].mxu1  ;;  %v1629_v38 = vmul.f32 %v2401_v26, %v2401_v26  ;;  %v1469_v42 = vadd.f32 %v2360_v15, %v1468_v29  ;;  %v724_v47 = vpop.f32.mrb[13].mxu0  ;;  %v1513_v0 = vmul.f32 %v2363_v41, %v2363_v41 }
 0x108   : > { %v1586_v33 = vadd.f32 %v1585_v27, %v1067_v31  ;;  %v1627_v34 = vmul.f32 %v1067_v31, %v1067_v31  ;;  %v1657_v35 = vadd.f32 %v1656_v25, %v1626_v16  ;;  %v2402_v36 = vpop.f32.mrb[18].mxu1  ;;  %v1511_v49 = vmul.f32 %v724_v47, %v724_v47  ;;  %v2364_v51 = vpop.f32.mrb[14].mxu0 }
 0x109   : > { %v1540_v37 = vadd.f32 %v1539_v30, %v1509_v28  ;;  %v2239_v39 = vpack.c.bf16 %v2402_v36, %v2401_v26  ;;  %v1070_v40 = vpop.f32.mrb[19].mxu1  ;;  %v1470_v48 = vadd.f32 %v1469_v42, %v724_v47  ;;  %v1630_v52 = vmul.f32 %v2402_v36, %v2402_v36  ;;  %v727_v56 = vpop.f32.mrb[15].mxu0 }
 0x10a   : > { %v1658_v43 = vadd.f32 %v1657_v35, %v1627_v34  ;;  %v2234_v44 = vpack.c.bf16 %v1070_v40, %v1067_v31  ;;  %v1587_v45 = vadd.f32 %v1586_v33, %v1070_v40  ;;  %v1628_v46 = vmul.f32 %v1070_v40, %v1070_v40 }
 0x10b   : > { %2294 = vst [vmem:[%s2701_s14 + $0x48] sm:$0xff] %v2239_v39   ;;  %v1541_v50 = vadd.f32 %v1540_v37, %v1510_v32  ;;  %v2149_v55 = vpack.c.bf16 %v2364_v51, %v2363_v41  ;;  %v2144_v58 = vpack.c.bf16 %v727_v56, %v724_v47  ;;  %v1471_v59 = vadd.f32 %v1470_v48, %v727_v56 }
 0x10c   : > { %2293 = vst [vmem:[%s2701_s14 + $0x40] sm:$0xff] %v2234_v44   ;;  %v1588_v53 = vadd.f32 %v2401_v26, %v1587_v45  ;;  %v1659_v54 = vadd.f32 %v1658_v43, %v1628_v46  ;;  %v1512_v60 = vmul.f32 %v727_v56, %v727_v56  ;;  %v1514_v4 = vmul.f32 %v2364_v51, %v2364_v51 }
 0x10d   : > { %v1542_v57 = vadd.f32 %v1541_v50, %v1511_v49  ;;  %2277 = vst [vmem:[%s2710_s16 + $0x38] sm:$0xff] %v2149_v55   ;;  %2276 = vst [vmem:[%s2710_s16 + $0x30] sm:$0xff] %v2144_v58   ;;  %v1472_v1 = vadd.f32 %v2363_v41, %v1471_v59 }
 0x10e   : > { %v1660_v61 = vadd.f32 %v1659_v54, %v1629_v38  ;;  %v2405_v62 = vpop.f32.mrb[20].mxu1  ;;  %v1589_v63 = vadd.f32 %v2402_v36, %v1588_v53  ;;  %v2367_v13 = vpop.f32.mrb[16].mxu0 }
 0x10f   : > { %v1543_v2 = vadd.f32 %v1542_v57, %v1512_v60  ;;  %v1083_v3 = vpop.f32.mrb[21].mxu1  ;;  %v1633_v10 = vmul.f32 %v2405_v62, %v2405_v62  ;;  %v1473_v14 = vadd.f32 %v2364_v51, %v1472_v1  ;;  %v740_v19 = vpop.f32.mrb[17].mxu0  ;;  %v1517_v36 = vmul.f32 %v2367_v13, %v2367_v13 }
 0x110   : > { %v1590_v5 = vadd.f32 %v1589_v63, %v1083_v3  ;;  %v1631_v6 = vmul.f32 %v1083_v3, %v1083_v3  ;;  %v1661_v7 = vadd.f32 %v1660_v61, %v1630_v52  ;;  %v2406_v8 = vpop.f32.mrb[22].mxu1  ;;  %v1515_v21 = vmul.f32 %v740_v19, %v740_v19  ;;  %v2368_v23 = vpop.f32.mrb[18].mxu0 }
 0x111   : > { %v1544_v9 = vadd.f32 %v1543_v2, %v1513_v0  ;;  %v2249_v11 = vpack.c.bf16 %v2406_v8, %v2405_v62  ;;  %v1086_v12 = vpop.f32.mrb[23].mxu1  ;;  %v1474_v20 = vadd.f32 %v1473_v14, %v740_v19  ;;  %v1634_v24 = vmul.f32 %v2406_v8, %v2406_v8  ;;  %v743_v28 = vpop.f32.mrb[19].mxu0 }
 0x112   : > { %v1662_v15 = vadd.f32 %v1661_v7, %v1631_v6  ;;  %v2244_v16 = vpack.c.bf16 %v1086_v12, %v1083_v3  ;;  %v1591_v17 = vadd.f32 %v1590_v5, %v1086_v12  ;;  %v1632_v18 = vmul.f32 %v1086_v12, %v1086_v12 }
 0x113   : > { %2296 = vst [vmem:[%s2701_s14 + $0x58] sm:$0xff] %v2249_v11   ;;  %v1545_v22 = vadd.f32 %v1544_v9, %v1514_v4  ;;  %v2159_v27 = vpack.c.bf16 %v2368_v23, %v2367_v13  ;;  %v2154_v30 = vpack.c.bf16 %v743_v28, %v740_v19  ;;  %v1475_v31 = vadd.f32 %v1474_v20, %v743_v28 }
 0x114   : > { %2295 = vst [vmem:[%s2701_s14 + $0x50] sm:$0xff] %v2244_v16   ;;  %v1592_v25 = vadd.f32 %v2405_v62, %v1591_v17  ;;  %v1663_v26 = vadd.f32 %v1662_v15, %v1632_v18  ;;  %v1516_v32 = vmul.f32 %v743_v28, %v743_v28  ;;  %v1518_v40 = vmul.f32 %v2368_v23, %v2368_v23 }
 0x115   : > { %v1546_v29 = vadd.f32 %v1545_v22, %v1515_v21  ;;  %2279 = vst [vmem:[%s2710_s16 + $0x48] sm:$0xff] %v2159_v27   ;;  %2278 = vst [vmem:[%s2710_s16 + $0x40] sm:$0xff] %v2154_v30   ;;  %v1476_v37 = vadd.f32 %v2367_v13, %v1475_v31 }
 0x116   : > { %v1664_v33 = vadd.f32 %v1663_v26, %v1633_v10  ;;  %v2409_v34 = vpop.f32.mrb[24].mxu1  ;;  %v1593_v35 = vadd.f32 %v2406_v8, %v1592_v25  ;;  %v2371_v49 = vpop.f32.mrb[20].mxu0 }
 0x117   : > { %v1547_v38 = vadd.f32 %v1546_v29, %v1516_v32  ;;  %v1099_v39 = vpop.f32.mrb[25].mxu1  ;;  %v1637_v46 = vmul.f32 %v2409_v34, %v2409_v34  ;;  %v1477_v50 = vadd.f32 %v2368_v23, %v1476_v37  ;;  %v756_v55 = vpop.f32.mrb[21].mxu0  ;;  %v1521_v8 = vmul.f32 %v2371_v49, %v2371_v49 }
 0x118   : > { %v1594_v41 = vadd.f32 %v1593_v35, %v1099_v39  ;;  %v1635_v42 = vmul.f32 %v1099_v39, %v1099_v39  ;;  %v1665_v43 = vadd.f32 %v1664_v33, %v1634_v24  ;;  %v2410_v44 = vpop.f32.mrb[26].mxu1  ;;  %v1519_v57 = vmul.f32 %v756_v55, %v756_v55  ;;  %v2372_v59 = vpop.f32.mrb[22].mxu0 }
 0x119   : > { %v1548_v45 = vadd.f32 %v1547_v38, %v1517_v36  ;;  %v2259_v47 = vpack.c.bf16 %v2410_v44, %v2409_v34  ;;  %v1102_v48 = vpop.f32.mrb[27].mxu1  ;;  %v1478_v56 = vadd.f32 %v1477_v50, %v756_v55  ;;  %v1638_v60 = vmul.f32 %v2410_v44, %v2410_v44  ;;  %v759_v0 = vpop.f32.mrb[23].mxu0 }
 0x11a   : > { %v1666_v51 = vadd.f32 %v1665_v43, %v1635_v42  ;;  %v2254_v52 = vpack.c.bf16 %v1102_v48, %v1099_v39  ;;  %v1595_v53 = vadd.f32 %v1594_v41, %v1102_v48  ;;  %v1636_v54 = vmul.f32 %v1102_v48, %v1102_v48 }
 0x11b   : > { %2298 = vst [vmem:[%s2701_s14 + $0x68] sm:$0xff] %v2259_v47   ;;  %v1549_v58 = vadd.f32 %v1548_v45, %v1518_v40  ;;  %v2169_v63 = vpack.c.bf16 %v2372_v59, %v2371_v49  ;;  %v2164_v2 = vpack.c.bf16 %v759_v0, %v756_v55  ;;  %v1479_v3 = vadd.f32 %v1478_v56, %v759_v0 }
 0x11c   : > { %2297 = vst [vmem:[%s2701_s14 + $0x60] sm:$0xff] %v2254_v52   ;;  %v1596_v61 = vadd.f32 %v2409_v34, %v1595_v53  ;;  %v1667_v62 = vadd.f32 %v1666_v51, %v1636_v54  ;;  %v1520_v4 = vmul.f32 %v759_v0, %v759_v0  ;;  %v1522_v12 = vmul.f32 %v2372_v59, %v2372_v59 }
 0x11d   : > { %v1550_v1 = vadd.f32 %v1549_v58, %v1519_v57  ;;  %2281 = vst [vmem:[%s2710_s16 + $0x58] sm:$0xff] %v2169_v63   ;;  %2280 = vst [vmem:[%s2710_s16 + $0x50] sm:$0xff] %v2164_v2   ;;  %v1480_v9 = vadd.f32 %v2371_v49, %v1479_v3 }
 0x11e   : > { %v1668_v5 = vadd.f32 %v1667_v62, %v1637_v46  ;;  %v2413_v6 = vpop.f32.mrb[28].mxu1  ;;  %v1597_v7 = vadd.f32 %v2410_v44, %v1596_v61  ;;  %v2375_v21 = vpop.f32.mrb[24].mxu0 }
 0x11f   : > { %v1551_v10 = vadd.f32 %v1550_v1, %v1520_v4  ;;  %v1115_v11 = vpop.f32.mrb[29].mxu1  ;;  %v1641_v18 = vmul.f32 %v2413_v6, %v2413_v6  ;;  %v1481_v22 = vadd.f32 %v2372_v59, %v1480_v9  ;;  %v772_v27 = vpop.f32.mrb[25].mxu0  ;;  %v1525_v43 = vmul.f32 %v2375_v21, %v2375_v21 }
 0x120   : > { %v1598_v13 = vadd.f32 %v1597_v7, %v1115_v11  ;;  %v1639_v14 = vmul.f32 %v1115_v11, %v1115_v11  ;;  %v1669_v15 = vadd.f32 %v1668_v5, %v1638_v60  ;;  %v2414_v16 = vpop.f32.mrb[30].mxu1  ;;  %v1523_v29 = vmul.f32 %v772_v27, %v772_v27  ;;  %v2376_v31 = vpop.f32.mrb[26].mxu0 }
 0x121   : > { %v1552_v17 = vadd.f32 %v1551_v10, %v1521_v8  ;;  %v2269_v19 = vpack.c.bf16 %v2414_v16, %v2413_v6  ;;  %v1118_v20 = vpop.f32.mrb[31].mxu1  ;;  %v1482_v28 = vadd.f32 %v1481_v22, %v772_v27  ;;  %v1642_v32 = vmul.f32 %v2414_v16, %v2414_v16  ;;  %v775_v36 = vpop.f32.mrb[27].mxu0  ;;  %v1570_v10 = vld [vmem:[%s2676_s18] sm:$0x1] }
 0x122   : > { %v1670_v23 = vadd.f32 %v1669_v15, %v1639_v14  ;;  %v2264_v24 = vpack.c.bf16 %v1118_v20, %v1115_v11  ;;  %v1599_v25 = vadd.f32 %v1598_v13, %v1118_v20  ;;  %v1640_v26 = vmul.f32 %v1118_v20, %v1118_v20 }
 0x123   : > { %2300 = vst [vmem:[%s2701_s14 + $0x78] sm:$0xff] %v2269_v19   ;;  %v1553_v30 = vadd.f32 %v1552_v17, %v1522_v12  ;;  %v2179_v35 = vpack.c.bf16 %v2376_v31, %v2375_v21  ;;  %v2174_v38 = vpack.c.bf16 %v775_v36, %v772_v27  ;;  %v1483_v39 = vadd.f32 %v1482_v28, %v775_v36 }
 0x124   : > { %2299 = vst [vmem:[%s2701_s14 + $0x70] sm:$0xff] %v2264_v24   ;;  %v1600_v33 = vadd.f32 %v2413_v6, %v1599_v25  ;;  %v1671_v34 = vadd.f32 %v1670_v23, %v1640_v26  ;;  %v1524_v40 = vmul.f32 %v775_v36, %v775_v36  ;;  %v1526_v48 = vmul.f32 %v2376_v31, %v2376_v31 }
 0x125   : > { %v1554_v37 = vadd.f32 %v1553_v30, %v1523_v29  ;;  %2283 = vst [vmem:[%s2710_s16 + $0x68] sm:$0xff] %v2179_v35   ;;  %2282 = vst [vmem:[%s2710_s16 + $0x60] sm:$0xff] %v2174_v38   ;;  %v1484_v44 = vadd.f32 %v2375_v21, %v1483_v39  ;;  %v1458_v30 = vld [vmem:[%s2688_s25] sm:$0x1] }
 0x126   : > { %v1601_v41 = vadd.f32 %v2414_v16, %v1600_v33  ;;  %v1672_v42 = vadd.f32 %v1671_v34, %v1641_v18  ;;  %v2379_v50 = vpop.f32.mrb[28].mxu0  ;;  %v1610_v16 = vld [vmem:[%s2681_s21] sm:$0x1] }
 0x127   : > { %v1555_v45 = vadd.f32 %v1554_v37, %v1524_v40  ;;  %v1485_v51 = vadd.f32 %v2376_v31, %v1484_v44  ;;  %v788_v54 = vpop.f32.mrb[29].mxu0  ;;  %v1529_v5 = vmul.f32 %v2379_v50, %v2379_v50  ;;  %v1498_v33 = vld [vmem:[%s2693_s28] sm:$0x1] }
 0x128   : > { %v1602_v46 = vrot.slane %v1601_v41, 4  ;;  %v1673_v47 = vadd.f32 %v1672_v42, %v1642_v32  ;;  %v1527_v56 = vmul.f32 %v788_v54, %v788_v54  ;;  %v2380_v58 = vpop.f32.mrb[30].mxu0 }
 0x129   : > { %v1556_v49 = vadd.f32 %v1555_v45, %v1525_v43  ;;  %v1486_v55 = vadd.f32 %v1485_v51, %v788_v54  ;;  %v2189_v61 = vpack.c.bf16 %v2380_v58, %v2379_v50  ;;  %v791_v62 = vpop.f32.mrb[31].mxu0  ;;  %v1530_v11 = vmul.f32 %v2380_v58, %v2380_v58 }
 0x12a   : > { %v1603_v52 = vadd.f32 %v1602_v46, %v1601_v41  ;;  %v1674_v53 = vrot.slane %v1673_v47, 4  ;;  %v2184_v0 = vpack.c.bf16 %v791_v62, %v788_v54  ;;  %v1528_v2 = vmul.f32 %v791_v62, %v791_v62 }
 0x12b   : > { %v1557_v57 = vadd.f32 %v1556_v49, %v1526_v48  ;;  %v1487_v1 = vadd.f32 %v1486_v55, %v791_v62  ;;  %2285 = vst [vmem:[%s2710_s16 + $0x78] sm:$0xff] %v2189_v61  }
 0x12c   : > { %v1604_v59 = vrot.slane %v1603_v52, 2  ;;  %v1675_v60 = vadd.f32 %v1674_v53, %v1673_v47  ;;  %2284 = vst [vmem:[%s2710_s16 + $0x70] sm:$0xff] %v2184_v0  }
 0x12d   : > { %v1558_v63 = vadd.f32 %v1557_v57, %v1527_v56  ;;  %v1488_v6 = vadd.f32 %v2379_v50, %v1487_v1 }
 0x12e   : > { %v1605_v3 = vadd.f32 %v1604_v59, %v1603_v52  ;;  %v1676_v4 = vrot.slane %v1675_v60, 2 }
 0x12f   : > { %v1559_v7 = vadd.f32 %v1558_v63, %v1528_v2  ;;  %v1489_v12 = vadd.f32 %v2380_v58, %v1488_v6 }
 0x130   : > { %v1606_v8 = vrot.slane %v1605_v3, 1  ;;  %v1677_v9 = vadd.f32 %v1676_v4, %v1675_v60 }
 0x131   : > { %v1560_v13 = vadd.f32 %v1559_v7, %v1529_v5  ;;  %v1490_v17 = vrot.slane %v1489_v12, 4 }
 0x132   : > { %v1607_v14 = vadd.f32 %v1606_v8, %v1605_v3  ;;  %v1678_v15 = vrot.slane %v1677_v9, 1 }
 0x133   : > { %v1561_v18 = vadd.f32 %v1560_v13, %v1530_v11  ;;  %v1491_v21 = vadd.f32 %v1490_v17, %v1489_v12 }
 0x134   : > { %v1608_v19 = vadd.f32 %v1607_v14, %v1570_v10  ;;  %v1679_v20 = vadd.f32 %v1678_v15, %v1677_v9 }
 0x135   : > { %v1562_v22 = vrot.slane %v1561_v18, 4  ;;  %v1492_v24 = vrot.slane %v1491_v21, 2 }
 0x136   : > { %1609 = vst [vmem:[%s2676_s18] sm:$0x1] %v1608_v19  ;;  %v1680_v23 = vadd.f32 %v1679_v20, %v1610_v16 }
 0x137   : > { %v1563_v25 = vadd.f32 %v1562_v22, %v1561_v18  ;;  %v1493_v26 = vadd.f32 %v1492_v24, %v1491_v21 }
 0x138   : > { %1681 = vst [vmem:[%s2681_s21] sm:$0x1] %v1680_v23 }
 0x139   : > { %v1564_v27 = vrot.slane %v1563_v25, 2  ;;  %v1494_v28 = vrot.slane %v1493_v26, 1 }
 0x13b   : > { %v1565_v29 = vadd.f32 %v1564_v27, %v1563_v25  ;;  %v1495_v31 = vadd.f32 %v1494_v28, %v1493_v26 }
 0x13d   : > { %v1566_v32 = vrot.slane %v1565_v29, 1  ;;  %v1496_v34 = vadd.f32 %v1495_v31, %v1458_v30 }
 0x13f   : > { %v1567_v35 = vadd.f32 %v1566_v32, %v1565_v29  ;;  %1497 = vst [vmem:[%s2688_s25] sm:$0x1] %v1496_v34 }
 0x141   : > { %v1568_v36 = vadd.f32 %v1567_v35, %v1498_v33 }
 0x143   : > { %1569 = vst [vmem:[%s2693_s28] sm:$0x1] %v1568_v36 }
 0x144 PF: > { %s20_s11 = sadd.s32 1, %s2501_s11   ;;  %s2768_s30 = smov %s2497_s10 }
 0x145   : > { %p17_p6 = scmp.ge.s32.totalorder %s20_s11, 4   ;;  %s2769_s10 = smov %s2771_s12 }
 0x147   :  { %19 = sbr.rel (!%p17_p6) target bundleno = 2 (0x2), region = 133 }

</bundles_post_ra>
